<compile_context>
chip_gen: v7x
topology: tpu7x:2x2x1
jax: 0.10.0
libtpu: 0.0.40
codegen_flags: <defaults>
</compile_context>

<pallas_src>
import jax
import jax.numpy as jnp
from jax.experimental import pallas as pl
from jax.experimental.pallas import tpu as pltpu

HIDDEN = 16
BATCH = 2
STEPS = 64


def _lstm_decoder_kernel(x_ref, w_ih_t_ref, w_hh_t_ref, b_ref,
                         wd_row_ref, bd_ref, out_ref, hs_scr):
    """64 unrolled LSTM steps + deferred lane-dense dense(1) + sigmoid.

    x_ref       : (B, H)        initial hidden state == input at every step
    w_ih_t_ref  : (H, 4H)       input->gates weights (transposed)
    w_hh_t_ref  : (H, 4H)       hidden->gates weights (transposed)
    b_ref       : (1, 4H)       b_ih + b_hh
    wd_row_ref  : (1, H)        dense weights (row vector, PyTorch layout)
    bd_ref      : (1, 1)        dense bias
    out_ref     : (1, T*B)      sigmoid probabilities (lane-dense; reshaped outside)
    hs_scr      : (T*B, H)      VMEM scratch holding every h_t for the deferred head
    """
    B, H = x_ref.shape
    x = x_ref[...]

    # Hoisted loads — these stay register/VMEM-resident for all 64 steps.
    w_hh = w_hh_t_ref[...]            # (H, 4H)
    wd_row = wd_row_ref[...]          # (1, H)
    bd = bd_ref[...]                  # (1, 1)

    # Input contribution is identical for every timestep -> compute once.
    pre_x = jnp.dot(x, w_ih_t_ref[...],
                    precision=jax.lax.Precision.DEFAULT,
                    preferred_element_type=jnp.float32) + b_ref[...]   # (B, 4H)

    # Recurrent state lives in vregs (one padded vreg each), not VMEM.
    h = x                             # h_0 = final_hidden_state
    c = jnp.zeros_like(x)             # c_0 = 0

    # Fully-unrolled recurrence: static trip count (64), tiny live state
    # (h, c, weights, pre_x — a handful of vregs), static scratch offsets.
    for t in range(STEPS):
        # Single-pass MXU matmul on the critical path (DEFAULT precision).
        gates = pre_x + jnp.dot(h, w_hh,
                                precision=jax.lax.Precision.DEFAULT,
                                preferred_element_type=jnp.float32)    # (B, 4H)
        # One EUP pass each over the whole gates vreg, then slice.
        s_all = jax.nn.sigmoid(gates)
        t_all = jnp.tanh(gates)
        # PyTorch gate order: i, f, g, o
        i_g = s_all[:, 0 * H:1 * H]
        f_g = s_all[:, 1 * H:2 * H]
        g_g = t_all[:, 2 * H:3 * H]
        o_g = s_all[:, 3 * H:4 * H]

        c = f_g * c + i_g * g_g
        h = o_g * jnp.tanh(c)

        # Off-critical-path snapshot of h_t for the deferred dense head
        # (static offsets; vst slots have plenty of slack).
        # TODO(synk): optionally coalesce 4 steps (8 sublane-aligned rows) per store.
        hs_scr[pl.ds(t * B, B), :] = h

    # Deferred, lane-dense dense head:
    #   (1,H) . (T*B,H)^T -> (1, T*B=128): one MXU push, one pop, one EUP
    #   sigmoid pass, one unmasked 128-lane store.
    hs = hs_scr[...]                                                   # (T*B, H)
    logits = jax.lax.dot_general(
        wd_row, hs,
        dimension_numbers=(((1,), (1,)), ((), ())),                    # A @ B^T
        precision=jax.lax.Precision.DEFAULT,
        preferred_element_type=jnp.float32) + bd                       # (1, T*B)
    out_ref[...] = jax.nn.sigmoid(logits)


def decoder_forward(final_hidden_state, params):
    """final_hidden_state: (1, B, H) float32 -> (T, B, 1) float32.

    Note: latency is unchanged up to B=8 (f32 sublanes); batching multiple
    decode requests into B before this call is the biggest system-level win.
    """
    x = jnp.squeeze(final_hidden_state, axis=0)             # (B, H)
    B, H = x.shape

    w_ih, w_hh, b_ih, b_hh, w_dense, b_dense = params
    w_ih_t = jnp.transpose(w_ih)                            # (H, 4H)
    w_hh_t = jnp.transpose(w_hh)                            # (H, 4H)
    b = (b_ih + b_hh).reshape(1, 4 * H)                     # (1, 4H)
    wd_row = w_dense.reshape(1, H)                          # (1, H)  PyTorch layout
    bd = b_dense.reshape(1, 1)                              # (1, 1)

    vmem = pl.BlockSpec(memory_space=pltpu.MemorySpace.VMEM)

    # Advisory cost hint so XLA schedules this micro-kernel sensibly.
    cost = pl.CostEstimate(
        flops=(2 * (STEPS + 1) * B * 4 * H * H          # recurrent + pre_x dots
               + 2 * H * STEPS * B                       # dense head
               + 6 * STEPS * B * H),                     # elementwise LSTM math
        transcendentals=STEPS * B * (2 * 4 * H + H) + STEPS * B,
        bytes_accessed=4 * (B * H + 2 * H * 4 * H + 4 * H + H + 1
                            + 2 * STEPS * B * H + STEPS * B),
    )

    flat = pl.pallas_call(
        _lstm_decoder_kernel,
        out_shape=jax.ShapeDtypeStruct((1, STEPS * B), jnp.float32),   # lane-dense
        in_specs=[vmem] * 6,
        out_specs=vmem,
        scratch_shapes=[
            pltpu.VMEM((STEPS * B, H), jnp.float32),   # all h_t for deferred head
        ],
        cost_estimate=cost,
    )(x, w_ih_t, w_hh_t, b, wd_row, bd)

    # (1, T*B) -> (T, B, 1): element (t, b) lives at lane t*B + b.
    return flat.reshape(STEPS, B, 1)


def init_params(key, hidden_size=HIDDEN):
    """Deterministic synthetic parameters (PyTorch-style uniform init)."""
    H = hidden_size
    bound = 1.0 / jnp.sqrt(jnp.float32(H))
    ks = jax.random.split(key, 6)
    w_ih = jax.random.uniform(ks[0], (4 * H, H), jnp.float32, -bound, bound)
    w_hh = jax.random.uniform(ks[1], (4 * H, H), jnp.float32, -bound, bound)
    b_ih = jax.random.uniform(ks[2], (4 * H,), jnp.float32, -bound, bound)
    b_hh = jax.random.uniform(ks[3], (4 * H,), jnp.float32, -bound, bound)
    w_dense = jax.random.uniform(ks[4], (1, H), jnp.float32, -bound, bound)
    b_dense = jax.random.uniform(ks[5], (1,), jnp.float32, -bound, bound)
    return (w_ih, w_hh, b_ih, b_hh, w_dense, b_dense)


def decoder_reference(final_hidden_state, params):
    """Pure-JAX reference matching torch.nn.LSTM semantics (for validation)."""
    w_ih, w_hh, b_ih, b_hh, w_dense, b_dense = params
    x = jnp.squeeze(final_hidden_state, axis=0)
    H = x.shape[1]
    h = x
    c = jnp.zeros_like(x)
    outs = []
    for _ in range(STEPS):
        gates = x @ w_ih.T + b_ih + h @ w_hh.T + b_hh
        i = jax.nn.sigmoid(gates[:, 0 * H:1 * H])
        f = jax.nn.sigmoid(gates[:, 1 * H:2 * H])
        g = jnp.tanh(gates[:, 2 * H:3 * H])
        o = jax.nn.sigmoid(gates[:, 3 * H:4 * H])
        c = f * c + i * g
        h = o * jnp.tanh(c)
        outs.append(jax.nn.sigmoid(h @ w_dense.T + b_dense))
    return jnp.stack(outs, axis=0)  # (T, B, 1)


if __name__ == "__main__":
    key = jax.random.PRNGKey(0)
    k_param, k_input = jax.random.split(key)

    params = init_params(k_param, HIDDEN)
    final_hidden_state = jax.random.normal(k_input, (1, BATCH, HIDDEN), jnp.float32)

    probs = decoder_forward(final_hidden_state, params)
    probs = jax.block_until_ready(probs)

    ref = decoder_reference(final_hidden_state, params)
    assert probs.shape == (STEPS, BATCH, 1), probs.shape
    assert jnp.allclose(probs, ref, atol=1e-4, rtol=1e-4), "mismatch vs reference"

    print("KERNEL_OK")
</pallas_src>

<mosaic_0001>
module attributes {stable_mosaic.version = 11 : i64} {
  func.func @_lstm_decoder_kernel(%arg0: memref<2x16xf32, #tpu.memory_space<vmem>>, %arg1: memref<16x64xf32, #tpu.memory_space<vmem>>, %arg2: memref<16x64xf32, #tpu.memory_space<vmem>>, %arg3: memref<1x64xf32, #tpu.memory_space<vmem>>, %arg4: memref<1x16xf32, #tpu.memory_space<vmem>>, %arg5: memref<1x1xf32, #tpu.memory_space<vmem>>, %arg6: memref<1x128xf32, #tpu.memory_space<vmem>>, %arg7: memref<128x16xf32, #tpu.memory_space<vmem>>) attributes {dimension_semantics = [], scalar_prefetch = 0 : i64, scratch_operands = 1 : i64, tpu.core_type = #tpu.core_type<tc>} {
    %c0 = arith.constant 0 : index
    %c0_0 = arith.constant 0 : index
    %0 = vector.load %arg0[%c0, %c0_0] : memref<2x16xf32, #tpu.memory_space<vmem>>, vector<2x16xf32>
    %c0_1 = arith.constant 0 : index
    %c0_2 = arith.constant 0 : index
    %1 = vector.load %arg2[%c0_1, %c0_2] : memref<16x64xf32, #tpu.memory_space<vmem>>, vector<16x64xf32>
    %c0_3 = arith.constant 0 : index
    %c0_4 = arith.constant 0 : index
    %2 = vector.load %arg4[%c0_3, %c0_4] : memref<1x16xf32, #tpu.memory_space<vmem>>, vector<1x16xf32>
    %c0_5 = arith.constant 0 : index
    %c0_6 = arith.constant 0 : index
    %3 = vector.load %arg5[%c0_5, %c0_6] : memref<1x1xf32, #tpu.memory_space<vmem>>, vector<1x1xf32>
    %c0_7 = arith.constant 0 : index
    %c0_8 = arith.constant 0 : index
    %4 = vector.load %arg1[%c0_7, %c0_8] : memref<16x64xf32, #tpu.memory_space<vmem>>, vector<16x64xf32>
    %cst = arith.constant dense<0.000000e+00> : vector<2x64xf32>
    %5 = tpu.matmul %0, %4, %cst {dimension_numbers = #tpu.dot_dimension_numbers<[1], [0], [0], [1], [0, 0, 1, 1], [], []>} : vector<2x16xf32>, vector<16x64xf32>, vector<2x64xf32> -> vector<2x64xf32>
    %c0_9 = arith.constant 0 : index
    %c0_10 = arith.constant 0 : index
    %6 = vector.load %arg3[%c0_9, %c0_10] : memref<1x64xf32, #tpu.memory_space<vmem>>, vector<1x64xf32>
    %7 = vector.broadcast %6 : vector<1x64xf32> to vector<2x64xf32>
    %8 = arith.addf %5, %7 : vector<2x64xf32>
    %cst_11 = arith.constant 0.000000e+00 : f32
    %9 = vector.broadcast %cst_11 : f32 to vector<2x16xf32>
    %cst_12 = arith.constant dense<0.000000e+00> : vector<2x64xf32>
    %10 = tpu.matmul %0, %1, %cst_12 {dimension_numbers = #tpu.dot_dimension_numbers<[1], [0], [0], [1], [0, 0, 1, 1], [], []>} : vector<2x16xf32>, vector<16x64xf32>, vector<2x64xf32> -> vector<2x64xf32>
    %11 = arith.addf %8, %10 : vector<2x64xf32>
    %12 = arith.negf %11 : vector<2x64xf32>
    %13 = math.exp %12 : vector<2x64xf32>
    %cst_13 = arith.constant 1.000000e+00 : f32
    %14 = vector.broadcast %cst_13 : f32 to vector<2x64xf32>
    %15 = arith.addf %14, %13 : vector<2x64xf32>
    %16 = arith.divf %14, %15 : vector<2x64xf32>
    %17 = math.tanh %11 : vector<2x64xf32>
    %18 = vector.extract_strided_slice %16 {offsets = [0, 0], sizes = [2, 16], strides = [1, 1]} : vector<2x64xf32> to vector<2x16xf32>
    %19 = vector.extract_strided_slice %16 {offsets = [0, 16], sizes = [2, 16], strides = [1, 1]} : vector<2x64xf32> to vector<2x16xf32>
    %20 = vector.extract_strided_slice %17 {offsets = [0, 32], sizes = [2, 16], strides = [1, 1]} : vector<2x64xf32> to vector<2x16xf32>
    %21 = vector.extract_strided_slice %16 {offsets = [0, 48], sizes = [2, 16], strides = [1, 1]} : vector<2x64xf32> to vector<2x16xf32>
    %22 = arith.mulf %19, %9 : vector<2x16xf32>
    %23 = arith.mulf %18, %20 : vector<2x16xf32>
    %24 = arith.addf %22, %23 : vector<2x16xf32>
    %25 = math.tanh %24 : vector<2x16xf32>
    %26 = arith.mulf %21, %25 : vector<2x16xf32>
    %c0_14 = arith.constant 0 : index
    %c0_15 = arith.constant 0 : index
    %27 = vector.load %arg7[%c0_14, %c0_15] : memref<128x16xf32, #tpu.memory_space<vmem>>, vector<2x16xf32>
    tpu.vector_store %arg7[%c0_14, %c0_15], %26 {strides = array<i32>} : memref<128x16xf32, #tpu.memory_space<vmem>>, vector<2x16xf32>,
    %cst_16 = arith.constant dense<0.000000e+00> : vector<2x64xf32>
    %28 = tpu.matmul %26, %1, %cst_16 {dimension_numbers = #tpu.dot_dimension_numbers<[1], [0], [0], [1], [0, 0, 1, 1], [], []>} : vector<2x16xf32>, vector<16x64xf32>, vector<2x64xf32> -> vector<2x64xf32>
    %29 = arith.addf %8, %28 : vector<2x64xf32>
    %30 = arith.negf %29 : vector<2x64xf32>
    %31 = math.exp %30 : vector<2x64xf32>
    %cst_17 = arith.constant 1.000000e+00 : f32
    %32 = vector.broadcast %cst_17 : f32 to vector<2x64xf32>
    %33 = arith.addf %32, %31 : vector<2x64xf32>
    %34 = arith.divf %32, %33 : vector<2x64xf32>
    %35 = math.tanh %29 : vector<2x64xf32>
    %36 = vector.extract_strided_slice %34 {offsets = [0, 0], sizes = [2, 16], strides = [1, 1]} : vector<2x64xf32> to vector<2x16xf32>
    %37 = vector.extract_strided_slice %34 {offsets = [0, 16], sizes = [2, 16], strides = [1, 1]} : vector<2x64xf32> to vector<2x16xf32>
    %38 = vector.extract_strided_slice %35 {offsets = [0, 32], sizes = [2, 16], strides = [1, 1]} : vector<2x64xf32> to vector<2x16xf32>
    %39 = vector.extract_strided_slice %34 {offsets = [0, 48], sizes = [2, 16], strides = [1, 1]} : vector<2x64xf32> to vector<2x16xf32>
    %40 = arith.mulf %37, %24 : vector<2x16xf32>
    %41 = arith.mulf %36, %38 : vector<2x16xf32>
    %42 = arith.addf %40, %41 : vector<2x16xf32>
    %43 = math.tanh %42 : vector<2x16xf32>
    %44 = arith.mulf %39, %43 : vector<2x16xf32>
    %c2 = arith.constant 2 : index
    %c0_18 = arith.constant 0 : index
    %45 = vector.load %arg7[%c2, %c0_18] : memref<128x16xf32, #tpu.memory_space<vmem>>, vector<2x16xf32>
    tpu.vector_store %arg7[%c2, %c0_18], %44 {strides = array<i32>} : memref<128x16xf32, #tpu.memory_space<vmem>>, vector<2x16xf32>,
    %cst_19 = arith.constant dense<0.000000e+00> : vector<2x64xf32>
    %46 = tpu.matmul %44, %1, %cst_19 {dimension_numbers = #tpu.dot_dimension_numbers<[1], [0], [0], [1], [0, 0, 1, 1], [], []>} : vector<2x16xf32>, vector<16x64xf32>, vector<2x64xf32> -> vector<2x64xf32>
    %47 = arith.addf %8, %46 : vector<2x64xf32>
    %48 = arith.negf %47 : vector<2x64xf32>
    %49 = math.exp %48 : vector<2x64xf32>
    %cst_20 = arith.constant 1.000000e+00 : f32
    %50 = vector.broadcast %cst_20 : f32 to vector<2x64xf32>
    %51 = arith.addf %50, %49 : vector<2x64xf32>
    %52 = arith.divf %50, %51 : vector<2x64xf32>
    %53 = math.tanh %47 : vector<2x64xf32>
    %54 = vector.extract_strided_slice %52 {offsets = [0, 0], sizes = [2, 16], strides = [1, 1]} : vector<2x64xf32> to vector<2x16xf32>
    %55 = vector.extract_strided_slice %52 {offsets = [0, 16], sizes = [2, 16], strides = [1, 1]} : vector<2x64xf32> to vector<2x16xf32>
    %56 = vector.extract_strided_slice %53 {offsets = [0, 32], sizes = [2, 16], strides = [1, 1]} : vector<2x64xf32> to vector<2x16xf32>
    %57 = vector.extract_strided_slice %52 {offsets = [0, 48], sizes = [2, 16], strides = [1, 1]} : vector<2x64xf32> to vector<2x16xf32>
    %58 = arith.mulf %55, %42 : vector<2x16xf32>
    %59 = arith.mulf %54, %56 : vector<2x16xf32>
    %60 = arith.addf %58, %59 : vector<2x16xf32>
    %61 = math.tanh %60 : vector<2x16xf32>
    %62 = arith.mulf %57, %61 : vector<2x16xf32>
    %c4 = arith.constant 4 : index
    %c0_21 = arith.constant 0 : index
    %63 = vector.load %arg7[%c4, %c0_21] : memref<128x16xf32, #tpu.memory_space<vmem>>, vector<2x16xf32>
    tpu.vector_store %arg7[%c4, %c0_21], %62 {strides = array<i32>} : memref<128x16xf32, #tpu.memory_space<vmem>>, vector<2x16xf32>,
    %cst_22 = arith.constant dense<0.000000e+00> : vector<2x64xf32>
    %64 = tpu.matmul %62, %1, %cst_22 {dimension_numbers = #tpu.dot_dimension_numbers<[1], [0], [0], [1], [0, 0, 1, 1], [], []>} : vector<2x16xf32>, vector<16x64xf32>, vector<2x64xf32> -> vector<2x64xf32>
    %65 = arith.addf %8, %64 : vector<2x64xf32>
    %66 = arith.negf %65 : vector<2x64xf32>
    %67 = math.exp %66 : vector<2x64xf32>
    %cst_23 = arith.constant 1.000000e+00 : f32
    %68 = vector.broadcast %cst_23 : f32 to vector<2x64xf32>
    %69 = arith.addf %68, %67 : vector<2x64xf32>
    %70 = arith.divf %68, %69 : vector<2x64xf32>
    %71 = math.tanh %65 : vector<2x64xf32>
    %72 = vector.extract_strided_slice %70 {offsets = [0, 0], sizes = [2, 16], strides = [1, 1]} : vector<2x64xf32> to vector<2x16xf32>
    %73 = vector.extract_strided_slice %70 {offsets = [0, 16], sizes = [2, 16], strides = [1, 1]} : vector<2x64xf32> to vector<2x16xf32>
    %74 = vector.extract_strided_slice %71 {offsets = [0, 32], sizes = [2, 16], strides = [1, 1]} : vector<2x64xf32> to vector<2x16xf32>
    %75 = vector.extract_strided_slice %70 {offsets = [0, 48], sizes = [2, 16], strides = [1, 1]} : vector<2x64xf32> to vector<2x16xf32>
    %76 = arith.mulf %73, %60 : vector<2x16xf32>
    %77 = arith.mulf %72, %74 : vector<2x16xf32>
    %78 = arith.addf %76, %77 : vector<2x16xf32>
    %79 = math.tanh %78 : vector<2x16xf32>
    %80 = arith.mulf %75, %79 : vector<2x16xf32>
    %c6 = arith.constant 6 : index
    %c0_24 = arith.constant 0 : index
    %81 = vector.load %arg7[%c6, %c0_24] : memref<128x16xf32, #tpu.memory_space<vmem>>, vector<2x16xf32>
    tpu.vector_store %arg7[%c6, %c0_24], %80 {strides = array<i32>} : memref<128x16xf32, #tpu.memory_space<vmem>>, vector<2x16xf32>,
    %cst_25 = arith.constant dense<0.000000e+00> : vector<2x64xf32>
    %82 = tpu.matmul %80, %1, %cst_25 {dimension_numbers = #tpu.dot_dimension_numbers<[1], [0], [0], [1], [0, 0, 1, 1], [], []>} : vector<2x16xf32>, vector<16x64xf32>, vector<2x64xf32> -> vector<2x64xf32>
    %83 = arith.addf %8, %82 : vector<2x64xf32>
    %84 = arith.negf %83 : vector<2x64xf32>
    %85 = math.exp %84 : vector<2x64xf32>
    %cst_26 = arith.constant 1.000000e+00 : f32
    %86 = vector.broadcast %cst_26 : f32 to vector<2x64xf32>
    %87 = arith.addf %86, %85 : vector<2x64xf32>
    %88 = arith.divf %86, %87 : vector<2x64xf32>
    %89 = math.tanh %83 : vector<2x64xf32>
    %90 = vector.extract_strided_slice %88 {offsets = [0, 0], sizes = [2, 16], strides = [1, 1]} : vector<2x64xf32> to vector<2x16xf32>
    %91 = vector.extract_strided_slice %88 {offsets = [0, 16], sizes = [2, 16], strides = [1, 1]} : vector<2x64xf32> to vector<2x16xf32>
    %92 = vector.extract_strided_slice %89 {offsets = [0, 32], sizes = [2, 16], strides = [1, 1]} : vector<2x64xf32> to vector<2x16xf32>
    %93 = vector.extract_strided_slice %88 {offsets = [0, 48], sizes = [2, 16], strides = [1, 1]} : vector<2x64xf32> to vector<2x16xf32>
    %94 = arith.mulf %91, %78 : vector<2x16xf32>
    %95 = arith.mulf %90, %92 : vector<2x16xf32>
    %96 = arith.addf %94, %95 : vector<2x16xf32>
    %97 = math.tanh %96 : vector<2x16xf32>
    %98 = arith.mulf %93, %97 : vector<2x16xf32>
    %c8 = arith.constant 8 : index
    %c0_27 = arith.constant 0 : index
    %99 = vector.load %arg7[%c8, %c0_27] : memref<128x16xf32, #tpu.memory_space<vmem>>, vector<2x16xf32>
    tpu.vector_store %arg7[%c8, %c0_27], %98 {strides = array<i32>} : memref<128x16xf32, #tpu.memory_space<vmem>>, vector<2x16xf32>,
    %cst_28 = arith.constant dense<0.000000e+00> : vector<2x64xf32>
    %100 = tpu.matmul %98, %1, %cst_28 {dimension_numbers = #tpu.dot_dimension_numbers<[1], [0], [0], [1], [0, 0, 1, 1], [], []>} : vector<2x16xf32>, vector<16x64xf32>, vector<2x64xf32> -> vector<2x64xf32>
    %101 = arith.addf %8, %100 : vector<2x64xf32>
    %102 = arith.negf %101 : vector<2x64xf32>
    %103 = math.exp %102 : vector<2x64xf32>
    %cst_29 = arith.constant 1.000000e+00 : f32
    %104 = vector.broadcast %cst_29 : f32 to vector<2x64xf32>
    %105 = arith.addf %104, %103 : vector<2x64xf32>
    %106 = arith.divf %104, %105 : vector<2x64xf32>
    %107 = math.tanh %101 : vector<2x64xf32>
    %108 = vector.extract_strided_slice %106 {offsets = [0, 0], sizes = [2, 16], strides = [1, 1]} : vector<2x64xf32> to vector<2x16xf32>
    %109 = vector.extract_strided_slice %106 {offsets = [0, 16], sizes = [2, 16], strides = [1, 1]} : vector<2x64xf32> to vector<2x16xf32>
    %110 = vector.extract_strided_slice %107 {offsets = [0, 32], sizes = [2, 16], strides = [1, 1]} : vector<2x64xf32> to vector<2x16xf32>
    %111 = vector.extract_strided_slice %106 {offsets = [0, 48], sizes = [2, 16], strides = [1, 1]} : vector<2x64xf32> to vector<2x16xf32>
    %112 = arith.mulf %109, %96 : vector<2x16xf32>
    %113 = arith.mulf %108, %110 : vector<2x16xf32>
    %114 = arith.addf %112, %113 : vector<2x16xf32>
    %115 = math.tanh %114 : vector<2x16xf32>
    %116 = arith.mulf %111, %115 : vector<2x16xf32>
    %c10 = arith.constant 10 : index
    %c0_30 = arith.constant 0 : index
    %117 = vector.load %arg7[%c10, %c0_30] : memref<128x16xf32, #tpu.memory_space<vmem>>, vector<2x16xf32>
    tpu.vector_store %arg7[%c10, %c0_30], %116 {strides = array<i32>} : memref<128x16xf32, #tpu.memory_space<vmem>>, vector<2x16xf32>,
    %cst_31 = arith.constant dense<0.000000e+00> : vector<2x64xf32>
    %118 = tpu.matmul %116, %1, %cst_31 {dimension_numbers = #tpu.dot_dimension_numbers<[1], [0], [0], [1], [0, 0, 1, 1], [], []>} : vector<2x16xf32>, vector<16x64xf32>, vector<2x64xf32> -> vector<2x64xf32>
    %119 = arith.addf %8, %118 : vector<2x64xf32>
    %120 = arith.negf %119 : vector<2x64xf32>
    %121 = math.exp %120 : vector<2x64xf32>
    %cst_32 = arith.constant 1.000000e+00 : f32
    %122 = vector.broadcast %cst_32 : f32 to vector<2x64xf32>
    %123 = arith.addf %122, %121 : vector<2x64xf32>
    %124 = arith.divf %122, %123 : vector<2x64xf32>
    %125 = math.tanh %119 : vector<2x64xf32>
    %126 = vector.extract_strided_slice %124 {offsets = [0, 0], sizes = [2, 16], strides = [1, 1]} : vector<2x64xf32> to vector<2x16xf32>
    %127 = vector.extract_strided_slice %124 {offsets = [0, 16], sizes = [2, 16], strides = [1, 1]} : vector<2x64xf32> to vector<2x16xf32>
    %128 = vector.extract_strided_slice %125 {offsets = [0, 32], sizes = [2, 16], strides = [1, 1]} : vector<2x64xf32> to vector<2x16xf32>
    %129 = vector.extract_strided_slice %124 {offsets = [0, 48], sizes = [2, 16], strides = [1, 1]} : vector<2x64xf32> to vector<2x16xf32>
    %130 = arith.mulf %127, %114 : vector<2x16xf32>
    %131 = arith.mulf %126, %128 : vector<2x16xf32>
    %132 = arith.addf %130, %131 : vector<2x16xf32>
    %133 = math.tanh %132 : vector<2x16xf32>
    %134 = arith.mulf %129, %133 : vector<2x16xf32>
    %c12 = arith.constant 12 : index
    %c0_33 = arith.constant 0 : index
    %135 = vector.load %arg7[%c12, %c0_33] : memref<128x16xf32, #tpu.memory_space<vmem>>, vector<2x16xf32>
    tpu.vector_store %arg7[%c12, %c0_33], %134 {strides = array<i32>} : memref<128x16xf32, #tpu.memory_space<vmem>>, vector<2x16xf32>,
    %cst_34 = arith.constant dense<0.000000e+00> : vector<2x64xf32>
    %136 = tpu.matmul %134, %1, %cst_34 {dimension_numbers = #tpu.dot_dimension_numbers<[1], [0], [0], [1], [0, 0, 1, 1], [], []>} : vector<2x16xf32>, vector<16x64xf32>, vector<2x64xf32> -> vector<2x64xf32>
    %137 = arith.addf %8, %136 : vector<2x64xf32>
    %138 = arith.negf %137 : vector<2x64xf32>
    %139 = math.exp %138 : vector<2x64xf32>
    %cst_35 = arith.constant 1.000000e+00 : f32
    %140 = vector.broadcast %cst_35 : f32 to vector<2x64xf32>
    %141 = arith.addf %140, %139 : vector<2x64xf32>
    %142 = arith.divf %140, %141 : vector<2x64xf32>
    %143 = math.tanh %137 : vector<2x64xf32>
    %144 = vector.extract_strided_slice %142 {offsets = [0, 0], sizes = [2, 16], strides = [1, 1]} : vector<2x64xf32> to vector<2x16xf32>
    %145 = vector.extract_strided_slice %142 {offsets = [0, 16], sizes = [2, 16], strides = [1, 1]} : vector<2x64xf32> to vector<2x16xf32>
    %146 = vector.extract_strided_slice %143 {offsets = [0, 32], sizes = [2, 16], strides = [1, 1]} : vector<2x64xf32> to vector<2x16xf32>
    %147 = vector.extract_strided_slice %142 {offsets = [0, 48], sizes = [2, 16], strides = [1, 1]} : vector<2x64xf32> to vector<2x16xf32>
    %148 = arith.mulf %145, %132 : vector<2x16xf32>
    %149 = arith.mulf %144, %146 : vector<2x16xf32>
    %150 = arith.addf %148, %149 : vector<2x16xf32>
    %151 = math.tanh %150 : vector<2x16xf32>
    %152 = arith.mulf %147, %151 : vector<2x16xf32>
    %c14 = arith.constant 14 : index
    %c0_36 = arith.constant 0 : index
    %153 = vector.load %arg7[%c14, %c0_36] : memref<128x16xf32, #tpu.memory_space<vmem>>, vector<2x16xf32>
    tpu.vector_store %arg7[%c14, %c0_36], %152 {strides = array<i32>} : memref<128x16xf32, #tpu.memory_space<vmem>>, vector<2x16xf32>,
    %cst_37 = arith.constant dense<0.000000e+00> : vector<2x64xf32>
    %154 = tpu.matmul %152, %1, %cst_37 {dimension_numbers = #tpu.dot_dimension_numbers<[1], [0], [0], [1], [0, 0, 1, 1], [], []>} : vector<2x16xf32>, vector<16x64xf32>, vector<2x64xf32> -> vector<2x64xf32>
    %155 = arith.addf %8, %154 : vector<2x64xf32>
    %156 = arith.negf %155 : vector<2x64xf32>
    %157 = math.exp %156 : vector<2x64xf32>
    %cst_38 = arith.constant 1.000000e+00 : f32
    %158 = vector.broadcast %cst_38 : f32 to vector<2x64xf32>
    %159 = arith.addf %158, %157 : vector<2x64xf32>
    %160 = arith.divf %158, %159 : vector<2x64xf32>
    %161 = math.tanh %155 : vector<2x64xf32>
    %162 = vector.extract_strided_slice %160 {offsets = [0, 0], sizes = [2, 16], strides = [1, 1]} : vector<2x64xf32> to vector<2x16xf32>
    %163 = vector.extract_strided_slice %160 {offsets = [0, 16], sizes = [2, 16], strides = [1, 1]} : vector<2x64xf32> to vector<2x16xf32>
    %164 = vector.extract_strided_slice %161 {offsets = [0, 32], sizes = [2, 16], strides = [1, 1]} : vector<2x64xf32> to vector<2x16xf32>
    %165 = vector.extract_strided_slice %160 {offsets = [0, 48], sizes = [2, 16], strides = [1, 1]} : vector<2x64xf32> to vector<2x16xf32>
    %166 = arith.mulf %163, %150 : vector<2x16xf32>
    %167 = arith.mulf %162, %164 : vector<2x16xf32>
    %168 = arith.addf %166, %167 : vector<2x16xf32>
    %169 = math.tanh %168 : vector<2x16xf32>
    %170 = arith.mulf %165, %169 : vector<2x16xf32>
    %c16 = arith.constant 16 : index
    %c0_39 = arith.constant 0 : index
    %171 = vector.load %arg7[%c16, %c0_39] : memref<128x16xf32, #tpu.memory_space<vmem>>, vector<2x16xf32>
    tpu.vector_store %arg7[%c16, %c0_39], %170 {strides = array<i32>} : memref<128x16xf32, #tpu.memory_space<vmem>>, vector<2x16xf32>,
    %cst_40 = arith.constant dense<0.000000e+00> : vector<2x64xf32>
    %172 = tpu.matmul %170, %1, %cst_40 {dimension_numbers = #tpu.dot_dimension_numbers<[1], [0], [0], [1], [0, 0, 1, 1], [], []>} : vector<2x16xf32>, vector<16x64xf32>, vector<2x64xf32> -> vector<2x64xf32>
    %173 = arith.addf %8, %172 : vector<2x64xf32>
    %174 = arith.negf %173 : vector<2x64xf32>
    %175 = math.exp %174 : vector<2x64xf32>
    %cst_41 = arith.constant 1.000000e+00 : f32
    %176 = vector.broadcast %cst_41 : f32 to vector<2x64xf32>
    %177 = arith.addf %176, %175 : vector<2x64xf32>
    %178 = arith.divf %176, %177 : vector<2x64xf32>
    %179 = math.tanh %173 : vector<2x64xf32>
    %180 = vector.extract_strided_slice %178 {offsets = [0, 0], sizes = [2, 16], strides = [1, 1]} : vector<2x64xf32> to vector<2x16xf32>
    %181 = vector.extract_strided_slice %178 {offsets = [0, 16], sizes = [2, 16], strides = [1, 1]} : vector<2x64xf32> to vector<2x16xf32>
    %182 = vector.extract_strided_slice %179 {offsets = [0, 32], sizes = [2, 16], strides = [1, 1]} : vector<2x64xf32> to vector<2x16xf32>
    %183 = vector.extract_strided_slice %178 {offsets = [0, 48], sizes = [2, 16], strides = [1, 1]} : vector<2x64xf32> to vector<2x16xf32>
    %184 = arith.mulf %181, %168 : vector<2x16xf32>
    %185 = arith.mulf %180, %182 : vector<2x16xf32>
    %186 = arith.addf %184, %185 : vector<2x16xf32>
    %187 = math.tanh %186 : vector<2x16xf32>
    %188 = arith.mulf %183, %187 : vector<2x16xf32>
    %c18 = arith.constant 18 : index
    %c0_42 = arith.constant 0 : index
    %189 = vector.load %arg7[%c18, %c0_42] : memref<128x16xf32, #tpu.memory_space<vmem>>, vector<2x16xf32>
    tpu.vector_store %arg7[%c18, %c0_42], %188 {strides = array<i32>} : memref<128x16xf32, #tpu.memory_space<vmem>>, vector<2x16xf32>,
    %cst_43 = arith.constant dense<0.000000e+00> : vector<2x64xf32>
    %190 = tpu.matmul %188, %1, %cst_43 {dimension_numbers = #tpu.dot_dimension_numbers<[1], [0], [0], [1], [0, 0, 1, 1], [], []>} : vector<2x16xf32>, vector<16x64xf32>, vector<2x64xf32> -> vector<2x64xf32>
    %191 = arith.addf %8, %190 : vector<2x64xf32>
    %192 = arith.negf %191 : vector<2x64xf32>
    %193 = math.exp %192 : vector<2x64xf32>
    %cst_44 = arith.constant 1.000000e+00 : f32
    %194 = vector.broadcast %cst_44 : f32 to vector<2x64xf32>
    %195 = arith.addf %194, %193 : vector<2x64xf32>
    %196 = arith.divf %194, %195 : vector<2x64xf32>
    %197 = math.tanh %191 : vector<2x64xf32>
    %198 = vector.extract_strided_slice %196 {offsets = [0, 0], sizes = [2, 16], strides = [1, 1]} : vector<2x64xf32> to vector<2x16xf32>
    %199 = vector.extract_strided_slice %196 {offsets = [0, 16], sizes = [2, 16], strides = [1, 1]} : vector<2x64xf32> to vector<2x16xf32>
    %200 = vector.extract_strided_slice %197 {offsets = [0, 32], sizes = [2, 16], strides = [1, 1]} : vector<2x64xf32> to vector<2x16xf32>
    %201 = vector.extract_strided_slice %196 {offsets = [0, 48], sizes = [2, 16], strides = [1, 1]} : vector<2x64xf32> to vector<2x16xf32>
    %202 = arith.mulf %199, %186 : vector<2x16xf32>
    %203 = arith.mulf %198, %200 : vector<2x16xf32>
    %204 = arith.addf %202, %203 : vector<2x16xf32>
    %205 = math.tanh %204 : vector<2x16xf32>
    %206 = arith.mulf %201, %205 : vector<2x16xf32>
    %c20 = arith.constant 20 : index
    %c0_45 = arith.constant 0 : index
    %207 = vector.load %arg7[%c20, %c0_45] : memref<128x16xf32, #tpu.memory_space<vmem>>, vector<2x16xf32>
    tpu.vector_store %arg7[%c20, %c0_45], %206 {strides = array<i32>} : memref<128x16xf32, #tpu.memory_space<vmem>>, vector<2x16xf32>,
    %cst_46 = arith.constant dense<0.000000e+00> : vector<2x64xf32>
    %208 = tpu.matmul %206, %1, %cst_46 {dimension_numbers = #tpu.dot_dimension_numbers<[1], [0], [0], [1], [0, 0, 1, 1], [], []>} : vector<2x16xf32>, vector<16x64xf32>, vector<2x64xf32> -> vector<2x64xf32>
    %209 = arith.addf %8, %208 : vector<2x64xf32>
    %210 = arith.negf %209 : vector<2x64xf32>
    %211 = math.exp %210 : vector<2x64xf32>
    %cst_47 = arith.constant 1.000000e+00 : f32
    %212 = vector.broadcast %cst_47 : f32 to vector<2x64xf32>
    %213 = arith.addf %212, %211 : vector<2x64xf32>
    %214 = arith.divf %212, %213 : vector<2x64xf32>
    %215 = math.tanh %209 : vector<2x64xf32>
    %216 = vector.extract_strided_slice %214 {offsets = [0, 0], sizes = [2, 16], strides = [1, 1]} : vector<2x64xf32> to vector<2x16xf32>
    %217 = vector.extract_strided_slice %214 {offsets = [0, 16], sizes = [2, 16], strides = [1, 1]} : vector<2x64xf32> to vector<2x16xf32>
    %218 = vector.extract_strided_slice %215 {offsets = [0, 32], sizes = [2, 16], strides = [1, 1]} : vector<2x64xf32> to vector<2x16xf32>
    %219 = vector.extract_strided_slice %214 {offsets = [0, 48], sizes = [2, 16], strides = [1, 1]} : vector<2x64xf32> to vector<2x16xf32>
    %220 = arith.mulf %217, %204 : vector<2x16xf32>
    %221 = arith.mulf %216, %218 : vector<2x16xf32>
    %222 = arith.addf %220, %221 : vector<2x16xf32>
    %223 = math.tanh %222 : vector<2x16xf32>
    %224 = arith.mulf %219, %223 : vector<2x16xf32>
    %c22 = arith.constant 22 : index
    %c0_48 = arith.constant 0 : index
    %225 = vector.load %arg7[%c22, %c0_48] : memref<128x16xf32, #tpu.memory_space<vmem>>, vector<2x16xf32>
    tpu.vector_store %arg7[%c22, %c0_48], %224 {strides = array<i32>} : memref<128x16xf32, #tpu.memory_space<vmem>>, vector<2x16xf32>,
    %cst_49 = arith.constant dense<0.000000e+00> : vector<2x64xf32>
    %226 = tpu.matmul %224, %1, %cst_49 {dimension_numbers = #tpu.dot_dimension_numbers<[1], [0], [0], [1], [0, 0, 1, 1], [], []>} : vector<2x16xf32>, vector<16x64xf32>, vector<2x64xf32> -> vector<2x64xf32>
    %227 = arith.addf %8, %226 : vector<2x64xf32>
    %228 = arith.negf %227 : vector<2x64xf32>
    %229 = math.exp %228 : vector<2x64xf32>
    %cst_50 = arith.constant 1.000000e+00 : f32
    %230 = vector.broadcast %cst_50 : f32 to vector<2x64xf32>
    %231 = arith.addf %230, %229 : vector<2x64xf32>
    %232 = arith.divf %230, %231 : vector<2x64xf32>
    %233 = math.tanh %227 : vector<2x64xf32>
    %234 = vector.extract_strided_slice %232 {offsets = [0, 0], sizes = [2, 16], strides = [1, 1]} : vector<2x64xf32> to vector<2x16xf32>
    %235 = vector.extract_strided_slice %232 {offsets = [0, 16], sizes = [2, 16], strides = [1, 1]} : vector<2x64xf32> to vector<2x16xf32>
    %236 = vector.extract_strided_slice %233 {offsets = [0, 32], sizes = [2, 16], strides = [1, 1]} : vector<2x64xf32> to vector<2x16xf32>
    %237 = vector.extract_strided_slice %232 {offsets = [0, 48], sizes = [2, 16], strides = [1, 1]} : vector<2x64xf32> to vector<2x16xf32>
    %238 = arith.mulf %235, %222 : vector<2x16xf32>
    %239 = arith.mulf %234, %236 : vector<2x16xf32>
    %240 = arith.addf %238, %239 : vector<2x16xf32>
    %241 = math.tanh %240 : vector<2x16xf32>
    %242 = arith.mulf %237, %241 : vector<2x16xf32>
    %c24 = arith.constant 24 : index
    %c0_51 = arith.constant 0 : index
    %243 = vector.load %arg7[%c24, %c0_51] : memref<128x16xf32, #tpu.memory_space<vmem>>, vector<2x16xf32>
    tpu.vector_store %arg7[%c24, %c0_51], %242 {strides = array<i32>} : memref<128x16xf32, #tpu.memory_space<vmem>>, vector<2x16xf32>,
    %cst_52 = arith.constant dense<0.000000e+00> : vector<2x64xf32>
    %244 = tpu.matmul %242, %1, %cst_52 {dimension_numbers = #tpu.dot_dimension_numbers<[1], [0], [0], [1], [0, 0, 1, 1], [], []>} : vector<2x16xf32>, vector<16x64xf32>, vector<2x64xf32> -> vector<2x64xf32>
    %245 = arith.addf %8, %244 : vector<2x64xf32>
    %246 = arith.negf %245 : vector<2x64xf32>
    %247 = math.exp %246 : vector<2x64xf32>
    %cst_53 = arith.constant 1.000000e+00 : f32
    %248 = vector.broadcast %cst_53 : f32 to vector<2x64xf32>
    %249 = arith.addf %248, %247 : vector<2x64xf32>
    %250 = arith.divf %248, %249 : vector<2x64xf32>
    %251 = math.tanh %245 : vector<2x64xf32>
    %252 = vector.extract_strided_slice %250 {offsets = [0, 0], sizes = [2, 16], strides = [1, 1]} : vector<2x64xf32> to vector<2x16xf32>
    %253 = vector.extract_strided_slice %250 {offsets = [0, 16], sizes = [2, 16], strides = [1, 1]} : vector<2x64xf32> to vector<2x16xf32>
    %254 = vector.extract_strided_slice %251 {offsets = [0, 32], sizes = [2, 16], strides = [1, 1]} : vector<2x64xf32> to vector<2x16xf32>
    %255 = vector.extract_strided_slice %250 {offsets = [0, 48], sizes = [2, 16], strides = [1, 1]} : vector<2x64xf32> to vector<2x16xf32>
    %256 = arith.mulf %253, %240 : vector<2x16xf32>
    %257 = arith.mulf %252, %254 : vector<2x16xf32>
    %258 = arith.addf %256, %257 : vector<2x16xf32>
    %259 = math.tanh %258 : vector<2x16xf32>
    %260 = arith.mulf %255, %259 : vector<2x16xf32>
    %c26 = arith.constant 26 : index
    %c0_54 = arith.constant 0 : index
    %261 = vector.load %arg7[%c26, %c0_54] : memref<128x16xf32, #tpu.memory_space<vmem>>, vector<2x16xf32>
    tpu.vector_store %arg7[%c26, %c0_54], %260 {strides = array<i32>} : memref<128x16xf32, #tpu.memory_space<vmem>>, vector<2x16xf32>,
    %cst_55 = arith.constant dense<0.000000e+00> : vector<2x64xf32>
    %262 = tpu.matmul %260, %1, %cst_55 {dimension_numbers = #tpu.dot_dimension_numbers<[1], [0], [0], [1], [0, 0, 1, 1], [], []>} : vector<2x16xf32>, vector<16x64xf32>, vector<2x64xf32> -> vector<2x64xf32>
    %263 = arith.addf %8, %262 : vector<2x64xf32>
    %264 = arith.negf %263 : vector<2x64xf32>
    %265 = math.exp %264 : vector<2x64xf32>
    %cst_56 = arith.constant 1.000000e+00 : f32
    %266 = vector.broadcast %cst_56 : f32 to vector<2x64xf32>
    %267 = arith.addf %266, %265 : vector<2x64xf32>
    %268 = arith.divf %266, %267 : vector<2x64xf32>
    %269 = math.tanh %263 : vector<2x64xf32>
    %270 = vector.extract_strided_slice %268 {offsets = [0, 0], sizes = [2, 16], strides = [1, 1]} : vector<2x64xf32> to vector<2x16xf32>
    %271 = vector.extract_strided_slice %268 {offsets = [0, 16], sizes = [2, 16], strides = [1, 1]} : vector<2x64xf32> to vector<2x16xf32>
    %272 = vector.extract_strided_slice %269 {offsets = [0, 32], sizes = [2, 16], strides = [1, 1]} : vector<2x64xf32> to vector<2x16xf32>
    %273 = vector.extract_strided_slice %268 {offsets = [0, 48], sizes = [2, 16], strides = [1, 1]} : vector<2x64xf32> to vector<2x16xf32>
    %274 = arith.mulf %271, %258 : vector<2x16xf32>
    %275 = arith.mulf %270, %272 : vector<2x16xf32>
    %276 = arith.addf %274, %275 : vector<2x16xf32>
    %277 = math.tanh %276 : vector<2x16xf32>
    %278 = arith.mulf %273, %277 : vector<2x16xf32>
    %c28 = arith.constant 28 : index
    %c0_57 = arith.constant 0 : index
    %279 = vector.load %arg7[%c28, %c0_57] : memref<128x16xf32, #tpu.memory_space<vmem>>, vector<2x16xf32>
    tpu.vector_store %arg7[%c28, %c0_57], %278 {strides = array<i32>} : memref<128x16xf32, #tpu.memory_space<vmem>>, vector<2x16xf32>,
    %cst_58 = arith.constant dense<0.000000e+00> : vector<2x64xf32>
    %280 = tpu.matmul %278, %1, %cst_58 {dimension_numbers = #tpu.dot_dimension_numbers<[1], [0], [0], [1], [0, 0, 1, 1], [], []>} : vector<2x16xf32>, vector<16x64xf32>, vector<2x64xf32> -> vector<2x64xf32>
    %281 = arith.addf %8, %280 : vector<2x64xf32>
    %282 = arith.negf %281 : vector<2x64xf32>
    %283 = math.exp %282 : vector<2x64xf32>
    %cst_59 = arith.constant 1.000000e+00 : f32
    %284 = vector.broadcast %cst_59 : f32 to vector<2x64xf32>
    %285 = arith.addf %284, %283 : vector<2x64xf32>
    %286 = arith.divf %284, %285 : vector<2x64xf32>
    %287 = math.tanh %281 : vector<2x64xf32>
    %288 = vector.extract_strided_slice %286 {offsets = [0, 0], sizes = [2, 16], strides = [1, 1]} : vector<2x64xf32> to vector<2x16xf32>
    %289 = vector.extract_strided_slice %286 {offsets = [0, 16], sizes = [2, 16], strides = [1, 1]} : vector<2x64xf32> to vector<2x16xf32>
    %290 = vector.extract_strided_slice %287 {offsets = [0, 32], sizes = [2, 16], strides = [1, 1]} : vector<2x64xf32> to vector<2x16xf32>
    %291 = vector.extract_strided_slice %286 {offsets = [0, 48], sizes = [2, 16], strides = [1, 1]} : vector<2x64xf32> to vector<2x16xf32>
    %292 = arith.mulf %289, %276 : vector<2x16xf32>
    %293 = arith.mulf %288, %290 : vector<2x16xf32>
    %294 = arith.addf %292, %293 : vector<2x16xf32>
    %295 = math.tanh %294 : vector<2x16xf32>
    %296 = arith.mulf %291, %295 : vector<2x16xf32>
    %c30 = arith.constant 30 : index
    %c0_60 = arith.constant 0 : index
    %297 = vector.load %arg7[%c30, %c0_60] : memref<128x16xf32, #tpu.memory_space<vmem>>, vector<2x16xf32>
    tpu.vector_store %arg7[%c30, %c0_60], %296 {strides = array<i32>} : memref<128x16xf32, #tpu.memory_space<vmem>>, vector<2x16xf32>,
    %cst_61 = arith.constant dense<0.000000e+00> : vector<2x64xf32>
    %298 = tpu.matmul %296, %1, %cst_61 {dimension_numbers = #tpu.dot_dimension_numbers<[1], [0], [0], [1], [0, 0, 1, 1], [], []>} : vector<2x16xf32>, vector<16x64xf32>, vector<2x64xf32> -> vector<2x64xf32>
    %299 = arith.addf %8, %298 : vector<2x64xf32>
    %300 = arith.negf %299 : vector<2x64xf32>
    %301 = math.exp %300 : vector<2x64xf32>
    %cst_62 = arith.constant 1.000000e+00 : f32
    %302 = vector.broadcast %cst_62 : f32 to vector<2x64xf32>
    %303 = arith.addf %302, %301 : vector<2x64xf32>
    %304 = arith.divf %302, %303 : vector<2x64xf32>
    %305 = math.tanh %299 : vector<2x64xf32>
    %306 = vector.extract_strided_slice %304 {offsets = [0, 0], sizes = [2, 16], strides = [1, 1]} : vector<2x64xf32> to vector<2x16xf32>
    %307 = vector.extract_strided_slice %304 {offsets = [0, 16], sizes = [2, 16], strides = [1, 1]} : vector<2x64xf32> to vector<2x16xf32>
    %308 = vector.extract_strided_slice %305 {offsets = [0, 32], sizes = [2, 16], strides = [1, 1]} : vector<2x64xf32> to vector<2x16xf32>
    %309 = vector.extract_strided_slice %304 {offsets = [0, 48], sizes = [2, 16], strides = [1, 1]} : vector<2x64xf32> to vector<2x16xf32>
    %310 = arith.mulf %307, %294 : vector<2x16xf32>
    %311 = arith.mulf %306, %308 : vector<2x16xf32>
    %312 = arith.addf %310, %311 : vector<2x16xf32>
    %313 = math.tanh %312 : vector<2x16xf32>
    %314 = arith.mulf %309, %313 : vector<2x16xf32>
    %c32 = arith.constant 32 : index
    %c0_63 = arith.constant 0 : index
    %315 = vector.load %arg7[%c32, %c0_63] : memref<128x16xf32, #tpu.memory_space<vmem>>, vector<2x16xf32>
    tpu.vector_store %arg7[%c32, %c0_63], %314 {strides = array<i32>} : memref<128x16xf32, #tpu.memory_space<vmem>>, vector<2x16xf32>,
    %cst_64 = arith.constant dense<0.000000e+00> : vector<2x64xf32>
    %316 = tpu.matmul %314, %1, %cst_64 {dimension_numbers = #tpu.dot_dimension_numbers<[1], [0], [0], [1], [0, 0, 1, 1], [], []>} : vector<2x16xf32>, vector<16x64xf32>, vector<2x64xf32> -> vector<2x64xf32>
    %317 = arith.addf %8, %316 : vector<2x64xf32>
    %318 = arith.negf %317 : vector<2x64xf32>
    %319 = math.exp %318 : vector<2x64xf32>
    %cst_65 = arith.constant 1.000000e+00 : f32
    %320 = vector.broadcast %cst_65 : f32 to vector<2x64xf32>
    %321 = arith.addf %320, %319 : vector<2x64xf32>
    %322 = arith.divf %320, %321 : vector<2x64xf32>
    %323 = math.tanh %317 : vector<2x64xf32>
    %324 = vector.extract_strided_slice %322 {offsets = [0, 0], sizes = [2, 16], strides = [1, 1]} : vector<2x64xf32> to vector<2x16xf32>
    %325 = vector.extract_strided_slice %322 {offsets = [0, 16], sizes = [2, 16], strides = [1, 1]} : vector<2x64xf32> to vector<2x16xf32>
    %326 = vector.extract_strided_slice %323 {offsets = [0, 32], sizes = [2, 16], strides = [1, 1]} : vector<2x64xf32> to vector<2x16xf32>
    %327 = vector.extract_strided_slice %322 {offsets = [0, 48], sizes = [2, 16], strides = [1, 1]} : vector<2x64xf32> to vector<2x16xf32>
    %328 = arith.mulf %325, %312 : vector<2x16xf32>
    %329 = arith.mulf %324, %326 : vector<2x16xf32>
    %330 = arith.addf %328, %329 : vector<2x16xf32>
    %331 = math.tanh %330 : vector<2x16xf32>
    %332 = arith.mulf %327, %331 : vector<2x16xf32>
    %c34 = arith.constant 34 : index
    %c0_66 = arith.constant 0 : index
    %333 = vector.load %arg7[%c34, %c0_66] : memref<128x16xf32, #tpu.memory_space<vmem>>, vector<2x16xf32>
    tpu.vector_store %arg7[%c34, %c0_66], %332 {strides = array<i32>} : memref<128x16xf32, #tpu.memory_space<vmem>>, vector<2x16xf32>,
    %cst_67 = arith.constant dense<0.000000e+00> : vector<2x64xf32>
    %334 = tpu.matmul %332, %1, %cst_67 {dimension_numbers = #tpu.dot_dimension_numbers<[1], [0], [0], [1], [0, 0, 1, 1], [], []>} : vector<2x16xf32>, vector<16x64xf32>, vector<2x64xf32> -> vector<2x64xf32>
    %335 = arith.addf %8, %334 : vector<2x64xf32>
    %336 = arith.negf %335 : vector<2x64xf32>
    %337 = math.exp %336 : vector<2x64xf32>
    %cst_68 = arith.constant 1.000000e+00 : f32
    %338 = vector.broadcast %cst_68 : f32 to vector<2x64xf32>
    %339 = arith.addf %338, %337 : vector<2x64xf32>
    %340 = arith.divf %338, %339 : vector<2x64xf32>
    %341 = math.tanh %335 : vector<2x64xf32>
    %342 = vector.extract_strided_slice %340 {offsets = [0, 0], sizes = [2, 16], strides = [1, 1]} : vector<2x64xf32> to vector<2x16xf32>
    %343 = vector.extract_strided_slice %340 {offsets = [0, 16], sizes = [2, 16], strides = [1, 1]} : vector<2x64xf32> to vector<2x16xf32>
    %344 = vector.extract_strided_slice %341 {offsets = [0, 32], sizes = [2, 16], strides = [1, 1]} : vector<2x64xf32> to vector<2x16xf32>
    %345 = vector.extract_strided_slice %340 {offsets = [0, 48], sizes = [2, 16], strides = [1, 1]} : vector<2x64xf32> to vector<2x16xf32>
    %346 = arith.mulf %343, %330 : vector<2x16xf32>
    %347 = arith.mulf %342, %344 : vector<2x16xf32>
    %348 = arith.addf %346, %347 : vector<2x16xf32>
    %349 = math.tanh %348 : vector<2x16xf32>
    %350 = arith.mulf %345, %349 : vector<2x16xf32>
    %c36 = arith.constant 36 : index
    %c0_69 = arith.constant 0 : index
    %351 = vector.load %arg7[%c36, %c0_69] : memref<128x16xf32, #tpu.memory_space<vmem>>, vector<2x16xf32>
    tpu.vector_store %arg7[%c36, %c0_69], %350 {strides = array<i32>} : memref<128x16xf32, #tpu.memory_space<vmem>>, vector<2x16xf32>,
    %cst_70 = arith.constant dense<0.000000e+00> : vector<2x64xf32>
    %352 = tpu.matmul %350, %1, %cst_70 {dimension_numbers = #tpu.dot_dimension_numbers<[1], [0], [0], [1], [0, 0, 1, 1], [], []>} : vector<2x16xf32>, vector<16x64xf32>, vector<2x64xf32> -> vector<2x64xf32>
    %353 = arith.addf %8, %352 : vector<2x64xf32>
    %354 = arith.negf %353 : vector<2x64xf32>
    %355 = math.exp %354 : vector<2x64xf32>
    %cst_71 = arith.constant 1.000000e+00 : f32
    %356 = vector.broadcast %cst_71 : f32 to vector<2x64xf32>
    %357 = arith.addf %356, %355 : vector<2x64xf32>
    %358 = arith.divf %356, %357 : vector<2x64xf32>
    %359 = math.tanh %353 : vector<2x64xf32>
    %360 = vector.extract_strided_slice %358 {offsets = [0, 0], sizes = [2, 16], strides = [1, 1]} : vector<2x64xf32> to vector<2x16xf32>
    %361 = vector.extract_strided_slice %358 {offsets = [0, 16], sizes = [2, 16], strides = [1, 1]} : vector<2x64xf32> to vector<2x16xf32>
    %362 = vector.extract_strided_slice %359 {offsets = [0, 32], sizes = [2, 16], strides = [1, 1]} : vector<2x64xf32> to vector<2x16xf32>
    %363 = vector.extract_strided_slice %358 {offsets = [0, 48], sizes = [2, 16], strides = [1, 1]} : vector<2x64xf32> to vector<2x16xf32>
    %364 = arith.mulf %361, %348 : vector<2x16xf32>
    %365 = arith.mulf %360, %362 : vector<2x16xf32>
    %366 = arith.addf %364, %365 : vector<2x16xf32>
    %367 = math.tanh %366 : vector<2x16xf32>
    %368 = arith.mulf %363, %367 : vector<2x16xf32>
    %c38 = arith.constant 38 : index
    %c0_72 = arith.constant 0 : index
    %369 = vector.load %arg7[%c38, %c0_72] : memref<128x16xf32, #tpu.memory_space<vmem>>, vector<2x16xf32>
    tpu.vector_store %arg7[%c38, %c0_72], %368 {strides = array<i32>} : memref<128x16xf32, #tpu.memory_space<vmem>>, vector<2x16xf32>,
    %cst_73 = arith.constant dense<0.000000e+00> : vector<2x64xf32>
    %370 = tpu.matmul %368, %1, %cst_73 {dimension_numbers = #tpu.dot_dimension_numbers<[1], [0], [0], [1], [0, 0, 1, 1], [], []>} : vector<2x16xf32>, vector<16x64xf32>, vector<2x64xf32> -> vector<2x64xf32>
    %371 = arith.addf %8, %370 : vector<2x64xf32>
    %372 = arith.negf %371 : vector<2x64xf32>
    %373 = math.exp %372 : vector<2x64xf32>
    %cst_74 = arith.constant 1.000000e+00 : f32
    %374 = vector.broadcast %cst_74 : f32 to vector<2x64xf32>
    %375 = arith.addf %374, %373 : vector<2x64xf32>
    %376 = arith.divf %374, %375 : vector<2x64xf32>
    %377 = math.tanh %371 : vector<2x64xf32>
    %378 = vector.extract_strided_slice %376 {offsets = [0, 0], sizes = [2, 16], strides = [1, 1]} : vector<2x64xf32> to vector<2x16xf32>
    %379 = vector.extract_strided_slice %376 {offsets = [0, 16], sizes = [2, 16], strides = [1, 1]} : vector<2x64xf32> to vector<2x16xf32>
    %380 = vector.extract_strided_slice %377 {offsets = [0, 32], sizes = [2, 16], strides = [1, 1]} : vector<2x64xf32> to vector<2x16xf32>
    %381 = vector.extract_strided_slice %376 {offsets = [0, 48], sizes = [2, 16], strides = [1, 1]} : vector<2x64xf32> to vector<2x16xf32>
    %382 = arith.mulf %379, %366 : vector<2x16xf32>
    %383 = arith.mulf %378, %380 : vector<2x16xf32>
    %384 = arith.addf %382, %383 : vector<2x16xf32>
    %385 = math.tanh %384 : vector<2x16xf32>
    %386 = arith.mulf %381, %385 : vector<2x16xf32>
    %c40 = arith.constant 40 : index
    %c0_75 = arith.constant 0 : index
    %387 = vector.load %arg7[%c40, %c0_75] : memref<128x16xf32, #tpu.memory_space<vmem>>, vector<2x16xf32>
    tpu.vector_store %arg7[%c40, %c0_75], %386 {strides = array<i32>} : memref<128x16xf32, #tpu.memory_space<vmem>>, vector<2x16xf32>,
    %cst_76 = arith.constant dense<0.000000e+00> : vector<2x64xf32>
    %388 = tpu.matmul %386, %1, %cst_76 {dimension_numbers = #tpu.dot_dimension_numbers<[1], [0], [0], [1], [0, 0, 1, 1], [], []>} : vector<2x16xf32>, vector<16x64xf32>, vector<2x64xf32> -> vector<2x64xf32>
    %389 = arith.addf %8, %388 : vector<2x64xf32>
    %390 = arith.negf %389 : vector<2x64xf32>
    %391 = math.exp %390 : vector<2x64xf32>
    %cst_77 = arith.constant 1.000000e+00 : f32
    %392 = vector.broadcast %cst_77 : f32 to vector<2x64xf32>
    %393 = arith.addf %392, %391 : vector<2x64xf32>
    %394 = arith.divf %392, %393 : vector<2x64xf32>
    %395 = math.tanh %389 : vector<2x64xf32>
    %396 = vector.extract_strided_slice %394 {offsets = [0, 0], sizes = [2, 16], strides = [1, 1]} : vector<2x64xf32> to vector<2x16xf32>
    %397 = vector.extract_strided_slice %394 {offsets = [0, 16], sizes = [2, 16], strides = [1, 1]} : vector<2x64xf32> to vector<2x16xf32>
    %398 = vector.extract_strided_slice %395 {offsets = [0, 32], sizes = [2, 16], strides = [1, 1]} : vector<2x64xf32> to vector<2x16xf32>
    %399 = vector.extract_strided_slice %394 {offsets = [0, 48], sizes = [2, 16], strides = [1, 1]} : vector<2x64xf32> to vector<2x16xf32>
    %400 = arith.mulf %397, %384 : vector<2x16xf32>
    %401 = arith.mulf %396, %398 : vector<2x16xf32>
    %402 = arith.addf %400, %401 : vector<2x16xf32>
    %403 = math.tanh %402 : vector<2x16xf32>
    %404 = arith.mulf %399, %403 : vector<2x16xf32>
    %c42 = arith.constant 42 : index
    %c0_78 = arith.constant 0 : index
    %405 = vector.load %arg7[%c42, %c0_78] : memref<128x16xf32, #tpu.memory_space<vmem>>, vector<2x16xf32>
    tpu.vector_store %arg7[%c42, %c0_78], %404 {strides = array<i32>} : memref<128x16xf32, #tpu.memory_space<vmem>>, vector<2x16xf32>,
    %cst_79 = arith.constant dense<0.000000e+00> : vector<2x64xf32>
    %406 = tpu.matmul %404, %1, %cst_79 {dimension_numbers = #tpu.dot_dimension_numbers<[1], [0], [0], [1], [0, 0, 1, 1], [], []>} : vector<2x16xf32>, vector<16x64xf32>, vector<2x64xf32> -> vector<2x64xf32>
    %407 = arith.addf %8, %406 : vector<2x64xf32>
    %408 = arith.negf %407 : vector<2x64xf32>
    %409 = math.exp %408 : vector<2x64xf32>
    %cst_80 = arith.constant 1.000000e+00 : f32
    %410 = vector.broadcast %cst_80 : f32 to vector<2x64xf32>
    %411 = arith.addf %410, %409 : vector<2x64xf32>
    %412 = arith.divf %410, %411 : vector<2x64xf32>
    %413 = math.tanh %407 : vector<2x64xf32>
    %414 = vector.extract_strided_slice %412 {offsets = [0, 0], sizes = [2, 16], strides = [1, 1]} : vector<2x64xf32> to vector<2x16xf32>
    %415 = vector.extract_strided_slice %412 {offsets = [0, 16], sizes = [2, 16], strides = [1, 1]} : vector<2x64xf32> to vector<2x16xf32>
    %416 = vector.extract_strided_slice %413 {offsets = [0, 32], sizes = [2, 16], strides = [1, 1]} : vector<2x64xf32> to vector<2x16xf32>
    %417 = vector.extract_strided_slice %412 {offsets = [0, 48], sizes = [2, 16], strides = [1, 1]} : vector<2x64xf32> to vector<2x16xf32>
    %418 = arith.mulf %415, %402 : vector<2x16xf32>
    %419 = arith.mulf %414, %416 : vector<2x16xf32>
    %420 = arith.addf %418, %419 : vector<2x16xf32>
    %421 = math.tanh %420 : vector<2x16xf32>
    %422 = arith.mulf %417, %421 : vector<2x16xf32>
    %c44 = arith.constant 44 : index
    %c0_81 = arith.constant 0 : index
    %423 = vector.load %arg7[%c44, %c0_81] : memref<128x16xf32, #tpu.memory_space<vmem>>, vector<2x16xf32>
    tpu.vector_store %arg7[%c44, %c0_81], %422 {strides = array<i32>} : memref<128x16xf32, #tpu.memory_space<vmem>>, vector<2x16xf32>,
    %cst_82 = arith.constant dense<0.000000e+00> : vector<2x64xf32>
    %424 = tpu.matmul %422, %1, %cst_82 {dimension_numbers = #tpu.dot_dimension_numbers<[1], [0], [0], [1], [0, 0, 1, 1], [], []>} : vector<2x16xf32>, vector<16x64xf32>, vector<2x64xf32> -> vector<2x64xf32>
    %425 = arith.addf %8, %424 : vector<2x64xf32>
    %426 = arith.negf %425 : vector<2x64xf32>
    %427 = math.exp %426 : vector<2x64xf32>
    %cst_83 = arith.constant 1.000000e+00 : f32
    %428 = vector.broadcast %cst_83 : f32 to vector<2x64xf32>
    %429 = arith.addf %428, %427 : vector<2x64xf32>
    %430 = arith.divf %428, %429 : vector<2x64xf32>
    %431 = math.tanh %425 : vector<2x64xf32>
    %432 = vector.extract_strided_slice %430 {offsets = [0, 0], sizes = [2, 16], strides = [1, 1]} : vector<2x64xf32> to vector<2x16xf32>
    %433 = vector.extract_strided_slice %430 {offsets = [0, 16], sizes = [2, 16], strides = [1, 1]} : vector<2x64xf32> to vector<2x16xf32>
    %434 = vector.extract_strided_slice %431 {offsets = [0, 32], sizes = [2, 16], strides = [1, 1]} : vector<2x64xf32> to vector<2x16xf32>
    %435 = vector.extract_strided_slice %430 {offsets = [0, 48], sizes = [2, 16], strides = [1, 1]} : vector<2x64xf32> to vector<2x16xf32>
    %436 = arith.mulf %433, %420 : vector<2x16xf32>
    %437 = arith.mulf %432, %434 : vector<2x16xf32>
    %438 = arith.addf %436, %437 : vector<2x16xf32>
    %439 = math.tanh %438 : vector<2x16xf32>
    %440 = arith.mulf %435, %439 : vector<2x16xf32>
    %c46 = arith.constant 46 : index
    %c0_84 = arith.constant 0 : index
    %441 = vector.load %arg7[%c46, %c0_84] : memref<128x16xf32, #tpu.memory_space<vmem>>, vector<2x16xf32>
    tpu.vector_store %arg7[%c46, %c0_84], %440 {strides = array<i32>} : memref<128x16xf32, #tpu.memory_space<vmem>>, vector<2x16xf32>,
    %cst_85 = arith.constant dense<0.000000e+00> : vector<2x64xf32>
    %442 = tpu.matmul %440, %1, %cst_85 {dimension_numbers = #tpu.dot_dimension_numbers<[1], [0], [0], [1], [0, 0, 1, 1], [], []>} : vector<2x16xf32>, vector<16x64xf32>, vector<2x64xf32> -> vector<2x64xf32>
    %443 = arith.addf %8, %442 : vector<2x64xf32>
    %444 = arith.negf %443 : vector<2x64xf32>
    %445 = math.exp %444 : vector<2x64xf32>
    %cst_86 = arith.constant 1.000000e+00 : f32
    %446 = vector.broadcast %cst_86 : f32 to vector<2x64xf32>
    %447 = arith.addf %446, %445 : vector<2x64xf32>
    %448 = arith.divf %446, %447 : vector<2x64xf32>
    %449 = math.tanh %443 : vector<2x64xf32>
    %450 = vector.extract_strided_slice %448 {offsets = [0, 0], sizes = [2, 16], strides = [1, 1]} : vector<2x64xf32> to vector<2x16xf32>
    %451 = vector.extract_strided_slice %448 {offsets = [0, 16], sizes = [2, 16], strides = [1, 1]} : vector<2x64xf32> to vector<2x16xf32>
    %452 = vector.extract_strided_slice %449 {offsets = [0, 32], sizes = [2, 16], strides = [1, 1]} : vector<2x64xf32> to vector<2x16xf32>
    %453 = vector.extract_strided_slice %448 {offsets = [0, 48], sizes = [2, 16], strides = [1, 1]} : vector<2x64xf32> to vector<2x16xf32>
    %454 = arith.mulf %451, %438 : vector<2x16xf32>
    %455 = arith.mulf %450, %452 : vector<2x16xf32>
    %456 = arith.addf %454, %455 : vector<2x16xf32>
    %457 = math.tanh %456 : vector<2x16xf32>
    %458 = arith.mulf %453, %457 : vector<2x16xf32>
    %c48 = arith.constant 48 : index
    %c0_87 = arith.constant 0 : index
    %459 = vector.load %arg7[%c48, %c0_87] : memref<128x16xf32, #tpu.memory_space<vmem>>, vector<2x16xf32>
    tpu.vector_store %arg7[%c48, %c0_87], %458 {strides = array<i32>} : memref<128x16xf32, #tpu.memory_space<vmem>>, vector<2x16xf32>,
    %cst_88 = arith.constant dense<0.000000e+00> : vector<2x64xf32>
    %460 = tpu.matmul %458, %1, %cst_88 {dimension_numbers = #tpu.dot_dimension_numbers<[1], [0], [0], [1], [0, 0, 1, 1], [], []>} : vector<2x16xf32>, vector<16x64xf32>, vector<2x64xf32> -> vector<2x64xf32>
    %461 = arith.addf %8, %460 : vector<2x64xf32>
    %462 = arith.negf %461 : vector<2x64xf32>
    %463 = math.exp %462 : vector<2x64xf32>
    %cst_89 = arith.constant 1.000000e+00 : f32
    %464 = vector.broadcast %cst_89 : f32 to vector<2x64xf32>
    %465 = arith.addf %464, %463 : vector<2x64xf32>
    %466 = arith.divf %464, %465 : vector<2x64xf32>
    %467 = math.tanh %461 : vector<2x64xf32>
    %468 = vector.extract_strided_slice %466 {offsets = [0, 0], sizes = [2, 16], strides = [1, 1]} : vector<2x64xf32> to vector<2x16xf32>
    %469 = vector.extract_strided_slice %466 {offsets = [0, 16], sizes = [2, 16], strides = [1, 1]} : vector<2x64xf32> to vector<2x16xf32>
    %470 = vector.extract_strided_slice %467 {offsets = [0, 32], sizes = [2, 16], strides = [1, 1]} : vector<2x64xf32> to vector<2x16xf32>
    %471 = vector.extract_strided_slice %466 {offsets = [0, 48], sizes = [2, 16], strides = [1, 1]} : vector<2x64xf32> to vector<2x16xf32>
    %472 = arith.mulf %469, %456 : vector<2x16xf32>
    %473 = arith.mulf %468, %470 : vector<2x16xf32>
    %474 = arith.addf %472, %473 : vector<2x16xf32>
    %475 = math.tanh %474 : vector<2x16xf32>
    %476 = arith.mulf %471, %475 : vector<2x16xf32>
    %c50 = arith.constant 50 : index
    %c0_90 = arith.constant 0 : index
    %477 = vector.load %arg7[%c50, %c0_90] : memref<128x16xf32, #tpu.memory_space<vmem>>, vector<2x16xf32>
    tpu.vector_store %arg7[%c50, %c0_90], %476 {strides = array<i32>} : memref<128x16xf32, #tpu.memory_space<vmem>>, vector<2x16xf32>,
    %cst_91 = arith.constant dense<0.000000e+00> : vector<2x64xf32>
    %478 = tpu.matmul %476, %1, %cst_91 {dimension_numbers = #tpu.dot_dimension_numbers<[1], [0], [0], [1], [0, 0, 1, 1], [], []>} : vector<2x16xf32>, vector<16x64xf32>, vector<2x64xf32> -> vector<2x64xf32>
    %479 = arith.addf %8, %478 : vector<2x64xf32>
    %480 = arith.negf %479 : vector<2x64xf32>
    %481 = math.exp %480 : vector<2x64xf32>
    %cst_92 = arith.constant 1.000000e+00 : f32
    %482 = vector.broadcast %cst_92 : f32 to vector<2x64xf32>
    %483 = arith.addf %482, %481 : vector<2x64xf32>
    %484 = arith.divf %482, %483 : vector<2x64xf32>
    %485 = math.tanh %479 : vector<2x64xf32>
    %486 = vector.extract_strided_slice %484 {offsets = [0, 0], sizes = [2, 16], strides = [1, 1]} : vector<2x64xf32> to vector<2x16xf32>
    %487 = vector.extract_strided_slice %484 {offsets = [0, 16], sizes = [2, 16], strides = [1, 1]} : vector<2x64xf32> to vector<2x16xf32>
    %488 = vector.extract_strided_slice %485 {offsets = [0, 32], sizes = [2, 16], strides = [1, 1]} : vector<2x64xf32> to vector<2x16xf32>
    %489 = vector.extract_strided_slice %484 {offsets = [0, 48], sizes = [2, 16], strides = [1, 1]} : vector<2x64xf32> to vector<2x16xf32>
    %490 = arith.mulf %487, %474 : vector<2x16xf32>
    %491 = arith.mulf %486, %488 : vector<2x16xf32>
    %492 = arith.addf %490, %491 : vector<2x16xf32>
    %493 = math.tanh %492 : vector<2x16xf32>
    %494 = arith.mulf %489, %493 : vector<2x16xf32>
    %c52 = arith.constant 52 : index
    %c0_93 = arith.constant 0 : index
    %495 = vector.load %arg7[%c52, %c0_93] : memref<128x16xf32, #tpu.memory_space<vmem>>, vector<2x16xf32>
    tpu.vector_store %arg7[%c52, %c0_93], %494 {strides = array<i32>} : memref<128x16xf32, #tpu.memory_space<vmem>>, vector<2x16xf32>,
    %cst_94 = arith.constant dense<0.000000e+00> : vector<2x64xf32>
    %496 = tpu.matmul %494, %1, %cst_94 {dimension_numbers = #tpu.dot_dimension_numbers<[1], [0], [0], [1], [0, 0, 1, 1], [], []>} : vector<2x16xf32>, vector<16x64xf32>, vector<2x64xf32> -> vector<2x64xf32>
    %497 = arith.addf %8, %496 : vector<2x64xf32>
    %498 = arith.negf %497 : vector<2x64xf32>
    %499 = math.exp %498 : vector<2x64xf32>
    %cst_95 = arith.constant 1.000000e+00 : f32
    %500 = vector.broadcast %cst_95 : f32 to vector<2x64xf32>
    %501 = arith.addf %500, %499 : vector<2x64xf32>
    %502 = arith.divf %500, %501 : vector<2x64xf32>
    %503 = math.tanh %497 : vector<2x64xf32>
    %504 = vector.extract_strided_slice %502 {offsets = [0, 0], sizes = [2, 16], strides = [1, 1]} : vector<2x64xf32> to vector<2x16xf32>
    %505 = vector.extract_strided_slice %502 {offsets = [0, 16], sizes = [2, 16], strides = [1, 1]} : vector<2x64xf32> to vector<2x16xf32>
    %506 = vector.extract_strided_slice %503 {offsets = [0, 32], sizes = [2, 16], strides = [1, 1]} : vector<2x64xf32> to vector<2x16xf32>
    %507 = vector.extract_strided_slice %502 {offsets = [0, 48], sizes = [2, 16], strides = [1, 1]} : vector<2x64xf32> to vector<2x16xf32>
    %508 = arith.mulf %505, %492 : vector<2x16xf32>
    %509 = arith.mulf %504, %506 : vector<2x16xf32>
    %510 = arith.addf %508, %509 : vector<2x16xf32>
    %511 = math.tanh %510 : vector<2x16xf32>
    %512 = arith.mulf %507, %511 : vector<2x16xf32>
    %c54 = arith.constant 54 : index
    %c0_96 = arith.constant 0 : index
    %513 = vector.load %arg7[%c54, %c0_96] : memref<128x16xf32, #tpu.memory_space<vmem>>, vector<2x16xf32>
    tpu.vector_store %arg7[%c54, %c0_96], %512 {strides = array<i32>} : memref<128x16xf32, #tpu.memory_space<vmem>>, vector<2x16xf32>,
    %cst_97 = arith.constant dense<0.000000e+00> : vector<2x64xf32>
    %514 = tpu.matmul %512, %1, %cst_97 {dimension_numbers = #tpu.dot_dimension_numbers<[1], [0], [0], [1], [0, 0, 1, 1], [], []>} : vector<2x16xf32>, vector<16x64xf32>, vector<2x64xf32> -> vector<2x64xf32>
    %515 = arith.addf %8, %514 : vector<2x64xf32>
    %516 = arith.negf %515 : vector<2x64xf32>
    %517 = math.exp %516 : vector<2x64xf32>
    %cst_98 = arith.constant 1.000000e+00 : f32
    %518 = vector.broadcast %cst_98 : f32 to vector<2x64xf32>
    %519 = arith.addf %518, %517 : vector<2x64xf32>
    %520 = arith.divf %518, %519 : vector<2x64xf32>
    %521 = math.tanh %515 : vector<2x64xf32>
    %522 = vector.extract_strided_slice %520 {offsets = [0, 0], sizes = [2, 16], strides = [1, 1]} : vector<2x64xf32> to vector<2x16xf32>
    %523 = vector.extract_strided_slice %520 {offsets = [0, 16], sizes = [2, 16], strides = [1, 1]} : vector<2x64xf32> to vector<2x16xf32>
    %524 = vector.extract_strided_slice %521 {offsets = [0, 32], sizes = [2, 16], strides = [1, 1]} : vector<2x64xf32> to vector<2x16xf32>
    %525 = vector.extract_strided_slice %520 {offsets = [0, 48], sizes = [2, 16], strides = [1, 1]} : vector<2x64xf32> to vector<2x16xf32>
    %526 = arith.mulf %523, %510 : vector<2x16xf32>
    %527 = arith.mulf %522, %524 : vector<2x16xf32>
    %528 = arith.addf %526, %527 : vector<2x16xf32>
    %529 = math.tanh %528 : vector<2x16xf32>
    %530 = arith.mulf %525, %529 : vector<2x16xf32>
    %c56 = arith.constant 56 : index
    %c0_99 = arith.constant 0 : index
    %531 = vector.load %arg7[%c56, %c0_99] : memref<128x16xf32, #tpu.memory_space<vmem>>, vector<2x16xf32>
    tpu.vector_store %arg7[%c56, %c0_99], %530 {strides = array<i32>} : memref<128x16xf32, #tpu.memory_space<vmem>>, vector<2x16xf32>,
    %cst_100 = arith.constant dense<0.000000e+00> : vector<2x64xf32>
    %532 = tpu.matmul %530, %1, %cst_100 {dimension_numbers = #tpu.dot_dimension_numbers<[1], [0], [0], [1], [0, 0, 1, 1], [], []>} : vector<2x16xf32>, vector<16x64xf32>, vector<2x64xf32> -> vector<2x64xf32>
    %533 = arith.addf %8, %532 : vector<2x64xf32>
    %534 = arith.negf %533 : vector<2x64xf32>
    %535 = math.exp %534 : vector<2x64xf32>
    %cst_101 = arith.constant 1.000000e+00 : f32
    %536 = vector.broadcast %cst_101 : f32 to vector<2x64xf32>
    %537 = arith.addf %536, %535 : vector<2x64xf32>
    %538 = arith.divf %536, %537 : vector<2x64xf32>
    %539 = math.tanh %533 : vector<2x64xf32>
    %540 = vector.extract_strided_slice %538 {offsets = [0, 0], sizes = [2, 16], strides = [1, 1]} : vector<2x64xf32> to vector<2x16xf32>
    %541 = vector.extract_strided_slice %538 {offsets = [0, 16], sizes = [2, 16], strides = [1, 1]} : vector<2x64xf32> to vector<2x16xf32>
    %542 = vector.extract_strided_slice %539 {offsets = [0, 32], sizes = [2, 16], strides = [1, 1]} : vector<2x64xf32> to vector<2x16xf32>
    %543 = vector.extract_strided_slice %538 {offsets = [0, 48], sizes = [2, 16], strides = [1, 1]} : vector<2x64xf32> to vector<2x16xf32>
    %544 = arith.mulf %541, %528 : vector<2x16xf32>
    %545 = arith.mulf %540, %542 : vector<2x16xf32>
    %546 = arith.addf %544, %545 : vector<2x16xf32>
    %547 = math.tanh %546 : vector<2x16xf32>
    %548 = arith.mulf %543, %547 : vector<2x16xf32>
    %c58 = arith.constant 58 : index
    %c0_102 = arith.constant 0 : index
    %549 = vector.load %arg7[%c58, %c0_102] : memref<128x16xf32, #tpu.memory_space<vmem>>, vector<2x16xf32>
    tpu.vector_store %arg7[%c58, %c0_102], %548 {strides = array<i32>} : memref<128x16xf32, #tpu.memory_space<vmem>>, vector<2x16xf32>,
    %cst_103 = arith.constant dense<0.000000e+00> : vector<2x64xf32>
    %550 = tpu.matmul %548, %1, %cst_103 {dimension_numbers = #tpu.dot_dimension_numbers<[1], [0], [0], [1], [0, 0, 1, 1], [], []>} : vector<2x16xf32>, vector<16x64xf32>, vector<2x64xf32> -> vector<2x64xf32>
    %551 = arith.addf %8, %550 : vector<2x64xf32>
    %552 = arith.negf %551 : vector<2x64xf32>
    %553 = math.exp %552 : vector<2x64xf32>
    %cst_104 = arith.constant 1.000000e+00 : f32
    %554 = vector.broadcast %cst_104 : f32 to vector<2x64xf32>
    %555 = arith.addf %554, %553 : vector<2x64xf32>
    %556 = arith.divf %554, %555 : vector<2x64xf32>
    %557 = math.tanh %551 : vector<2x64xf32>
    %558 = vector.extract_strided_slice %556 {offsets = [0, 0], sizes = [2, 16], strides = [1, 1]} : vector<2x64xf32> to vector<2x16xf32>
    %559 = vector.extract_strided_slice %556 {offsets = [0, 16], sizes = [2, 16], strides = [1, 1]} : vector<2x64xf32> to vector<2x16xf32>
    %560 = vector.extract_strided_slice %557 {offsets = [0, 32], sizes = [2, 16], strides = [1, 1]} : vector<2x64xf32> to vector<2x16xf32>
    %561 = vector.extract_strided_slice %556 {offsets = [0, 48], sizes = [2, 16], strides = [1, 1]} : vector<2x64xf32> to vector<2x16xf32>
    %562 = arith.mulf %559, %546 : vector<2x16xf32>
    %563 = arith.mulf %558, %560 : vector<2x16xf32>
    %564 = arith.addf %562, %563 : vector<2x16xf32>
    %565 = math.tanh %564 : vector<2x16xf32>
    %566 = arith.mulf %561, %565 : vector<2x16xf32>
    %c60 = arith.constant 60 : index
    %c0_105 = arith.constant 0 : index
    %567 = vector.load %arg7[%c60, %c0_105] : memref<128x16xf32, #tpu.memory_space<vmem>>, vector<2x16xf32>
    tpu.vector_store %arg7[%c60, %c0_105], %566 {strides = array<i32>} : memref<128x16xf32, #tpu.memory_space<vmem>>, vector<2x16xf32>,
    %cst_106 = arith.constant dense<0.000000e+00> : vector<2x64xf32>
    %568 = tpu.matmul %566, %1, %cst_106 {dimension_numbers = #tpu.dot_dimension_numbers<[1], [0], [0], [1], [0, 0, 1, 1], [], []>} : vector<2x16xf32>, vector<16x64xf32>, vector<2x64xf32> -> vector<2x64xf32>
    %569 = arith.addf %8, %568 : vector<2x64xf32>
    %570 = arith.negf %569 : vector<2x64xf32>
    %571 = math.exp %570 : vector<2x64xf32>
    %cst_107 = arith.constant 1.000000e+00 : f32
    %572 = vector.broadcast %cst_107 : f32 to vector<2x64xf32>
    %573 = arith.addf %572, %571 : vector<2x64xf32>
    %574 = arith.divf %572, %573 : vector<2x64xf32>
    %575 = math.tanh %569 : vector<2x64xf32>
    %576 = vector.extract_strided_slice %574 {offsets = [0, 0], sizes = [2, 16], strides = [1, 1]} : vector<2x64xf32> to vector<2x16xf32>
    %577 = vector.extract_strided_slice %574 {offsets = [0, 16], sizes = [2, 16], strides = [1, 1]} : vector<2x64xf32> to vector<2x16xf32>
    %578 = vector.extract_strided_slice %575 {offsets = [0, 32], sizes = [2, 16], strides = [1, 1]} : vector<2x64xf32> to vector<2x16xf32>
    %579 = vector.extract_strided_slice %574 {offsets = [0, 48], sizes = [2, 16], strides = [1, 1]} : vector<2x64xf32> to vector<2x16xf32>
    %580 = arith.mulf %577, %564 : vector<2x16xf32>
    %581 = arith.mulf %576, %578 : vector<2x16xf32>
    %582 = arith.addf %580, %581 : vector<2x16xf32>
    %583 = math.tanh %582 : vector<2x16xf32>
    %584 = arith.mulf %579, %583 : vector<2x16xf32>
    %c62 = arith.constant 62 : index
    %c0_108 = arith.constant 0 : index
    %585 = vector.load %arg7[%c62, %c0_108] : memref<128x16xf32, #tpu.memory_space<vmem>>, vector<2x16xf32>
    tpu.vector_store %arg7[%c62, %c0_108], %584 {strides = array<i32>} : memref<128x16xf32, #tpu.memory_space<vmem>>, vector<2x16xf32>,
    %cst_109 = arith.constant dense<0.000000e+00> : vector<2x64xf32>
    %586 = tpu.matmul %584, %1, %cst_109 {dimension_numbers = #tpu.dot_dimension_numbers<[1], [0], [0], [1], [0, 0, 1, 1], [], []>} : vector<2x16xf32>, vector<16x64xf32>, vector<2x64xf32> -> vector<2x64xf32>
    %587 = arith.addf %8, %586 : vector<2x64xf32>
    %588 = arith.negf %587 : vector<2x64xf32>
    %589 = math.exp %588 : vector<2x64xf32>
    %cst_110 = arith.constant 1.000000e+00 : f32
    %590 = vector.broadcast %cst_110 : f32 to vector<2x64xf32>
    %591 = arith.addf %590, %589 : vector<2x64xf32>
    %592 = arith.divf %590, %591 : vector<2x64xf32>
    %593 = math.tanh %587 : vector<2x64xf32>
    %594 = vector.extract_strided_slice %592 {offsets = [0, 0], sizes = [2, 16], strides = [1, 1]} : vector<2x64xf32> to vector<2x16xf32>
    %595 = vector.extract_strided_slice %592 {offsets = [0, 16], sizes = [2, 16], strides = [1, 1]} : vector<2x64xf32> to vector<2x16xf32>
    %596 = vector.extract_strided_slice %593 {offsets = [0, 32], sizes = [2, 16], strides = [1, 1]} : vector<2x64xf32> to vector<2x16xf32>
    %597 = vector.extract_strided_slice %592 {offsets = [0, 48], sizes = [2, 16], strides = [1, 1]} : vector<2x64xf32> to vector<2x16xf32>
    %598 = arith.mulf %595, %582 : vector<2x16xf32>
    %599 = arith.mulf %594, %596 : vector<2x16xf32>
    %600 = arith.addf %598, %599 : vector<2x16xf32>
    %601 = math.tanh %600 : vector<2x16xf32>
    %602 = arith.mulf %597, %601 : vector<2x16xf32>
    %c64 = arith.constant 64 : index
    %c0_111 = arith.constant 0 : index
    %603 = vector.load %arg7[%c64, %c0_111] : memref<128x16xf32, #tpu.memory_space<vmem>>, vector<2x16xf32>
    tpu.vector_store %arg7[%c64, %c0_111], %602 {strides = array<i32>} : memref<128x16xf32, #tpu.memory_space<vmem>>, vector<2x16xf32>,
    %cst_112 = arith.constant dense<0.000000e+00> : vector<2x64xf32>
    %604 = tpu.matmul %602, %1, %cst_112 {dimension_numbers = #tpu.dot_dimension_numbers<[1], [0], [0], [1], [0, 0, 1, 1], [], []>} : vector<2x16xf32>, vector<16x64xf32>, vector<2x64xf32> -> vector<2x64xf32>
    %605 = arith.addf %8, %604 : vector<2x64xf32>
    %606 = arith.negf %605 : vector<2x64xf32>
    %607 = math.exp %606 : vector<2x64xf32>
    %cst_113 = arith.constant 1.000000e+00 : f32
    %608 = vector.broadcast %cst_113 : f32 to vector<2x64xf32>
    %609 = arith.addf %608, %607 : vector<2x64xf32>
    %610 = arith.divf %608, %609 : vector<2x64xf32>
    %611 = math.tanh %605 : vector<2x64xf32>
    %612 = vector.extract_strided_slice %610 {offsets = [0, 0], sizes = [2, 16], strides = [1, 1]} : vector<2x64xf32> to vector<2x16xf32>
    %613 = vector.extract_strided_slice %610 {offsets = [0, 16], sizes = [2, 16], strides = [1, 1]} : vector<2x64xf32> to vector<2x16xf32>
    %614 = vector.extract_strided_slice %611 {offsets = [0, 32], sizes = [2, 16], strides = [1, 1]} : vector<2x64xf32> to vector<2x16xf32>
    %615 = vector.extract_strided_slice %610 {offsets = [0, 48], sizes = [2, 16], strides = [1, 1]} : vector<2x64xf32> to vector<2x16xf32>
    %616 = arith.mulf %613, %600 : vector<2x16xf32>
    %617 = arith.mulf %612, %614 : vector<2x16xf32>
    %618 = arith.addf %616, %617 : vector<2x16xf32>
    %619 = math.tanh %618 : vector<2x16xf32>
    %620 = arith.mulf %615, %619 : vector<2x16xf32>
    %c66 = arith.constant 66 : index
    %c0_114 = arith.constant 0 : index
    %621 = vector.load %arg7[%c66, %c0_114] : memref<128x16xf32, #tpu.memory_space<vmem>>, vector<2x16xf32>
    tpu.vector_store %arg7[%c66, %c0_114], %620 {strides = array<i32>} : memref<128x16xf32, #tpu.memory_space<vmem>>, vector<2x16xf32>,
    %cst_115 = arith.constant dense<0.000000e+00> : vector<2x64xf32>
    %622 = tpu.matmul %620, %1, %cst_115 {dimension_numbers = #tpu.dot_dimension_numbers<[1], [0], [0], [1], [0, 0, 1, 1], [], []>} : vector<2x16xf32>, vector<16x64xf32>, vector<2x64xf32> -> vector<2x64xf32>
    %623 = arith.addf %8, %622 : vector<2x64xf32>
    %624 = arith.negf %623 : vector<2x64xf32>
    %625 = math.exp %624 : vector<2x64xf32>
    %cst_116 = arith.constant 1.000000e+00 : f32
    %626 = vector.broadcast %cst_116 : f32 to vector<2x64xf32>
    %627 = arith.addf %626, %625 : vector<2x64xf32>
    %628 = arith.divf %626, %627 : vector<2x64xf32>
    %629 = math.tanh %623 : vector<2x64xf32>
    %630 = vector.extract_strided_slice %628 {offsets = [0, 0], sizes = [2, 16], strides = [1, 1]} : vector<2x64xf32> to vector<2x16xf32>
    %631 = vector.extract_strided_slice %628 {offsets = [0, 16], sizes = [2, 16], strides = [1, 1]} : vector<2x64xf32> to vector<2x16xf32>
    %632 = vector.extract_strided_slice %629 {offsets = [0, 32], sizes = [2, 16], strides = [1, 1]} : vector<2x64xf32> to vector<2x16xf32>
    %633 = vector.extract_strided_slice %628 {offsets = [0, 48], sizes = [2, 16], strides = [1, 1]} : vector<2x64xf32> to vector<2x16xf32>
    %634 = arith.mulf %631, %618 : vector<2x16xf32>
    %635 = arith.mulf %630, %632 : vector<2x16xf32>
    %636 = arith.addf %634, %635 : vector<2x16xf32>
    %637 = math.tanh %636 : vector<2x16xf32>
    %638 = arith.mulf %633, %637 : vector<2x16xf32>
    %c68 = arith.constant 68 : index
    %c0_117 = arith.constant 0 : index
    %639 = vector.load %arg7[%c68, %c0_117] : memref<128x16xf32, #tpu.memory_space<vmem>>, vector<2x16xf32>
    tpu.vector_store %arg7[%c68, %c0_117], %638 {strides = array<i32>} : memref<128x16xf32, #tpu.memory_space<vmem>>, vector<2x16xf32>,
    %cst_118 = arith.constant dense<0.000000e+00> : vector<2x64xf32>
    %640 = tpu.matmul %638, %1, %cst_118 {dimension_numbers = #tpu.dot_dimension_numbers<[1], [0], [0], [1], [0, 0, 1, 1], [], []>} : vector<2x16xf32>, vector<16x64xf32>, vector<2x64xf32> -> vector<2x64xf32>
    %641 = arith.addf %8, %640 : vector<2x64xf32>
    %642 = arith.negf %641 : vector<2x64xf32>
    %643 = math.exp %642 : vector<2x64xf32>
    %cst_119 = arith.constant 1.000000e+00 : f32
    %644 = vector.broadcast %cst_119 : f32 to vector<2x64xf32>
    %645 = arith.addf %644, %643 : vector<2x64xf32>
    %646 = arith.divf %644, %645 : vector<2x64xf32>
    %647 = math.tanh %641 : vector<2x64xf32>
    %648 = vector.extract_strided_slice %646 {offsets = [0, 0], sizes = [2, 16], strides = [1, 1]} : vector<2x64xf32> to vector<2x16xf32>
    %649 = vector.extract_strided_slice %646 {offsets = [0, 16], sizes = [2, 16], strides = [1, 1]} : vector<2x64xf32> to vector<2x16xf32>
    %650 = vector.extract_strided_slice %647 {offsets = [0, 32], sizes = [2, 16], strides = [1, 1]} : vector<2x64xf32> to vector<2x16xf32>
    %651 = vector.extract_strided_slice %646 {offsets = [0, 48], sizes = [2, 16], strides = [1, 1]} : vector<2x64xf32> to vector<2x16xf32>
    %652 = arith.mulf %649, %636 : vector<2x16xf32>
    %653 = arith.mulf %648, %650 : vector<2x16xf32>
    %654 = arith.addf %652, %653 : vector<2x16xf32>
    %655 = math.tanh %654 : vector<2x16xf32>
    %656 = arith.mulf %651, %655 : vector<2x16xf32>
    %c70 = arith.constant 70 : index
    %c0_120 = arith.constant 0 : index
    %657 = vector.load %arg7[%c70, %c0_120] : memref<128x16xf32, #tpu.memory_space<vmem>>, vector<2x16xf32>
    tpu.vector_store %arg7[%c70, %c0_120], %656 {strides = array<i32>} : memref<128x16xf32, #tpu.memory_space<vmem>>, vector<2x16xf32>,
    %cst_121 = arith.constant dense<0.000000e+00> : vector<2x64xf32>
    %658 = tpu.matmul %656, %1, %cst_121 {dimension_numbers = #tpu.dot_dimension_numbers<[1], [0], [0], [1], [0, 0, 1, 1], [], []>} : vector<2x16xf32>, vector<16x64xf32>, vector<2x64xf32> -> vector<2x64xf32>
    %659 = arith.addf %8, %658 : vector<2x64xf32>
    %660 = arith.negf %659 : vector<2x64xf32>
    %661 = math.exp %660 : vector<2x64xf32>
    %cst_122 = arith.constant 1.000000e+00 : f32
    %662 = vector.broadcast %cst_122 : f32 to vector<2x64xf32>
    %663 = arith.addf %662, %661 : vector<2x64xf32>
    %664 = arith.divf %662, %663 : vector<2x64xf32>
    %665 = math.tanh %659 : vector<2x64xf32>
    %666 = vector.extract_strided_slice %664 {offsets = [0, 0], sizes = [2, 16], strides = [1, 1]} : vector<2x64xf32> to vector<2x16xf32>
    %667 = vector.extract_strided_slice %664 {offsets = [0, 16], sizes = [2, 16], strides = [1, 1]} : vector<2x64xf32> to vector<2x16xf32>
    %668 = vector.extract_strided_slice %665 {offsets = [0, 32], sizes = [2, 16], strides = [1, 1]} : vector<2x64xf32> to vector<2x16xf32>
    %669 = vector.extract_strided_slice %664 {offsets = [0, 48], sizes = [2, 16], strides = [1, 1]} : vector<2x64xf32> to vector<2x16xf32>
    %670 = arith.mulf %667, %654 : vector<2x16xf32>
    %671 = arith.mulf %666, %668 : vector<2x16xf32>
    %672 = arith.addf %670, %671 : vector<2x16xf32>
    %673 = math.tanh %672 : vector<2x16xf32>
    %674 = arith.mulf %669, %673 : vector<2x16xf32>
    %c72 = arith.constant 72 : index
    %c0_123 = arith.constant 0 : index
    %675 = vector.load %arg7[%c72, %c0_123] : memref<128x16xf32, #tpu.memory_space<vmem>>, vector<2x16xf32>
    tpu.vector_store %arg7[%c72, %c0_123], %674 {strides = array<i32>} : memref<128x16xf32, #tpu.memory_space<vmem>>, vector<2x16xf32>,
    %cst_124 = arith.constant dense<0.000000e+00> : vector<2x64xf32>
    %676 = tpu.matmul %674, %1, %cst_124 {dimension_numbers = #tpu.dot_dimension_numbers<[1], [0], [0], [1], [0, 0, 1, 1], [], []>} : vector<2x16xf32>, vector<16x64xf32>, vector<2x64xf32> -> vector<2x64xf32>
    %677 = arith.addf %8, %676 : vector<2x64xf32>
    %678 = arith.negf %677 : vector<2x64xf32>
    %679 = math.exp %678 : vector<2x64xf32>
    %cst_125 = arith.constant 1.000000e+00 : f32
    %680 = vector.broadcast %cst_125 : f32 to vector<2x64xf32>
    %681 = arith.addf %680, %679 : vector<2x64xf32>
    %682 = arith.divf %680, %681 : vector<2x64xf32>
    %683 = math.tanh %677 : vector<2x64xf32>
    %684 = vector.extract_strided_slice %682 {offsets = [0, 0], sizes = [2, 16], strides = [1, 1]} : vector<2x64xf32> to vector<2x16xf32>
    %685 = vector.extract_strided_slice %682 {offsets = [0, 16], sizes = [2, 16], strides = [1, 1]} : vector<2x64xf32> to vector<2x16xf32>
    %686 = vector.extract_strided_slice %683 {offsets = [0, 32], sizes = [2, 16], strides = [1, 1]} : vector<2x64xf32> to vector<2x16xf32>
    %687 = vector.extract_strided_slice %682 {offsets = [0, 48], sizes = [2, 16], strides = [1, 1]} : vector<2x64xf32> to vector<2x16xf32>
    %688 = arith.mulf %685, %672 : vector<2x16xf32>
    %689 = arith.mulf %684, %686 : vector<2x16xf32>
    %690 = arith.addf %688, %689 : vector<2x16xf32>
    %691 = math.tanh %690 : vector<2x16xf32>
    %692 = arith.mulf %687, %691 : vector<2x16xf32>
    %c74 = arith.constant 74 : index
    %c0_126 = arith.constant 0 : index
    %693 = vector.load %arg7[%c74, %c0_126] : memref<128x16xf32, #tpu.memory_space<vmem>>, vector<2x16xf32>
    tpu.vector_store %arg7[%c74, %c0_126], %692 {strides = array<i32>} : memref<128x16xf32, #tpu.memory_space<vmem>>, vector<2x16xf32>,
    %cst_127 = arith.constant dense<0.000000e+00> : vector<2x64xf32>
    %694 = tpu.matmul %692, %1, %cst_127 {dimension_numbers = #tpu.dot_dimension_numbers<[1], [0], [0], [1], [0, 0, 1, 1], [], []>} : vector<2x16xf32>, vector<16x64xf32>, vector<2x64xf32> -> vector<2x64xf32>
    %695 = arith.addf %8, %694 : vector<2x64xf32>
    %696 = arith.negf %695 : vector<2x64xf32>
    %697 = math.exp %696 : vector<2x64xf32>
    %cst_128 = arith.constant 1.000000e+00 : f32
    %698 = vector.broadcast %cst_128 : f32 to vector<2x64xf32>
    %699 = arith.addf %698, %697 : vector<2x64xf32>
    %700 = arith.divf %698, %699 : vector<2x64xf32>
    %701 = math.tanh %695 : vector<2x64xf32>
    %702 = vector.extract_strided_slice %700 {offsets = [0, 0], sizes = [2, 16], strides = [1, 1]} : vector<2x64xf32> to vector<2x16xf32>
    %703 = vector.extract_strided_slice %700 {offsets = [0, 16], sizes = [2, 16], strides = [1, 1]} : vector<2x64xf32> to vector<2x16xf32>
    %704 = vector.extract_strided_slice %701 {offsets = [0, 32], sizes = [2, 16], strides = [1, 1]} : vector<2x64xf32> to vector<2x16xf32>
    %705 = vector.extract_strided_slice %700 {offsets = [0, 48], sizes = [2, 16], strides = [1, 1]} : vector<2x64xf32> to vector<2x16xf32>
    %706 = arith.mulf %703, %690 : vector<2x16xf32>
    %707 = arith.mulf %702, %704 : vector<2x16xf32>
    %708 = arith.addf %706, %707 : vector<2x16xf32>
    %709 = math.tanh %708 : vector<2x16xf32>
    %710 = arith.mulf %705, %709 : vector<2x16xf32>
    %c76 = arith.constant 76 : index
    %c0_129 = arith.constant 0 : index
    %711 = vector.load %arg7[%c76, %c0_129] : memref<128x16xf32, #tpu.memory_space<vmem>>, vector<2x16xf32>
    tpu.vector_store %arg7[%c76, %c0_129], %710 {strides = array<i32>} : memref<128x16xf32, #tpu.memory_space<vmem>>, vector<2x16xf32>,
    %cst_130 = arith.constant dense<0.000000e+00> : vector<2x64xf32>
    %712 = tpu.matmul %710, %1, %cst_130 {dimension_numbers = #tpu.dot_dimension_numbers<[1], [0], [0], [1], [0, 0, 1, 1], [], []>} : vector<2x16xf32>, vector<16x64xf32>, vector<2x64xf32> -> vector<2x64xf32>
    %713 = arith.addf %8, %712 : vector<2x64xf32>
    %714 = arith.negf %713 : vector<2x64xf32>
    %715 = math.exp %714 : vector<2x64xf32>
    %cst_131 = arith.constant 1.000000e+00 : f32
    %716 = vector.broadcast %cst_131 : f32 to vector<2x64xf32>
    %717 = arith.addf %716, %715 : vector<2x64xf32>
    %718 = arith.divf %716, %717 : vector<2x64xf32>
    %719 = math.tanh %713 : vector<2x64xf32>
    %720 = vector.extract_strided_slice %718 {offsets = [0, 0], sizes = [2, 16], strides = [1, 1]} : vector<2x64xf32> to vector<2x16xf32>
    %721 = vector.extract_strided_slice %718 {offsets = [0, 16], sizes = [2, 16], strides = [1, 1]} : vector<2x64xf32> to vector<2x16xf32>
    %722 = vector.extract_strided_slice %719 {offsets = [0, 32], sizes = [2, 16], strides = [1, 1]} : vector<2x64xf32> to vector<2x16xf32>
    %723 = vector.extract_strided_slice %718 {offsets = [0, 48], sizes = [2, 16], strides = [1, 1]} : vector<2x64xf32> to vector<2x16xf32>
    %724 = arith.mulf %721, %708 : vector<2x16xf32>
    %725 = arith.mulf %720, %722 : vector<2x16xf32>
    %726 = arith.addf %724, %725 : vector<2x16xf32>
    %727 = math.tanh %726 : vector<2x16xf32>
    %728 = arith.mulf %723, %727 : vector<2x16xf32>
    %c78 = arith.constant 78 : index
    %c0_132 = arith.constant 0 : index
    %729 = vector.load %arg7[%c78, %c0_132] : memref<128x16xf32, #tpu.memory_space<vmem>>, vector<2x16xf32>
    tpu.vector_store %arg7[%c78, %c0_132], %728 {strides = array<i32>} : memref<128x16xf32, #tpu.memory_space<vmem>>, vector<2x16xf32>,
    %cst_133 = arith.constant dense<0.000000e+00> : vector<2x64xf32>
    %730 = tpu.matmul %728, %1, %cst_133 {dimension_numbers = #tpu.dot_dimension_numbers<[1], [0], [0], [1], [0, 0, 1, 1], [], []>} : vector<2x16xf32>, vector<16x64xf32>, vector<2x64xf32> -> vector<2x64xf32>
    %731 = arith.addf %8, %730 : vector<2x64xf32>
    %732 = arith.negf %731 : vector<2x64xf32>
    %733 = math.exp %732 : vector<2x64xf32>
    %cst_134 = arith.constant 1.000000e+00 : f32
    %734 = vector.broadcast %cst_134 : f32 to vector<2x64xf32>
    %735 = arith.addf %734, %733 : vector<2x64xf32>
    %736 = arith.divf %734, %735 : vector<2x64xf32>
    %737 = math.tanh %731 : vector<2x64xf32>
    %738 = vector.extract_strided_slice %736 {offsets = [0, 0], sizes = [2, 16], strides = [1, 1]} : vector<2x64xf32> to vector<2x16xf32>
    %739 = vector.extract_strided_slice %736 {offsets = [0, 16], sizes = [2, 16], strides = [1, 1]} : vector<2x64xf32> to vector<2x16xf32>
    %740 = vector.extract_strided_slice %737 {offsets = [0, 32], sizes = [2, 16], strides = [1, 1]} : vector<2x64xf32> to vector<2x16xf32>
    %741 = vector.extract_strided_slice %736 {offsets = [0, 48], sizes = [2, 16], strides = [1, 1]} : vector<2x64xf32> to vector<2x16xf32>
    %742 = arith.mulf %739, %726 : vector<2x16xf32>
    %743 = arith.mulf %738, %740 : vector<2x16xf32>
    %744 = arith.addf %742, %743 : vector<2x16xf32>
    %745 = math.tanh %744 : vector<2x16xf32>
    %746 = arith.mulf %741, %745 : vector<2x16xf32>
    %c80 = arith.constant 80 : index
    %c0_135 = arith.constant 0 : index
    %747 = vector.load %arg7[%c80, %c0_135] : memref<128x16xf32, #tpu.memory_space<vmem>>, vector<2x16xf32>
    tpu.vector_store %arg7[%c80, %c0_135], %746 {strides = array<i32>} : memref<128x16xf32, #tpu.memory_space<vmem>>, vector<2x16xf32>,
    %cst_136 = arith.constant dense<0.000000e+00> : vector<2x64xf32>
    %748 = tpu.matmul %746, %1, %cst_136 {dimension_numbers = #tpu.dot_dimension_numbers<[1], [0], [0], [1], [0, 0, 1, 1], [], []>} : vector<2x16xf32>, vector<16x64xf32>, vector<2x64xf32> -> vector<2x64xf32>
    %749 = arith.addf %8, %748 : vector<2x64xf32>
    %750 = arith.negf %749 : vector<2x64xf32>
    %751 = math.exp %750 : vector<2x64xf32>
    %cst_137 = arith.constant 1.000000e+00 : f32
    %752 = vector.broadcast %cst_137 : f32 to vector<2x64xf32>
    %753 = arith.addf %752, %751 : vector<2x64xf32>
    %754 = arith.divf %752, %753 : vector<2x64xf32>
    %755 = math.tanh %749 : vector<2x64xf32>
    %756 = vector.extract_strided_slice %754 {offsets = [0, 0], sizes = [2, 16], strides = [1, 1]} : vector<2x64xf32> to vector<2x16xf32>
    %757 = vector.extract_strided_slice %754 {offsets = [0, 16], sizes = [2, 16], strides = [1, 1]} : vector<2x64xf32> to vector<2x16xf32>
    %758 = vector.extract_strided_slice %755 {offsets = [0, 32], sizes = [2, 16], strides = [1, 1]} : vector<2x64xf32> to vector<2x16xf32>
    %759 = vector.extract_strided_slice %754 {offsets = [0, 48], sizes = [2, 16], strides = [1, 1]} : vector<2x64xf32> to vector<2x16xf32>
    %760 = arith.mulf %757, %744 : vector<2x16xf32>
    %761 = arith.mulf %756, %758 : vector<2x16xf32>
    %762 = arith.addf %760, %761 : vector<2x16xf32>
    %763 = math.tanh %762 : vector<2x16xf32>
    %764 = arith.mulf %759, %763 : vector<2x16xf32>
    %c82 = arith.constant 82 : index
    %c0_138 = arith.constant 0 : index
    %765 = vector.load %arg7[%c82, %c0_138] : memref<128x16xf32, #tpu.memory_space<vmem>>, vector<2x16xf32>
    tpu.vector_store %arg7[%c82, %c0_138], %764 {strides = array<i32>} : memref<128x16xf32, #tpu.memory_space<vmem>>, vector<2x16xf32>,
    %cst_139 = arith.constant dense<0.000000e+00> : vector<2x64xf32>
    %766 = tpu.matmul %764, %1, %cst_139 {dimension_numbers = #tpu.dot_dimension_numbers<[1], [0], [0], [1], [0, 0, 1, 1], [], []>} : vector<2x16xf32>, vector<16x64xf32>, vector<2x64xf32> -> vector<2x64xf32>
    %767 = arith.addf %8, %766 : vector<2x64xf32>
    %768 = arith.negf %767 : vector<2x64xf32>
    %769 = math.exp %768 : vector<2x64xf32>
    %cst_140 = arith.constant 1.000000e+00 : f32
    %770 = vector.broadcast %cst_140 : f32 to vector<2x64xf32>
    %771 = arith.addf %770, %769 : vector<2x64xf32>
    %772 = arith.divf %770, %771 : vector<2x64xf32>
    %773 = math.tanh %767 : vector<2x64xf32>
    %774 = vector.extract_strided_slice %772 {offsets = [0, 0], sizes = [2, 16], strides = [1, 1]} : vector<2x64xf32> to vector<2x16xf32>
    %775 = vector.extract_strided_slice %772 {offsets = [0, 16], sizes = [2, 16], strides = [1, 1]} : vector<2x64xf32> to vector<2x16xf32>
    %776 = vector.extract_strided_slice %773 {offsets = [0, 32], sizes = [2, 16], strides = [1, 1]} : vector<2x64xf32> to vector<2x16xf32>
    %777 = vector.extract_strided_slice %772 {offsets = [0, 48], sizes = [2, 16], strides = [1, 1]} : vector<2x64xf32> to vector<2x16xf32>
    %778 = arith.mulf %775, %762 : vector<2x16xf32>
    %779 = arith.mulf %774, %776 : vector<2x16xf32>
    %780 = arith.addf %778, %779 : vector<2x16xf32>
    %781 = math.tanh %780 : vector<2x16xf32>
    %782 = arith.mulf %777, %781 : vector<2x16xf32>
    %c84 = arith.constant 84 : index
    %c0_141 = arith.constant 0 : index
    %783 = vector.load %arg7[%c84, %c0_141] : memref<128x16xf32, #tpu.memory_space<vmem>>, vector<2x16xf32>
    tpu.vector_store %arg7[%c84, %c0_141], %782 {strides = array<i32>} : memref<128x16xf32, #tpu.memory_space<vmem>>, vector<2x16xf32>,
    %cst_142 = arith.constant dense<0.000000e+00> : vector<2x64xf32>
    %784 = tpu.matmul %782, %1, %cst_142 {dimension_numbers = #tpu.dot_dimension_numbers<[1], [0], [0], [1], [0, 0, 1, 1], [], []>} : vector<2x16xf32>, vector<16x64xf32>, vector<2x64xf32> -> vector<2x64xf32>
    %785 = arith.addf %8, %784 : vector<2x64xf32>
    %786 = arith.negf %785 : vector<2x64xf32>
    %787 = math.exp %786 : vector<2x64xf32>
    %cst_143 = arith.constant 1.000000e+00 : f32
    %788 = vector.broadcast %cst_143 : f32 to vector<2x64xf32>
    %789 = arith.addf %788, %787 : vector<2x64xf32>
    %790 = arith.divf %788, %789 : vector<2x64xf32>
    %791 = math.tanh %785 : vector<2x64xf32>
    %792 = vector.extract_strided_slice %790 {offsets = [0, 0], sizes = [2, 16], strides = [1, 1]} : vector<2x64xf32> to vector<2x16xf32>
    %793 = vector.extract_strided_slice %790 {offsets = [0, 16], sizes = [2, 16], strides = [1, 1]} : vector<2x64xf32> to vector<2x16xf32>
    %794 = vector.extract_strided_slice %791 {offsets = [0, 32], sizes = [2, 16], strides = [1, 1]} : vector<2x64xf32> to vector<2x16xf32>
    %795 = vector.extract_strided_slice %790 {offsets = [0, 48], sizes = [2, 16], strides = [1, 1]} : vector<2x64xf32> to vector<2x16xf32>
    %796 = arith.mulf %793, %780 : vector<2x16xf32>
    %797 = arith.mulf %792, %794 : vector<2x16xf32>
    %798 = arith.addf %796, %797 : vector<2x16xf32>
    %799 = math.tanh %798 : vector<2x16xf32>
    %800 = arith.mulf %795, %799 : vector<2x16xf32>
    %c86 = arith.constant 86 : index
    %c0_144 = arith.constant 0 : index
    %801 = vector.load %arg7[%c86, %c0_144] : memref<128x16xf32, #tpu.memory_space<vmem>>, vector<2x16xf32>
    tpu.vector_store %arg7[%c86, %c0_144], %800 {strides = array<i32>} : memref<128x16xf32, #tpu.memory_space<vmem>>, vector<2x16xf32>,
    %cst_145 = arith.constant dense<0.000000e+00> : vector<2x64xf32>
    %802 = tpu.matmul %800, %1, %cst_145 {dimension_numbers = #tpu.dot_dimension_numbers<[1], [0], [0], [1], [0, 0, 1, 1], [], []>} : vector<2x16xf32>, vector<16x64xf32>, vector<2x64xf32> -> vector<2x64xf32>
    %803 = arith.addf %8, %802 : vector<2x64xf32>
    %804 = arith.negf %803 : vector<2x64xf32>
    %805 = math.exp %804 : vector<2x64xf32>
    %cst_146 = arith.constant 1.000000e+00 : f32
    %806 = vector.broadcast %cst_146 : f32 to vector<2x64xf32>
    %807 = arith.addf %806, %805 : vector<2x64xf32>
    %808 = arith.divf %806, %807 : vector<2x64xf32>
    %809 = math.tanh %803 : vector<2x64xf32>
    %810 = vector.extract_strided_slice %808 {offsets = [0, 0], sizes = [2, 16], strides = [1, 1]} : vector<2x64xf32> to vector<2x16xf32>
    %811 = vector.extract_strided_slice %808 {offsets = [0, 16], sizes = [2, 16], strides = [1, 1]} : vector<2x64xf32> to vector<2x16xf32>
    %812 = vector.extract_strided_slice %809 {offsets = [0, 32], sizes = [2, 16], strides = [1, 1]} : vector<2x64xf32> to vector<2x16xf32>
    %813 = vector.extract_strided_slice %808 {offsets = [0, 48], sizes = [2, 16], strides = [1, 1]} : vector<2x64xf32> to vector<2x16xf32>
    %814 = arith.mulf %811, %798 : vector<2x16xf32>
    %815 = arith.mulf %810, %812 : vector<2x16xf32>
    %816 = arith.addf %814, %815 : vector<2x16xf32>
    %817 = math.tanh %816 : vector<2x16xf32>
    %818 = arith.mulf %813, %817 : vector<2x16xf32>
    %c88 = arith.constant 88 : index
    %c0_147 = arith.constant 0 : index
    %819 = vector.load %arg7[%c88, %c0_147] : memref<128x16xf32, #tpu.memory_space<vmem>>, vector<2x16xf32>
    tpu.vector_store %arg7[%c88, %c0_147], %818 {strides = array<i32>} : memref<128x16xf32, #tpu.memory_space<vmem>>, vector<2x16xf32>,
    %cst_148 = arith.constant dense<0.000000e+00> : vector<2x64xf32>
    %820 = tpu.matmul %818, %1, %cst_148 {dimension_numbers = #tpu.dot_dimension_numbers<[1], [0], [0], [1], [0, 0, 1, 1], [], []>} : vector<2x16xf32>, vector<16x64xf32>, vector<2x64xf32> -> vector<2x64xf32>
    %821 = arith.addf %8, %820 : vector<2x64xf32>
    %822 = arith.negf %821 : vector<2x64xf32>
    %823 = math.exp %822 : vector<2x64xf32>
    %cst_149 = arith.constant 1.000000e+00 : f32
    %824 = vector.broadcast %cst_149 : f32 to vector<2x64xf32>
    %825 = arith.addf %824, %823 : vector<2x64xf32>
    %826 = arith.divf %824, %825 : vector<2x64xf32>
    %827 = math.tanh %821 : vector<2x64xf32>
    %828 = vector.extract_strided_slice %826 {offsets = [0, 0], sizes = [2, 16], strides = [1, 1]} : vector<2x64xf32> to vector<2x16xf32>
    %829 = vector.extract_strided_slice %826 {offsets = [0, 16], sizes = [2, 16], strides = [1, 1]} : vector<2x64xf32> to vector<2x16xf32>
    %830 = vector.extract_strided_slice %827 {offsets = [0, 32], sizes = [2, 16], strides = [1, 1]} : vector<2x64xf32> to vector<2x16xf32>
    %831 = vector.extract_strided_slice %826 {offsets = [0, 48], sizes = [2, 16], strides = [1, 1]} : vector<2x64xf32> to vector<2x16xf32>
    %832 = arith.mulf %829, %816 : vector<2x16xf32>
    %833 = arith.mulf %828, %830 : vector<2x16xf32>
    %834 = arith.addf %832, %833 : vector<2x16xf32>
    %835 = math.tanh %834 : vector<2x16xf32>
    %836 = arith.mulf %831, %835 : vector<2x16xf32>
    %c90 = arith.constant 90 : index
    %c0_150 = arith.constant 0 : index
    %837 = vector.load %arg7[%c90, %c0_150] : memref<128x16xf32, #tpu.memory_space<vmem>>, vector<2x16xf32>
    tpu.vector_store %arg7[%c90, %c0_150], %836 {strides = array<i32>} : memref<128x16xf32, #tpu.memory_space<vmem>>, vector<2x16xf32>,
    %cst_151 = arith.constant dense<0.000000e+00> : vector<2x64xf32>
    %838 = tpu.matmul %836, %1, %cst_151 {dimension_numbers = #tpu.dot_dimension_numbers<[1], [0], [0], [1], [0, 0, 1, 1], [], []>} : vector<2x16xf32>, vector<16x64xf32>, vector<2x64xf32> -> vector<2x64xf32>
    %839 = arith.addf %8, %838 : vector<2x64xf32>
    %840 = arith.negf %839 : vector<2x64xf32>
    %841 = math.exp %840 : vector<2x64xf32>
    %cst_152 = arith.constant 1.000000e+00 : f32
    %842 = vector.broadcast %cst_152 : f32 to vector<2x64xf32>
    %843 = arith.addf %842, %841 : vector<2x64xf32>
    %844 = arith.divf %842, %843 : vector<2x64xf32>
    %845 = math.tanh %839 : vector<2x64xf32>
    %846 = vector.extract_strided_slice %844 {offsets = [0, 0], sizes = [2, 16], strides = [1, 1]} : vector<2x64xf32> to vector<2x16xf32>
    %847 = vector.extract_strided_slice %844 {offsets = [0, 16], sizes = [2, 16], strides = [1, 1]} : vector<2x64xf32> to vector<2x16xf32>
    %848 = vector.extract_strided_slice %845 {offsets = [0, 32], sizes = [2, 16], strides = [1, 1]} : vector<2x64xf32> to vector<2x16xf32>
    %849 = vector.extract_strided_slice %844 {offsets = [0, 48], sizes = [2, 16], strides = [1, 1]} : vector<2x64xf32> to vector<2x16xf32>
    %850 = arith.mulf %847, %834 : vector<2x16xf32>
    %851 = arith.mulf %846, %848 : vector<2x16xf32>
    %852 = arith.addf %850, %851 : vector<2x16xf32>
    %853 = math.tanh %852 : vector<2x16xf32>
    %854 = arith.mulf %849, %853 : vector<2x16xf32>
    %c92 = arith.constant 92 : index
    %c0_153 = arith.constant 0 : index
    %855 = vector.load %arg7[%c92, %c0_153] : memref<128x16xf32, #tpu.memory_space<vmem>>, vector<2x16xf32>
    tpu.vector_store %arg7[%c92, %c0_153], %854 {strides = array<i32>} : memref<128x16xf32, #tpu.memory_space<vmem>>, vector<2x16xf32>,
    %cst_154 = arith.constant dense<0.000000e+00> : vector<2x64xf32>
    %856 = tpu.matmul %854, %1, %cst_154 {dimension_numbers = #tpu.dot_dimension_numbers<[1], [0], [0], [1], [0, 0, 1, 1], [], []>} : vector<2x16xf32>, vector<16x64xf32>, vector<2x64xf32> -> vector<2x64xf32>
    %857 = arith.addf %8, %856 : vector<2x64xf32>
    %858 = arith.negf %857 : vector<2x64xf32>
    %859 = math.exp %858 : vector<2x64xf32>
    %cst_155 = arith.constant 1.000000e+00 : f32
    %860 = vector.broadcast %cst_155 : f32 to vector<2x64xf32>
    %861 = arith.addf %860, %859 : vector<2x64xf32>
    %862 = arith.divf %860, %861 : vector<2x64xf32>
    %863 = math.tanh %857 : vector<2x64xf32>
    %864 = vector.extract_strided_slice %862 {offsets = [0, 0], sizes = [2, 16], strides = [1, 1]} : vector<2x64xf32> to vector<2x16xf32>
    %865 = vector.extract_strided_slice %862 {offsets = [0, 16], sizes = [2, 16], strides = [1, 1]} : vector<2x64xf32> to vector<2x16xf32>
    %866 = vector.extract_strided_slice %863 {offsets = [0, 32], sizes = [2, 16], strides = [1, 1]} : vector<2x64xf32> to vector<2x16xf32>
    %867 = vector.extract_strided_slice %862 {offsets = [0, 48], sizes = [2, 16], strides = [1, 1]} : vector<2x64xf32> to vector<2x16xf32>
    %868 = arith.mulf %865, %852 : vector<2x16xf32>
    %869 = arith.mulf %864, %866 : vector<2x16xf32>
    %870 = arith.addf %868, %869 : vector<2x16xf32>
    %871 = math.tanh %870 : vector<2x16xf32>
    %872 = arith.mulf %867, %871 : vector<2x16xf32>
    %c94 = arith.constant 94 : index
    %c0_156 = arith.constant 0 : index
    %873 = vector.load %arg7[%c94, %c0_156] : memref<128x16xf32, #tpu.memory_space<vmem>>, vector<2x16xf32>
    tpu.vector_store %arg7[%c94, %c0_156], %872 {strides = array<i32>} : memref<128x16xf32, #tpu.memory_space<vmem>>, vector<2x16xf32>,
    %cst_157 = arith.constant dense<0.000000e+00> : vector<2x64xf32>
    %874 = tpu.matmul %872, %1, %cst_157 {dimension_numbers = #tpu.dot_dimension_numbers<[1], [0], [0], [1], [0, 0, 1, 1], [], []>} : vector<2x16xf32>, vector<16x64xf32>, vector<2x64xf32> -> vector<2x64xf32>
    %875 = arith.addf %8, %874 : vector<2x64xf32>
    %876 = arith.negf %875 : vector<2x64xf32>
    %877 = math.exp %876 : vector<2x64xf32>
    %cst_158 = arith.constant 1.000000e+00 : f32
    %878 = vector.broadcast %cst_158 : f32 to vector<2x64xf32>
    %879 = arith.addf %878, %877 : vector<2x64xf32>
    %880 = arith.divf %878, %879 : vector<2x64xf32>
    %881 = math.tanh %875 : vector<2x64xf32>
    %882 = vector.extract_strided_slice %880 {offsets = [0, 0], sizes = [2, 16], strides = [1, 1]} : vector<2x64xf32> to vector<2x16xf32>
    %883 = vector.extract_strided_slice %880 {offsets = [0, 16], sizes = [2, 16], strides = [1, 1]} : vector<2x64xf32> to vector<2x16xf32>
    %884 = vector.extract_strided_slice %881 {offsets = [0, 32], sizes = [2, 16], strides = [1, 1]} : vector<2x64xf32> to vector<2x16xf32>
    %885 = vector.extract_strided_slice %880 {offsets = [0, 48], sizes = [2, 16], strides = [1, 1]} : vector<2x64xf32> to vector<2x16xf32>
    %886 = arith.mulf %883, %870 : vector<2x16xf32>
    %887 = arith.mulf %882, %884 : vector<2x16xf32>
    %888 = arith.addf %886, %887 : vector<2x16xf32>
    %889 = math.tanh %888 : vector<2x16xf32>
    %890 = arith.mulf %885, %889 : vector<2x16xf32>
    %c96 = arith.constant 96 : index
    %c0_159 = arith.constant 0 : index
    %891 = vector.load %arg7[%c96, %c0_159] : memref<128x16xf32, #tpu.memory_space<vmem>>, vector<2x16xf32>
    tpu.vector_store %arg7[%c96, %c0_159], %890 {strides = array<i32>} : memref<128x16xf32, #tpu.memory_space<vmem>>, vector<2x16xf32>,
    %cst_160 = arith.constant dense<0.000000e+00> : vector<2x64xf32>
    %892 = tpu.matmul %890, %1, %cst_160 {dimension_numbers = #tpu.dot_dimension_numbers<[1], [0], [0], [1], [0, 0, 1, 1], [], []>} : vector<2x16xf32>, vector<16x64xf32>, vector<2x64xf32> -> vector<2x64xf32>
    %893 = arith.addf %8, %892 : vector<2x64xf32>
    %894 = arith.negf %893 : vector<2x64xf32>
    %895 = math.exp %894 : vector<2x64xf32>
    %cst_161 = arith.constant 1.000000e+00 : f32
    %896 = vector.broadcast %cst_161 : f32 to vector<2x64xf32>
    %897 = arith.addf %896, %895 : vector<2x64xf32>
    %898 = arith.divf %896, %897 : vector<2x64xf32>
    %899 = math.tanh %893 : vector<2x64xf32>
    %900 = vector.extract_strided_slice %898 {offsets = [0, 0], sizes = [2, 16], strides = [1, 1]} : vector<2x64xf32> to vector<2x16xf32>
    %901 = vector.extract_strided_slice %898 {offsets = [0, 16], sizes = [2, 16], strides = [1, 1]} : vector<2x64xf32> to vector<2x16xf32>
    %902 = vector.extract_strided_slice %899 {offsets = [0, 32], sizes = [2, 16], strides = [1, 1]} : vector<2x64xf32> to vector<2x16xf32>
    %903 = vector.extract_strided_slice %898 {offsets = [0, 48], sizes = [2, 16], strides = [1, 1]} : vector<2x64xf32> to vector<2x16xf32>
    %904 = arith.mulf %901, %888 : vector<2x16xf32>
    %905 = arith.mulf %900, %902 : vector<2x16xf32>
    %906 = arith.addf %904, %905 : vector<2x16xf32>
    %907 = math.tanh %906 : vector<2x16xf32>
    %908 = arith.mulf %903, %907 : vector<2x16xf32>
    %c98 = arith.constant 98 : index
    %c0_162 = arith.constant 0 : index
    %909 = vector.load %arg7[%c98, %c0_162] : memref<128x16xf32, #tpu.memory_space<vmem>>, vector<2x16xf32>
    tpu.vector_store %arg7[%c98, %c0_162], %908 {strides = array<i32>} : memref<128x16xf32, #tpu.memory_space<vmem>>, vector<2x16xf32>,
    %cst_163 = arith.constant dense<0.000000e+00> : vector<2x64xf32>
    %910 = tpu.matmul %908, %1, %cst_163 {dimension_numbers = #tpu.dot_dimension_numbers<[1], [0], [0], [1], [0, 0, 1, 1], [], []>} : vector<2x16xf32>, vector<16x64xf32>, vector<2x64xf32> -> vector<2x64xf32>
    %911 = arith.addf %8, %910 : vector<2x64xf32>
    %912 = arith.negf %911 : vector<2x64xf32>
    %913 = math.exp %912 : vector<2x64xf32>
    %cst_164 = arith.constant 1.000000e+00 : f32
    %914 = vector.broadcast %cst_164 : f32 to vector<2x64xf32>
    %915 = arith.addf %914, %913 : vector<2x64xf32>
    %916 = arith.divf %914, %915 : vector<2x64xf32>
    %917 = math.tanh %911 : vector<2x64xf32>
    %918 = vector.extract_strided_slice %916 {offsets = [0, 0], sizes = [2, 16], strides = [1, 1]} : vector<2x64xf32> to vector<2x16xf32>
    %919 = vector.extract_strided_slice %916 {offsets = [0, 16], sizes = [2, 16], strides = [1, 1]} : vector<2x64xf32> to vector<2x16xf32>
    %920 = vector.extract_strided_slice %917 {offsets = [0, 32], sizes = [2, 16], strides = [1, 1]} : vector<2x64xf32> to vector<2x16xf32>
    %921 = vector.extract_strided_slice %916 {offsets = [0, 48], sizes = [2, 16], strides = [1, 1]} : vector<2x64xf32> to vector<2x16xf32>
    %922 = arith.mulf %919, %906 : vector<2x16xf32>
    %923 = arith.mulf %918, %920 : vector<2x16xf32>
    %924 = arith.addf %922, %923 : vector<2x16xf32>
    %925 = math.tanh %924 : vector<2x16xf32>
    %926 = arith.mulf %921, %925 : vector<2x16xf32>
    %c100 = arith.constant 100 : index
    %c0_165 = arith.constant 0 : index
    %927 = vector.load %arg7[%c100, %c0_165] : memref<128x16xf32, #tpu.memory_space<vmem>>, vector<2x16xf32>
    tpu.vector_store %arg7[%c100, %c0_165], %926 {strides = array<i32>} : memref<128x16xf32, #tpu.memory_space<vmem>>, vector<2x16xf32>,
    %cst_166 = arith.constant dense<0.000000e+00> : vector<2x64xf32>
    %928 = tpu.matmul %926, %1, %cst_166 {dimension_numbers = #tpu.dot_dimension_numbers<[1], [0], [0], [1], [0, 0, 1, 1], [], []>} : vector<2x16xf32>, vector<16x64xf32>, vector<2x64xf32> -> vector<2x64xf32>
    %929 = arith.addf %8, %928 : vector<2x64xf32>
    %930 = arith.negf %929 : vector<2x64xf32>
    %931 = math.exp %930 : vector<2x64xf32>
    %cst_167 = arith.constant 1.000000e+00 : f32
    %932 = vector.broadcast %cst_167 : f32 to vector<2x64xf32>
    %933 = arith.addf %932, %931 : vector<2x64xf32>
    %934 = arith.divf %932, %933 : vector<2x64xf32>
    %935 = math.tanh %929 : vector<2x64xf32>
    %936 = vector.extract_strided_slice %934 {offsets = [0, 0], sizes = [2, 16], strides = [1, 1]} : vector<2x64xf32> to vector<2x16xf32>
    %937 = vector.extract_strided_slice %934 {offsets = [0, 16], sizes = [2, 16], strides = [1, 1]} : vector<2x64xf32> to vector<2x16xf32>
    %938 = vector.extract_strided_slice %935 {offsets = [0, 32], sizes = [2, 16], strides = [1, 1]} : vector<2x64xf32> to vector<2x16xf32>
    %939 = vector.extract_strided_slice %934 {offsets = [0, 48], sizes = [2, 16], strides = [1, 1]} : vector<2x64xf32> to vector<2x16xf32>
    %940 = arith.mulf %937, %924 : vector<2x16xf32>
    %941 = arith.mulf %936, %938 : vector<2x16xf32>
    %942 = arith.addf %940, %941 : vector<2x16xf32>
    %943 = math.tanh %942 : vector<2x16xf32>
    %944 = arith.mulf %939, %943 : vector<2x16xf32>
    %c102 = arith.constant 102 : index
    %c0_168 = arith.constant 0 : index
    %945 = vector.load %arg7[%c102, %c0_168] : memref<128x16xf32, #tpu.memory_space<vmem>>, vector<2x16xf32>
    tpu.vector_store %arg7[%c102, %c0_168], %944 {strides = array<i32>} : memref<128x16xf32, #tpu.memory_space<vmem>>, vector<2x16xf32>,
    %cst_169 = arith.constant dense<0.000000e+00> : vector<2x64xf32>
    %946 = tpu.matmul %944, %1, %cst_169 {dimension_numbers = #tpu.dot_dimension_numbers<[1], [0], [0], [1], [0, 0, 1, 1], [], []>} : vector<2x16xf32>, vector<16x64xf32>, vector<2x64xf32> -> vector<2x64xf32>
    %947 = arith.addf %8, %946 : vector<2x64xf32>
    %948 = arith.negf %947 : vector<2x64xf32>
    %949 = math.exp %948 : vector<2x64xf32>
    %cst_170 = arith.constant 1.000000e+00 : f32
    %950 = vector.broadcast %cst_170 : f32 to vector<2x64xf32>
    %951 = arith.addf %950, %949 : vector<2x64xf32>
    %952 = arith.divf %950, %951 : vector<2x64xf32>
    %953 = math.tanh %947 : vector<2x64xf32>
    %954 = vector.extract_strided_slice %952 {offsets = [0, 0], sizes = [2, 16], strides = [1, 1]} : vector<2x64xf32> to vector<2x16xf32>
    %955 = vector.extract_strided_slice %952 {offsets = [0, 16], sizes = [2, 16], strides = [1, 1]} : vector<2x64xf32> to vector<2x16xf32>
    %956 = vector.extract_strided_slice %953 {offsets = [0, 32], sizes = [2, 16], strides = [1, 1]} : vector<2x64xf32> to vector<2x16xf32>
    %957 = vector.extract_strided_slice %952 {offsets = [0, 48], sizes = [2, 16], strides = [1, 1]} : vector<2x64xf32> to vector<2x16xf32>
    %958 = arith.mulf %955, %942 : vector<2x16xf32>
    %959 = arith.mulf %954, %956 : vector<2x16xf32>
    %960 = arith.addf %958, %959 : vector<2x16xf32>
    %961 = math.tanh %960 : vector<2x16xf32>
    %962 = arith.mulf %957, %961 : vector<2x16xf32>
    %c104 = arith.constant 104 : index
    %c0_171 = arith.constant 0 : index
    %963 = vector.load %arg7[%c104, %c0_171] : memref<128x16xf32, #tpu.memory_space<vmem>>, vector<2x16xf32>
    tpu.vector_store %arg7[%c104, %c0_171], %962 {strides = array<i32>} : memref<128x16xf32, #tpu.memory_space<vmem>>, vector<2x16xf32>,
    %cst_172 = arith.constant dense<0.000000e+00> : vector<2x64xf32>
    %964 = tpu.matmul %962, %1, %cst_172 {dimension_numbers = #tpu.dot_dimension_numbers<[1], [0], [0], [1], [0, 0, 1, 1], [], []>} : vector<2x16xf32>, vector<16x64xf32>, vector<2x64xf32> -> vector<2x64xf32>
    %965 = arith.addf %8, %964 : vector<2x64xf32>
    %966 = arith.negf %965 : vector<2x64xf32>
    %967 = math.exp %966 : vector<2x64xf32>
    %cst_173 = arith.constant 1.000000e+00 : f32
    %968 = vector.broadcast %cst_173 : f32 to vector<2x64xf32>
    %969 = arith.addf %968, %967 : vector<2x64xf32>
    %970 = arith.divf %968, %969 : vector<2x64xf32>
    %971 = math.tanh %965 : vector<2x64xf32>
    %972 = vector.extract_strided_slice %970 {offsets = [0, 0], sizes = [2, 16], strides = [1, 1]} : vector<2x64xf32> to vector<2x16xf32>
    %973 = vector.extract_strided_slice %970 {offsets = [0, 16], sizes = [2, 16], strides = [1, 1]} : vector<2x64xf32> to vector<2x16xf32>
    %974 = vector.extract_strided_slice %971 {offsets = [0, 32], sizes = [2, 16], strides = [1, 1]} : vector<2x64xf32> to vector<2x16xf32>
    %975 = vector.extract_strided_slice %970 {offsets = [0, 48], sizes = [2, 16], strides = [1, 1]} : vector<2x64xf32> to vector<2x16xf32>
    %976 = arith.mulf %973, %960 : vector<2x16xf32>
    %977 = arith.mulf %972, %974 : vector<2x16xf32>
    %978 = arith.addf %976, %977 : vector<2x16xf32>
    %979 = math.tanh %978 : vector<2x16xf32>
    %980 = arith.mulf %975, %979 : vector<2x16xf32>
    %c106 = arith.constant 106 : index
    %c0_174 = arith.constant 0 : index
    %981 = vector.load %arg7[%c106, %c0_174] : memref<128x16xf32, #tpu.memory_space<vmem>>, vector<2x16xf32>
    tpu.vector_store %arg7[%c106, %c0_174], %980 {strides = array<i32>} : memref<128x16xf32, #tpu.memory_space<vmem>>, vector<2x16xf32>,
    %cst_175 = arith.constant dense<0.000000e+00> : vector<2x64xf32>
    %982 = tpu.matmul %980, %1, %cst_175 {dimension_numbers = #tpu.dot_dimension_numbers<[1], [0], [0], [1], [0, 0, 1, 1], [], []>} : vector<2x16xf32>, vector<16x64xf32>, vector<2x64xf32> -> vector<2x64xf32>
    %983 = arith.addf %8, %982 : vector<2x64xf32>
    %984 = arith.negf %983 : vector<2x64xf32>
    %985 = math.exp %984 : vector<2x64xf32>
    %cst_176 = arith.constant 1.000000e+00 : f32
    %986 = vector.broadcast %cst_176 : f32 to vector<2x64xf32>
    %987 = arith.addf %986, %985 : vector<2x64xf32>
    %988 = arith.divf %986, %987 : vector<2x64xf32>
    %989 = math.tanh %983 : vector<2x64xf32>
    %990 = vector.extract_strided_slice %988 {offsets = [0, 0], sizes = [2, 16], strides = [1, 1]} : vector<2x64xf32> to vector<2x16xf32>
    %991 = vector.extract_strided_slice %988 {offsets = [0, 16], sizes = [2, 16], strides = [1, 1]} : vector<2x64xf32> to vector<2x16xf32>
    %992 = vector.extract_strided_slice %989 {offsets = [0, 32], sizes = [2, 16], strides = [1, 1]} : vector<2x64xf32> to vector<2x16xf32>
    %993 = vector.extract_strided_slice %988 {offsets = [0, 48], sizes = [2, 16], strides = [1, 1]} : vector<2x64xf32> to vector<2x16xf32>
    %994 = arith.mulf %991, %978 : vector<2x16xf32>
    %995 = arith.mulf %990, %992 : vector<2x16xf32>
    %996 = arith.addf %994, %995 : vector<2x16xf32>
    %997 = math.tanh %996 : vector<2x16xf32>
    %998 = arith.mulf %993, %997 : vector<2x16xf32>
    %c108 = arith.constant 108 : index
    %c0_177 = arith.constant 0 : index
    %999 = vector.load %arg7[%c108, %c0_177] : memref<128x16xf32, #tpu.memory_space<vmem>>, vector<2x16xf32>
    tpu.vector_store %arg7[%c108, %c0_177], %998 {strides = array<i32>} : memref<128x16xf32, #tpu.memory_space<vmem>>, vector<2x16xf32>,
    %cst_178 = arith.constant dense<0.000000e+00> : vector<2x64xf32>
    %1000 = tpu.matmul %998, %1, %cst_178 {dimension_numbers = #tpu.dot_dimension_numbers<[1], [0], [0], [1], [0, 0, 1, 1], [], []>} : vector<2x16xf32>, vector<16x64xf32>, vector<2x64xf32> -> vector<2x64xf32>
    %1001 = arith.addf %8, %1000 : vector<2x64xf32>
    %1002 = arith.negf %1001 : vector<2x64xf32>
    %1003 = math.exp %1002 : vector<2x64xf32>
    %cst_179 = arith.constant 1.000000e+00 : f32
    %1004 = vector.broadcast %cst_179 : f32 to vector<2x64xf32>
    %1005 = arith.addf %1004, %1003 : vector<2x64xf32>
    %1006 = arith.divf %1004, %1005 : vector<2x64xf32>
    %1007 = math.tanh %1001 : vector<2x64xf32>
    %1008 = vector.extract_strided_slice %1006 {offsets = [0, 0], sizes = [2, 16], strides = [1, 1]} : vector<2x64xf32> to vector<2x16xf32>
    %1009 = vector.extract_strided_slice %1006 {offsets = [0, 16], sizes = [2, 16], strides = [1, 1]} : vector<2x64xf32> to vector<2x16xf32>
    %1010 = vector.extract_strided_slice %1007 {offsets = [0, 32], sizes = [2, 16], strides = [1, 1]} : vector<2x64xf32> to vector<2x16xf32>
    %1011 = vector.extract_strided_slice %1006 {offsets = [0, 48], sizes = [2, 16], strides = [1, 1]} : vector<2x64xf32> to vector<2x16xf32>
    %1012 = arith.mulf %1009, %996 : vector<2x16xf32>
    %1013 = arith.mulf %1008, %1010 : vector<2x16xf32>
    %1014 = arith.addf %1012, %1013 : vector<2x16xf32>
    %1015 = math.tanh %1014 : vector<2x16xf32>
    %1016 = arith.mulf %1011, %1015 : vector<2x16xf32>
    %c110 = arith.constant 110 : index
    %c0_180 = arith.constant 0 : index
    %1017 = vector.load %arg7[%c110, %c0_180] : memref<128x16xf32, #tpu.memory_space<vmem>>, vector<2x16xf32>
    tpu.vector_store %arg7[%c110, %c0_180], %1016 {strides = array<i32>} : memref<128x16xf32, #tpu.memory_space<vmem>>, vector<2x16xf32>,
    %cst_181 = arith.constant dense<0.000000e+00> : vector<2x64xf32>
    %1018 = tpu.matmul %1016, %1, %cst_181 {dimension_numbers = #tpu.dot_dimension_numbers<[1], [0], [0], [1], [0, 0, 1, 1], [], []>} : vector<2x16xf32>, vector<16x64xf32>, vector<2x64xf32> -> vector<2x64xf32>
    %1019 = arith.addf %8, %1018 : vector<2x64xf32>
    %1020 = arith.negf %1019 : vector<2x64xf32>
    %1021 = math.exp %1020 : vector<2x64xf32>
    %cst_182 = arith.constant 1.000000e+00 : f32
    %1022 = vector.broadcast %cst_182 : f32 to vector<2x64xf32>
    %1023 = arith.addf %1022, %1021 : vector<2x64xf32>
    %1024 = arith.divf %1022, %1023 : vector<2x64xf32>
    %1025 = math.tanh %1019 : vector<2x64xf32>
    %1026 = vector.extract_strided_slice %1024 {offsets = [0, 0], sizes = [2, 16], strides = [1, 1]} : vector<2x64xf32> to vector<2x16xf32>
    %1027 = vector.extract_strided_slice %1024 {offsets = [0, 16], sizes = [2, 16], strides = [1, 1]} : vector<2x64xf32> to vector<2x16xf32>
    %1028 = vector.extract_strided_slice %1025 {offsets = [0, 32], sizes = [2, 16], strides = [1, 1]} : vector<2x64xf32> to vector<2x16xf32>
    %1029 = vector.extract_strided_slice %1024 {offsets = [0, 48], sizes = [2, 16], strides = [1, 1]} : vector<2x64xf32> to vector<2x16xf32>
    %1030 = arith.mulf %1027, %1014 : vector<2x16xf32>
    %1031 = arith.mulf %1026, %1028 : vector<2x16xf32>
    %1032 = arith.addf %1030, %1031 : vector<2x16xf32>
    %1033 = math.tanh %1032 : vector<2x16xf32>
    %1034 = arith.mulf %1029, %1033 : vector<2x16xf32>
    %c112 = arith.constant 112 : index
    %c0_183 = arith.constant 0 : index
    %1035 = vector.load %arg7[%c112, %c0_183] : memref<128x16xf32, #tpu.memory_space<vmem>>, vector<2x16xf32>
    tpu.vector_store %arg7[%c112, %c0_183], %1034 {strides = array<i32>} : memref<128x16xf32, #tpu.memory_space<vmem>>, vector<2x16xf32>,
    %cst_184 = arith.constant dense<0.000000e+00> : vector<2x64xf32>
    %1036 = tpu.matmul %1034, %1, %cst_184 {dimension_numbers = #tpu.dot_dimension_numbers<[1], [0], [0], [1], [0, 0, 1, 1], [], []>} : vector<2x16xf32>, vector<16x64xf32>, vector<2x64xf32> -> vector<2x64xf32>
    %1037 = arith.addf %8, %1036 : vector<2x64xf32>
    %1038 = arith.negf %1037 : vector<2x64xf32>
    %1039 = math.exp %1038 : vector<2x64xf32>
    %cst_185 = arith.constant 1.000000e+00 : f32
    %1040 = vector.broadcast %cst_185 : f32 to vector<2x64xf32>
    %1041 = arith.addf %1040, %1039 : vector<2x64xf32>
    %1042 = arith.divf %1040, %1041 : vector<2x64xf32>
    %1043 = math.tanh %1037 : vector<2x64xf32>
    %1044 = vector.extract_strided_slice %1042 {offsets = [0, 0], sizes = [2, 16], strides = [1, 1]} : vector<2x64xf32> to vector<2x16xf32>
    %1045 = vector.extract_strided_slice %1042 {offsets = [0, 16], sizes = [2, 16], strides = [1, 1]} : vector<2x64xf32> to vector<2x16xf32>
    %1046 = vector.extract_strided_slice %1043 {offsets = [0, 32], sizes = [2, 16], strides = [1, 1]} : vector<2x64xf32> to vector<2x16xf32>
    %1047 = vector.extract_strided_slice %1042 {offsets = [0, 48], sizes = [2, 16], strides = [1, 1]} : vector<2x64xf32> to vector<2x16xf32>
    %1048 = arith.mulf %1045, %1032 : vector<2x16xf32>
    %1049 = arith.mulf %1044, %1046 : vector<2x16xf32>
    %1050 = arith.addf %1048, %1049 : vector<2x16xf32>
    %1051 = math.tanh %1050 : vector<2x16xf32>
    %1052 = arith.mulf %1047, %1051 : vector<2x16xf32>
    %c114 = arith.constant 114 : index
    %c0_186 = arith.constant 0 : index
    %1053 = vector.load %arg7[%c114, %c0_186] : memref<128x16xf32, #tpu.memory_space<vmem>>, vector<2x16xf32>
    tpu.vector_store %arg7[%c114, %c0_186], %1052 {strides = array<i32>} : memref<128x16xf32, #tpu.memory_space<vmem>>, vector<2x16xf32>,
    %cst_187 = arith.constant dense<0.000000e+00> : vector<2x64xf32>
    %1054 = tpu.matmul %1052, %1, %cst_187 {dimension_numbers = #tpu.dot_dimension_numbers<[1], [0], [0], [1], [0, 0, 1, 1], [], []>} : vector<2x16xf32>, vector<16x64xf32>, vector<2x64xf32> -> vector<2x64xf32>
    %1055 = arith.addf %8, %1054 : vector<2x64xf32>
    %1056 = arith.negf %1055 : vector<2x64xf32>
    %1057 = math.exp %1056 : vector<2x64xf32>
    %cst_188 = arith.constant 1.000000e+00 : f32
    %1058 = vector.broadcast %cst_188 : f32 to vector<2x64xf32>
    %1059 = arith.addf %1058, %1057 : vector<2x64xf32>
    %1060 = arith.divf %1058, %1059 : vector<2x64xf32>
    %1061 = math.tanh %1055 : vector<2x64xf32>
    %1062 = vector.extract_strided_slice %1060 {offsets = [0, 0], sizes = [2, 16], strides = [1, 1]} : vector<2x64xf32> to vector<2x16xf32>
    %1063 = vector.extract_strided_slice %1060 {offsets = [0, 16], sizes = [2, 16], strides = [1, 1]} : vector<2x64xf32> to vector<2x16xf32>
    %1064 = vector.extract_strided_slice %1061 {offsets = [0, 32], sizes = [2, 16], strides = [1, 1]} : vector<2x64xf32> to vector<2x16xf32>
    %1065 = vector.extract_strided_slice %1060 {offsets = [0, 48], sizes = [2, 16], strides = [1, 1]} : vector<2x64xf32> to vector<2x16xf32>
    %1066 = arith.mulf %1063, %1050 : vector<2x16xf32>
    %1067 = arith.mulf %1062, %1064 : vector<2x16xf32>
    %1068 = arith.addf %1066, %1067 : vector<2x16xf32>
    %1069 = math.tanh %1068 : vector<2x16xf32>
    %1070 = arith.mulf %1065, %1069 : vector<2x16xf32>
    %c116 = arith.constant 116 : index
    %c0_189 = arith.constant 0 : index
    %1071 = vector.load %arg7[%c116, %c0_189] : memref<128x16xf32, #tpu.memory_space<vmem>>, vector<2x16xf32>
    tpu.vector_store %arg7[%c116, %c0_189], %1070 {strides = array<i32>} : memref<128x16xf32, #tpu.memory_space<vmem>>, vector<2x16xf32>,
    %cst_190 = arith.constant dense<0.000000e+00> : vector<2x64xf32>
    %1072 = tpu.matmul %1070, %1, %cst_190 {dimension_numbers = #tpu.dot_dimension_numbers<[1], [0], [0], [1], [0, 0, 1, 1], [], []>} : vector<2x16xf32>, vector<16x64xf32>, vector<2x64xf32> -> vector<2x64xf32>
    %1073 = arith.addf %8, %1072 : vector<2x64xf32>
    %1074 = arith.negf %1073 : vector<2x64xf32>
    %1075 = math.exp %1074 : vector<2x64xf32>
    %cst_191 = arith.constant 1.000000e+00 : f32
    %1076 = vector.broadcast %cst_191 : f32 to vector<2x64xf32>
    %1077 = arith.addf %1076, %1075 : vector<2x64xf32>
    %1078 = arith.divf %1076, %1077 : vector<2x64xf32>
    %1079 = math.tanh %1073 : vector<2x64xf32>
    %1080 = vector.extract_strided_slice %1078 {offsets = [0, 0], sizes = [2, 16], strides = [1, 1]} : vector<2x64xf32> to vector<2x16xf32>
    %1081 = vector.extract_strided_slice %1078 {offsets = [0, 16], sizes = [2, 16], strides = [1, 1]} : vector<2x64xf32> to vector<2x16xf32>
    %1082 = vector.extract_strided_slice %1079 {offsets = [0, 32], sizes = [2, 16], strides = [1, 1]} : vector<2x64xf32> to vector<2x16xf32>
    %1083 = vector.extract_strided_slice %1078 {offsets = [0, 48], sizes = [2, 16], strides = [1, 1]} : vector<2x64xf32> to vector<2x16xf32>
    %1084 = arith.mulf %1081, %1068 : vector<2x16xf32>
    %1085 = arith.mulf %1080, %1082 : vector<2x16xf32>
    %1086 = arith.addf %1084, %1085 : vector<2x16xf32>
    %1087 = math.tanh %1086 : vector<2x16xf32>
    %1088 = arith.mulf %1083, %1087 : vector<2x16xf32>
    %c118 = arith.constant 118 : index
    %c0_192 = arith.constant 0 : index
    %1089 = vector.load %arg7[%c118, %c0_192] : memref<128x16xf32, #tpu.memory_space<vmem>>, vector<2x16xf32>
    tpu.vector_store %arg7[%c118, %c0_192], %1088 {strides = array<i32>} : memref<128x16xf32, #tpu.memory_space<vmem>>, vector<2x16xf32>,
    %cst_193 = arith.constant dense<0.000000e+00> : vector<2x64xf32>
    %1090 = tpu.matmul %1088, %1, %cst_193 {dimension_numbers = #tpu.dot_dimension_numbers<[1], [0], [0], [1], [0, 0, 1, 1], [], []>} : vector<2x16xf32>, vector<16x64xf32>, vector<2x64xf32> -> vector<2x64xf32>
    %1091 = arith.addf %8, %1090 : vector<2x64xf32>
    %1092 = arith.negf %1091 : vector<2x64xf32>
    %1093 = math.exp %1092 : vector<2x64xf32>
    %cst_194 = arith.constant 1.000000e+00 : f32
    %1094 = vector.broadcast %cst_194 : f32 to vector<2x64xf32>
    %1095 = arith.addf %1094, %1093 : vector<2x64xf32>
    %1096 = arith.divf %1094, %1095 : vector<2x64xf32>
    %1097 = math.tanh %1091 : vector<2x64xf32>
    %1098 = vector.extract_strided_slice %1096 {offsets = [0, 0], sizes = [2, 16], strides = [1, 1]} : vector<2x64xf32> to vector<2x16xf32>
    %1099 = vector.extract_strided_slice %1096 {offsets = [0, 16], sizes = [2, 16], strides = [1, 1]} : vector<2x64xf32> to vector<2x16xf32>
    %1100 = vector.extract_strided_slice %1097 {offsets = [0, 32], sizes = [2, 16], strides = [1, 1]} : vector<2x64xf32> to vector<2x16xf32>
    %1101 = vector.extract_strided_slice %1096 {offsets = [0, 48], sizes = [2, 16], strides = [1, 1]} : vector<2x64xf32> to vector<2x16xf32>
    %1102 = arith.mulf %1099, %1086 : vector<2x16xf32>
    %1103 = arith.mulf %1098, %1100 : vector<2x16xf32>
    %1104 = arith.addf %1102, %1103 : vector<2x16xf32>
    %1105 = math.tanh %1104 : vector<2x16xf32>
    %1106 = arith.mulf %1101, %1105 : vector<2x16xf32>
    %c120 = arith.constant 120 : index
    %c0_195 = arith.constant 0 : index
    %1107 = vector.load %arg7[%c120, %c0_195] : memref<128x16xf32, #tpu.memory_space<vmem>>, vector<2x16xf32>
    tpu.vector_store %arg7[%c120, %c0_195], %1106 {strides = array<i32>} : memref<128x16xf32, #tpu.memory_space<vmem>>, vector<2x16xf32>,
    %cst_196 = arith.constant dense<0.000000e+00> : vector<2x64xf32>
    %1108 = tpu.matmul %1106, %1, %cst_196 {dimension_numbers = #tpu.dot_dimension_numbers<[1], [0], [0], [1], [0, 0, 1, 1], [], []>} : vector<2x16xf32>, vector<16x64xf32>, vector<2x64xf32> -> vector<2x64xf32>
    %1109 = arith.addf %8, %1108 : vector<2x64xf32>
    %1110 = arith.negf %1109 : vector<2x64xf32>
    %1111 = math.exp %1110 : vector<2x64xf32>
    %cst_197 = arith.constant 1.000000e+00 : f32
    %1112 = vector.broadcast %cst_197 : f32 to vector<2x64xf32>
    %1113 = arith.addf %1112, %1111 : vector<2x64xf32>
    %1114 = arith.divf %1112, %1113 : vector<2x64xf32>
    %1115 = math.tanh %1109 : vector<2x64xf32>
    %1116 = vector.extract_strided_slice %1114 {offsets = [0, 0], sizes = [2, 16], strides = [1, 1]} : vector<2x64xf32> to vector<2x16xf32>
    %1117 = vector.extract_strided_slice %1114 {offsets = [0, 16], sizes = [2, 16], strides = [1, 1]} : vector<2x64xf32> to vector<2x16xf32>
    %1118 = vector.extract_strided_slice %1115 {offsets = [0, 32], sizes = [2, 16], strides = [1, 1]} : vector<2x64xf32> to vector<2x16xf32>
    %1119 = vector.extract_strided_slice %1114 {offsets = [0, 48], sizes = [2, 16], strides = [1, 1]} : vector<2x64xf32> to vector<2x16xf32>
    %1120 = arith.mulf %1117, %1104 : vector<2x16xf32>
    %1121 = arith.mulf %1116, %1118 : vector<2x16xf32>
    %1122 = arith.addf %1120, %1121 : vector<2x16xf32>
    %1123 = math.tanh %1122 : vector<2x16xf32>
    %1124 = arith.mulf %1119, %1123 : vector<2x16xf32>
    %c122 = arith.constant 122 : index
    %c0_198 = arith.constant 0 : index
    %1125 = vector.load %arg7[%c122, %c0_198] : memref<128x16xf32, #tpu.memory_space<vmem>>, vector<2x16xf32>
    tpu.vector_store %arg7[%c122, %c0_198], %1124 {strides = array<i32>} : memref<128x16xf32, #tpu.memory_space<vmem>>, vector<2x16xf32>,
    %cst_199 = arith.constant dense<0.000000e+00> : vector<2x64xf32>
    %1126 = tpu.matmul %1124, %1, %cst_199 {dimension_numbers = #tpu.dot_dimension_numbers<[1], [0], [0], [1], [0, 0, 1, 1], [], []>} : vector<2x16xf32>, vector<16x64xf32>, vector<2x64xf32> -> vector<2x64xf32>
    %1127 = arith.addf %8, %1126 : vector<2x64xf32>
    %1128 = arith.negf %1127 : vector<2x64xf32>
    %1129 = math.exp %1128 : vector<2x64xf32>
    %cst_200 = arith.constant 1.000000e+00 : f32
    %1130 = vector.broadcast %cst_200 : f32 to vector<2x64xf32>
    %1131 = arith.addf %1130, %1129 : vector<2x64xf32>
    %1132 = arith.divf %1130, %1131 : vector<2x64xf32>
    %1133 = math.tanh %1127 : vector<2x64xf32>
    %1134 = vector.extract_strided_slice %1132 {offsets = [0, 0], sizes = [2, 16], strides = [1, 1]} : vector<2x64xf32> to vector<2x16xf32>
    %1135 = vector.extract_strided_slice %1132 {offsets = [0, 16], sizes = [2, 16], strides = [1, 1]} : vector<2x64xf32> to vector<2x16xf32>
    %1136 = vector.extract_strided_slice %1133 {offsets = [0, 32], sizes = [2, 16], strides = [1, 1]} : vector<2x64xf32> to vector<2x16xf32>
    %1137 = vector.extract_strided_slice %1132 {offsets = [0, 48], sizes = [2, 16], strides = [1, 1]} : vector<2x64xf32> to vector<2x16xf32>
    %1138 = arith.mulf %1135, %1122 : vector<2x16xf32>
    %1139 = arith.mulf %1134, %1136 : vector<2x16xf32>
    %1140 = arith.addf %1138, %1139 : vector<2x16xf32>
    %1141 = math.tanh %1140 : vector<2x16xf32>
    %1142 = arith.mulf %1137, %1141 : vector<2x16xf32>
    %c124 = arith.constant 124 : index
    %c0_201 = arith.constant 0 : index
    %1143 = vector.load %arg7[%c124, %c0_201] : memref<128x16xf32, #tpu.memory_space<vmem>>, vector<2x16xf32>
    tpu.vector_store %arg7[%c124, %c0_201], %1142 {strides = array<i32>} : memref<128x16xf32, #tpu.memory_space<vmem>>, vector<2x16xf32>,
    %cst_202 = arith.constant dense<0.000000e+00> : vector<2x64xf32>
    %1144 = tpu.matmul %1142, %1, %cst_202 {dimension_numbers = #tpu.dot_dimension_numbers<[1], [0], [0], [1], [0, 0, 1, 1], [], []>} : vector<2x16xf32>, vector<16x64xf32>, vector<2x64xf32> -> vector<2x64xf32>
    %1145 = arith.addf %8, %1144 : vector<2x64xf32>
    %1146 = arith.negf %1145 : vector<2x64xf32>
    %1147 = math.exp %1146 : vector<2x64xf32>
    %cst_203 = arith.constant 1.000000e+00 : f32
    %1148 = vector.broadcast %cst_203 : f32 to vector<2x64xf32>
    %1149 = arith.addf %1148, %1147 : vector<2x64xf32>
    %1150 = arith.divf %1148, %1149 : vector<2x64xf32>
    %1151 = math.tanh %1145 : vector<2x64xf32>
    %1152 = vector.extract_strided_slice %1150 {offsets = [0, 0], sizes = [2, 16], strides = [1, 1]} : vector<2x64xf32> to vector<2x16xf32>
    %1153 = vector.extract_strided_slice %1150 {offsets = [0, 16], sizes = [2, 16], strides = [1, 1]} : vector<2x64xf32> to vector<2x16xf32>
    %1154 = vector.extract_strided_slice %1151 {offsets = [0, 32], sizes = [2, 16], strides = [1, 1]} : vector<2x64xf32> to vector<2x16xf32>
    %1155 = vector.extract_strided_slice %1150 {offsets = [0, 48], sizes = [2, 16], strides = [1, 1]} : vector<2x64xf32> to vector<2x16xf32>
    %1156 = arith.mulf %1153, %1140 : vector<2x16xf32>
    %1157 = arith.mulf %1152, %1154 : vector<2x16xf32>
    %1158 = arith.addf %1156, %1157 : vector<2x16xf32>
    %1159 = math.tanh %1158 : vector<2x16xf32>
    %1160 = arith.mulf %1155, %1159 : vector<2x16xf32>
    %c126 = arith.constant 126 : index
    %c0_204 = arith.constant 0 : index
    %1161 = vector.load %arg7[%c126, %c0_204] : memref<128x16xf32, #tpu.memory_space<vmem>>, vector<2x16xf32>
    tpu.vector_store %arg7[%c126, %c0_204], %1160 {strides = array<i32>} : memref<128x16xf32, #tpu.memory_space<vmem>>, vector<2x16xf32>,
    %c0_205 = arith.constant 0 : index
    %c0_206 = arith.constant 0 : index
    %1162 = vector.load %arg7[%c0_205, %c0_206] : memref<128x16xf32, #tpu.memory_space<vmem>>, vector<128x16xf32>
    %cst_207 = arith.constant dense<0.000000e+00> : vector<1x128xf32>
    %1163 = tpu.matmul %2, %1162, %cst_207 {dimension_numbers = #tpu.dot_dimension_numbers<[1], [1], [0], [0], [0, 0, 1, 0], [], []>} : vector<1x16xf32>, vector<128x16xf32>, vector<1x128xf32> -> vector<1x128xf32>
    %1164 = vector.broadcast %3 : vector<1x1xf32> to vector<1x128xf32>
    %1165 = arith.addf %1163, %1164 : vector<1x128xf32>
    %1166 = arith.negf %1165 : vector<1x128xf32>
    %1167 = math.exp %1166 : vector<1x128xf32>
    %cst_208 = arith.constant 1.000000e+00 : f32
    %1168 = vector.broadcast %cst_208 : f32 to vector<1x128xf32>
    %1169 = arith.addf %1168, %1167 : vector<1x128xf32>
    %1170 = arith.divf %1168, %1169 : vector<1x128xf32>
    %c0_209 = arith.constant 0 : index
    %c0_210 = arith.constant 0 : index
    %1171 = vector.load %arg6[%c0_209, %c0_210] : memref<1x128xf32, #tpu.memory_space<vmem>>, vector<1x128xf32>
    tpu.vector_store %arg6[%c0_209, %c0_210], %1170 {strides = array<i32>} : memref<1x128xf32, #tpu.memory_space<vmem>>, vector<1x128xf32>,
    return
  }
}

</mosaic_0001>

<bundles_post_ra>
// kernel: tpu_custom_call.1
= control target key start
LH: loop header
LB: loop body
LE: loop exit
PB: predicated region body
PF: predicated region fallthrough
CT: control target
= control target key end

     0   :  { %s9358_s0 = inlined_call_operand.vmem [shape: f32[2,16], index: 0, kind: input, shape index: {}]   ;;  %s9359_s1 = inlined_call_operand.hbm [shape: f32[16,64], index: 1, kind: input, shape index: {}]   ;;  %s9360_s2 = inlined_call_operand.hbm [shape: f32[16,64], index: 2, kind: input, shape index: {}]   ;;  %s9361_s3 = inlined_call_operand.vmem [shape: f32[1,64], index: 3, kind: input, shape index: {}]   ;;  %s9362_s4 = inlined_call_operand.vmem [shape: f32[1,16], index: 4, kind: input, shape index: {}]   ;;  %s9363_s5 = inlined_call_operand.<no memory space> [shape: f32[1,1], index: 5, kind: input, shape index: {}]   ;;  %s9364_s6 = inlined_call_operand.hbm [shape: f32[1,128], index: 6, kind: output, shape index: {}]  }
   0x1   :  { %v11_v0 = vstv %s9363_s5 }
   0x2   :  { %12 = vst [vmem:[#allocation3] sm:$0x1] %v11_v0 }
   0x3   :  { %13 = vsyncpa [#allocation5], 0 }
   0x4   :  { %14 = vsyncpa [#allocation8], 0 }
   0x5   :  { %15 = vsyncpa [#allocation6], 0  ;;  %s8517_s23 = smov [#allocation4]   ;;  %s8445_s27 = scalar_lea.hbm %s9359_s1, 256 }
   0x6   :  { %s23_s24 = sshll.u32 %s8517_s23, 4  ;;  %p8446_p0 = scmp.ne.s32.totalorder %s9359_s1, %s8445_s27  ;;  %s24_s24 = int_to_ptr.vmem [resolvable:$true] %s23_s24 }
   0x7   :  { %p8449_p1 = scmp.lt.u32.totalorder %s8445_s27, %s9359_s1 }
   0x9   :  { %p8451_p2 = pnand %p8449_p1, %p8446_p0 }
   0xb   :  { %8454 = shalt.err (!%p8451_p2)
}
   0xc   :  { %s8455_s5 = scalar_lea.vmem %s24_s24, 256  ;;  %p8460_p4 = scmp.lt.s32.totalorder %s24_s24, %s24_s24 }
   0xd   :  { %p8456_p3 = scmp.ne.s32.totalorder %s24_s24, %s8455_s5  ;;  %p8461_p5 = scmp.lt.s32.totalorder %s8455_s5, %s8455_s5 }
   0xf   :  { %p8462_p6 = por %p8461_p5, %p8460_p4 }
  0x11   :  { %p8463_p7 = pnand %p8462_p6, %p8456_p3 }
  0x13   :  { %8466 = shalt.err (!%p8463_p7)
}
  0x14   :  { %s8518_s8 = smov 128   ;;  %s8519_s9 = smov 8  }
  0x15   :  { %29 = dma.hbm_to_vmem [thread:$0]  %s9359_s1, 256, %s24_s24, [#allocation5], %s8518_s8, %s8518_s8, %s8519_s9  }
  0x16   :  { %s8520_s12 = smov [#allocation7]   ;;  %s8467_s16 = scalar_lea.hbm %s9360_s2, 256 }
  0x17   :  { %s35_s13 = sshll.u32 %s8520_s12, 4  ;;  %p8468_p8 = scmp.ne.s32.totalorder %s9360_s2, %s8467_s16  ;;  %s36_s13 = int_to_ptr.vmem [resolvable:$true] %s35_s13 }
  0x18   :  { %p8471_p9 = scmp.lt.u32.totalorder %s8467_s16, %s9360_s2 }
  0x1a   :  { %p8473_p10 = pnand %p8471_p9, %p8468_p8 }
  0x1c   :  { %8476 = shalt.err (!%p8473_p10)
}
  0x1d   :  { %s8477_s21 = scalar_lea.vmem %s36_s13, 256  ;;  %p8482_p12 = scmp.lt.s32.totalorder %s36_s13, %s36_s13 }
  0x1e   :  { %p8478_p11 = scmp.ne.s32.totalorder %s36_s13, %s8477_s21  ;;  %p8483_p13 = scmp.lt.s32.totalorder %s8477_s21, %s8477_s21 }
  0x20   :  { %p8484_p0 = por %p8483_p13, %p8482_p12 }
  0x22   :  { %p8485_p1 = pnand %p8484_p0, %p8478_p11 }
  0x24   :  { %8488 = shalt.err (!%p8485_p1)
}
  0x25   :  { %41 = dma.hbm_to_vmem [thread:$0]  %s9360_s2, 256, %s36_s13, [#allocation8], %s8518_s8, %s8518_s8, %s8519_s9  }
  0x26   :  { %8511 = dma.done.wait [#allocation5], 256  }
  0x27   :  { %8512 = vsyncadd [#allocation5], 4294967040 }
  0x28   :  { %8513 = dma.done.wait [#allocation8], 256  }
  0x29   :  { %8514 = vsyncadd [#allocation8], 4294967040  ;;  %v8521_v1 = vmov 0.0|0.0   ;;  %vm8522_vm0 = vmmov 0   ;;  %v8523_v2 = vmov 0.0   ;;  %v59_v3 = vld [vmem:[#allocation4] sm:$0xff] }
  0x2a   :  { %7688 = vmatprep.subr.bf16.mxu0 %v8521_v1  ;;  %7202 = vmatprep.mubr.msk.f32.mxu0 %vm8522_vm0, %v8523_v2  ;;  %v60_v4 = vld [vmem:[#allocation4 + $0x8] sm:$0xff]  ;;  %v55_v6 = vld [vmem:[#allocation7] sm:$0xff]  ;;  %v56_v7 = vld [vmem:[#allocation7 + $0x8] sm:$0xff]  ;;  %vm68_vm1 = vcmask 130048   ;;  %s8524_s25 = smov 96   ;;  %s8526_s26 = smov 32  }
  0x2b   :  { %7733 = vmatprep.subr.bf16.mxu1 %v8521_v1  ;;  %7307 = vmatprep.mubr.msk.f32.mxu1 %vm8522_vm0, %v8523_v2  ;;  %v7689_v5 = vpack.c.bf16 %v60_v4, %v59_v3  ;;  %v8598_v8 = vpack.c.bf16 %v56_v7, %v55_v6  ;;  %v54_v9 = vld [vmem:[%s9358_s0] sm:$0x3]  ;;  %s8527_s27 = smov 80   ;;  %vm241_vm2 = vcmask 123904   ;;  %vm9298_vm3 = vmpackc.low %vm68_vm1, %vm68_vm1  ;;  %s8529_s30 = smov [#allocation9]  }
  0x2c   :  { %v6838_v10 = vld [vmem:[%s9361_s3] ss:$0 sm:$0xff]  ;;  %s8525_s3 = smov 16   ;;  %s6828_s7 = sshll.u32 %s8529_s30, 4  ;;  %s6829_s7 = int_to_ptr.vmem [resolvable:$true] %s6828_s7 }
  0x2d   :  { %7690 = vmatpush3.bf16.msra.mxu0 %v7689_v5  ;;  %7735 = vmatpush3.bf16.msra.mxu1 %v8598_v8  ;;  %s8493_s5 = scalar_lea.vmem %s6829_s7, 32  ;;  %p8494_p3 = scmp.lt.s32.totalorder %s6829_s7, %s6829_s7 }
  0x2e   :  { %7691 = vmatprep.subr.bf16.mxu0 %v8521_v1  ;;  %7739 = vmatprep.subr.bf16.mxu1 %v8521_v1 }
  0x30   :  { %7203 = vmatmul.mubr.msk.f32.vlgmr.msra.gmra.mrb[0].mxu0 %vm68_vm1, %v54_v9 }
  0x31   :  { %7693 = vmatpush3.bf16.msra.mxu0 %v8598_v8  ;;  %7209 = vmatprep.mubr.msk.f32.mxu0 %vm8522_vm0, %v8523_v2 }
  0x32   :  { %7694 = vmatprep.subr.bf16.mxu0 %v8521_v1 }
  0x34   :  { %7210 = vmatmul.mubr.msk.f32.vlgmr.msra.gmra.mrb[2].mxu0 %vm68_vm1, %v54_v9 }
  0x35   :  { %7696 = vmatpush3.bf16.msra.mxu0 %v8598_v8  ;;  %7216 = vmatprep.mubr.msk.f32.mxu0 %vm8522_vm0, %v8523_v2 }
  0x36   :  { %7697 = vmatprep.subr.bf16.mxu0 %v8521_v1 }
 0x103   :  { %v138_v11 = vpop.f32.mrb[0].mxu0 }
 0x104   :  { %v7204_v12 = vpop.f32.mrb[1].mxu0  ;;  %v8619_v13 = vadd.f32 %v6838_v10, %v138_v11 }
 0x107   :  { %v208_v14 = vpop.f32.mrb[2].mxu0 }
 0x108   :  { %v212_v15 = vadd.f32 %v208_v14, %v8619_v13  ;;  %v7211_v16 = vpop.f32.mrb[3].mxu0 }
 0x10a   :  { %7929 = vtanh.f32 %v212_v15  ;;  %v6841_v18 = vmul.f32 -1.442695, %v212_v15 }
 0x10c   :  { %7931 = vpow2.f32 %v6841_v18 }
 0x114   :  { %v7930_v17 = vpop.eup %7929 }
 0x115   :  { %222 = vrot.lane.b32.xlu0 %v7930_v17, %s8524_s25 }
 0x116   :  { %v7932_v19 = vpop.eup %7931 }
 0x117   :  { %v216_v20 = vadd.f32 1.0, %v7932_v19 }
 0x119   :  { %7933 = vrcp.f32 %v216_v20 }
 0x123   :  { %v7934_v21 = vpop.eup %7933 }
 0x124   :  { %v220_v24 = vmul.f32 0.0, %v7934_v21 }
 0x187   :  { %v223_v22 = vpop.permute.xlu0 %222 }
 0x188   :  { %v225_v23 = vmul.f32 %v7934_v21, %v223_v22 }
 0x18a   :  { %227 = vrot.lane.b32.xlu0 %v225_v23, %s8525_s3 }
 0x1fc   :  { %v228_v25 = vpop.permute.xlu0 %227 }
 0x1fd   :  { %v230_v26 = vadd.f32 %v228_v25, %v220_v24 }
 0x1ff   :  { %7935 = vtanh.f32 %v230_v26 }
 0x209   :  { %v7936_v27 = vpop.eup %7935 }
 0x20a   :  { %233 = vrot.lane.b32.xlu1 %v7936_v27, %s8526_s26 }
 0x27c   :  { %v234_v28 = vpop.permute.xlu1 %233 }
 0x27d   :  { %v236_v29 = vmul.f32 %v7934_v21, %v234_v28 }
 0x27f   :  { %238 = vrot.lane.b32.xlu1 %v236_v29, %s8527_s27 }
 0x2f1   :  { %v239_v30 = vpop.permute.xlu1 %238 }
 0x2f2   :  { %242 = vst.msk [vmem:[#allocation2] sm:$0x3] %vm241_vm2, %v239_v30  ;;  %7217 = vmatmul.mubr.msk.f32.vlgmr.msra.gmra.mrb[4].mxu0 %vm68_vm1, %v239_v30 }
 0x2f3   :  { %7699 = vmatpush3.bf16.msra.mxu0 %v8598_v8  ;;  %7223 = vmatprep.mubr.msk.f32.mxu0 %vm8522_vm0, %v8523_v2 }
 0x2f4   :  { %7700 = vmatprep.subr.bf16.mxu0 %v8521_v1 }
 0x3c5   :  { %v311_v31 = vpop.f32.mrb[4].mxu0 }
 0x3c6   :  { %v315_v32 = vadd.f32 %v311_v31, %v8619_v13  ;;  %v7218_v33 = vpop.f32.mrb[5].mxu0 }
 0x3c8   :  { %7937 = vtanh.f32 %v315_v32  ;;  %v6843_v35 = vmul.f32 -1.442695, %v315_v32 }
 0x3ca   :  { %7939 = vpow2.f32 %v6843_v35 }
 0x3d2   :  { %v7938_v34 = vpop.eup %7937 }
 0x3d3   :  { %325 = vrot.lane.b32.xlu0 %v7938_v34, %s8524_s25 }
 0x3d4   :  { %v7940_v36 = vpop.eup %7939 }
 0x3d5   :  { %v319_v37 = vadd.f32 1.0, %v7940_v36 }
 0x3d7   :  { %7941 = vrcp.f32 %v319_v37 }
 0x3e1   :  { %v7942_v38 = vpop.eup %7941 }
 0x3e2   :  { %v323_v41 = vmul.f32 %v7942_v38, %v230_v26 }
 0x445   :  { %v326_v39 = vpop.permute.xlu0 %325 }
 0x446   :  { %v328_v40 = vmul.f32 %v7942_v38, %v326_v39 }
 0x448   :  { %330 = vrot.lane.b32.xlu1 %v328_v40, %s8525_s3 }
 0x4ba   :  { %v331_v42 = vpop.permute.xlu1 %330 }
 0x4bb   :  { %v333_v43 = vadd.f32 %v331_v42, %v323_v41 }
 0x4bd   :  { %7943 = vtanh.f32 %v333_v43 }
 0x4c7   :  { %v7944_v44 = vpop.eup %7943 }
 0x4c8   :  { %336 = vrot.lane.b32.xlu0 %v7944_v44, %s8526_s26 }
 0x53a   :  { %v337_v45 = vpop.permute.xlu0 %336 }
 0x53b   :  { %v339_v46 = vmul.f32 %v7942_v38, %v337_v45 }
 0x53d   :  { %341 = vrot.lane.b32.xlu1 %v339_v46, %s8527_s27 }
 0x5af   :  { %v342_v47 = vpop.permute.xlu1 %341 }
 0x5b0   :  { %344 = vst.msk [vmem:[#allocation2 + $0x2] sm:$0x3] %vm241_vm2, %v342_v47  ;;  %7224 = vmatmul.mubr.msk.f32.vlgmr.msra.gmra.mrb[6].mxu0 %vm68_vm1, %v342_v47 }
 0x5b1   :  { %7702 = vmatpush3.bf16.msra.mxu0 %v8598_v8  ;;  %7230 = vmatprep.mubr.msk.f32.mxu0 %vm8522_vm0, %v8523_v2 }
 0x5b2   :  { %7703 = vmatprep.subr.bf16.mxu0 %v8521_v1 }
 0x683   :  { %v413_v48 = vpop.f32.mrb[6].mxu0 }
 0x684   :  { %v417_v49 = vadd.f32 %v413_v48, %v8619_v13  ;;  %v7225_v50 = vpop.f32.mrb[7].mxu0 }
 0x686   :  { %7945 = vtanh.f32 %v417_v49  ;;  %v6845_v52 = vmul.f32 -1.442695, %v417_v49 }
 0x688   :  { %7947 = vpow2.f32 %v6845_v52 }
 0x690   :  { %v7946_v51 = vpop.eup %7945 }
 0x691   :  { %427 = vrot.lane.b32.xlu0 %v7946_v51, %s8524_s25 }
 0x692   :  { %v7948_v53 = vpop.eup %7947 }
 0x693   :  { %v421_v54 = vadd.f32 1.0, %v7948_v53 }
 0x695   :  { %7949 = vrcp.f32 %v421_v54 }
 0x69f   :  { %v7950_v55 = vpop.eup %7949 }
 0x6a0   :  { %v425_v58 = vmul.f32 %v7950_v55, %v333_v43 }
 0x703   :  { %v428_v56 = vpop.permute.xlu0 %427 }
 0x704   :  { %v430_v57 = vmul.f32 %v7950_v55, %v428_v56 }
 0x706   :  { %432 = vrot.lane.b32.xlu1 %v430_v57, %s8525_s3 }
 0x778   :  { %v433_v59 = vpop.permute.xlu1 %432 }
 0x779   :  { %v435_v60 = vadd.f32 %v433_v59, %v425_v58 }
 0x77b   :  { %7951 = vtanh.f32 %v435_v60 }
 0x785   :  { %v7952_v61 = vpop.eup %7951 }
 0x786   :  { %438 = vrot.lane.b32.xlu0 %v7952_v61, %s8526_s26 }
 0x7f8   :  { %v439_v62 = vpop.permute.xlu0 %438 }
 0x7f9   :  { %v441_v63 = vmul.f32 %v7950_v55, %v439_v62 }
 0x7fb   :  { %443 = vrot.lane.b32.xlu1 %v441_v63, %s8527_s27 }
 0x86d   :  { %v444_v0 = vpop.permute.xlu1 %443 }
 0x86e   :  { %446 = vst.msk [vmem:[#allocation2 + $0x4] sm:$0x3] %vm241_vm2, %v444_v0  ;;  %7231 = vmatmul.mubr.msk.f32.vlgmr.msra.gmra.mrb[8].mxu0 %vm68_vm1, %v444_v0 }
 0x86f   :  { %7705 = vmatpush3.bf16.msra.mxu0 %v8598_v8  ;;  %7237 = vmatprep.mubr.msk.f32.mxu0 %vm8522_vm0, %v8523_v2 }
 0x870   :  { %7706 = vmatprep.subr.bf16.mxu0 %v8521_v1 }
 0x941   :  { %v515_v3 = vpop.f32.mrb[8].mxu0 }
 0x942   :  { %v519_v4 = vadd.f32 %v515_v3, %v8619_v13  ;;  %v7232_v5 = vpop.f32.mrb[9].mxu0 }
 0x944   :  { %7953 = vtanh.f32 %v519_v4  ;;  %v6847_v7 = vmul.f32 -1.442695, %v519_v4 }
 0x946   :  { %7955 = vpow2.f32 %v6847_v7 }
 0x94e   :  { %v7954_v6 = vpop.eup %7953 }
 0x94f   :  { %529 = vrot.lane.b32.xlu0 %v7954_v6, %s8524_s25 }
 0x950   :  { %v7956_v9 = vpop.eup %7955 }
 0x951   :  { %v523_v10 = vadd.f32 1.0, %v7956_v9 }
 0x953   :  { %7957 = vrcp.f32 %v523_v10 }
 0x95d   :  { %v7958_v11 = vpop.eup %7957 }
 0x95e   :  { %v527_v15 = vmul.f32 %v7958_v11, %v435_v60 }
 0x9c1   :  { %v530_v12 = vpop.permute.xlu0 %529 }
 0x9c2   :  { %v532_v14 = vmul.f32 %v7958_v11, %v530_v12 }
 0x9c4   :  { %534 = vrot.lane.b32.xlu1 %v532_v14, %s8525_s3 }
 0xa36   :  { %v535_v16 = vpop.permute.xlu1 %534 }
 0xa37   :  { %v537_v17 = vadd.f32 %v535_v16, %v527_v15 }
 0xa39   :  { %7959 = vtanh.f32 %v537_v17 }
 0xa43   :  { %v7960_v18 = vpop.eup %7959 }
 0xa44   :  { %540 = vrot.lane.b32.xlu0 %v7960_v18, %s8526_s26 }
 0xab6   :  { %v541_v19 = vpop.permute.xlu0 %540 }
 0xab7   :  { %v543_v20 = vmul.f32 %v7958_v11, %v541_v19 }
 0xab9   :  { %545 = vrot.lane.b32.xlu1 %v543_v20, %s8527_s27 }
 0xb2b   :  { %v546_v21 = vpop.permute.xlu1 %545 }
 0xb2c   :  { %548 = vst.msk [vmem:[#allocation2 + $0x6] sm:$0x3] %vm241_vm2, %v546_v21  ;;  %7238 = vmatmul.mubr.msk.f32.vlgmr.msra.gmra.mrb[10].mxu0 %vm68_vm1, %v546_v21 }
 0xb2d   :  { %7708 = vmatpush3.bf16.msra.mxu0 %v8598_v8  ;;  %7244 = vmatprep.mubr.msk.f32.mxu0 %vm8522_vm0, %v8523_v2 }
 0xb2e   :  { %7709 = vmatprep.subr.bf16.mxu0 %v8521_v1 }
 0xbff   :  { %v617_v22 = vpop.f32.mrb[10].mxu0 }
 0xc00   :  { %v621_v23 = vadd.f32 %v617_v22, %v8619_v13  ;;  %v7239_v24 = vpop.f32.mrb[11].mxu0 }
 0xc02   :  { %7961 = vtanh.f32 %v621_v23  ;;  %v6849_v26 = vmul.f32 -1.442695, %v621_v23 }
 0xc04   :  { %7963 = vpow2.f32 %v6849_v26 }
 0xc0c   :  { %v7962_v25 = vpop.eup %7961 }
 0xc0d   :  { %631 = vrot.lane.b32.xlu0 %v7962_v25, %s8524_s25 }
 0xc0e   :  { %v7964_v27 = vpop.eup %7963 }
 0xc0f   :  { %v625_v28 = vadd.f32 1.0, %v7964_v27 }
 0xc11   :  { %7965 = vrcp.f32 %v625_v28 }
 0xc1b   :  { %v7966_v29 = vpop.eup %7965 }
 0xc1c   :  { %v629_v32 = vmul.f32 %v7966_v29, %v537_v17 }
 0xc7f   :  { %v632_v30 = vpop.permute.xlu0 %631 }
 0xc80   :  { %v634_v31 = vmul.f32 %v7966_v29, %v632_v30 }
 0xc82   :  { %636 = vrot.lane.b32.xlu1 %v634_v31, %s8525_s3 }
 0xcf4   :  { %v637_v33 = vpop.permute.xlu1 %636 }
 0xcf5   :  { %v639_v34 = vadd.f32 %v637_v33, %v629_v32 }
 0xcf7   :  { %7967 = vtanh.f32 %v639_v34 }
 0xd01   :  { %v7968_v35 = vpop.eup %7967 }
 0xd02   :  { %642 = vrot.lane.b32.xlu0 %v7968_v35, %s8526_s26 }
 0xd74   :  { %v643_v36 = vpop.permute.xlu0 %642 }
 0xd75   :  { %v645_v37 = vmul.f32 %v7966_v29, %v643_v36 }
 0xd77   :  { %647 = vrot.lane.b32.xlu1 %v645_v37, %s8527_s27 }
 0xde9   :  { %v648_v38 = vpop.permute.xlu1 %647 }
 0xdea   :  { %650 = vst.msk [vmem:[#allocation2 + $0x8] sm:$0x3] %vm241_vm2, %v648_v38  ;;  %7245 = vmatmul.mubr.msk.f32.vlgmr.msra.gmra.mrb[12].mxu0 %vm68_vm1, %v648_v38 }
 0xdeb   :  { %7711 = vmatpush3.bf16.msra.mxu0 %v8598_v8  ;;  %7251 = vmatprep.mubr.msk.f32.mxu0 %vm8522_vm0, %v8523_v2 }
 0xdec   :  { %7712 = vmatprep.subr.bf16.mxu0 %v8521_v1 }
 0xebd   :  { %v719_v39 = vpop.f32.mrb[12].mxu0 }
 0xebe   :  { %v723_v40 = vadd.f32 %v719_v39, %v8619_v13  ;;  %v7246_v41 = vpop.f32.mrb[13].mxu0 }
 0xec0   :  { %7969 = vtanh.f32 %v723_v40  ;;  %v6851_v43 = vmul.f32 -1.442695, %v723_v40 }
 0xec2   :  { %7971 = vpow2.f32 %v6851_v43 }
 0xeca   :  { %v7970_v42 = vpop.eup %7969 }
 0xecb   :  { %733 = vrot.lane.b32.xlu0 %v7970_v42, %s8524_s25 }
 0xecc   :  { %v7972_v44 = vpop.eup %7971 }
 0xecd   :  { %v727_v45 = vadd.f32 1.0, %v7972_v44 }
 0xecf   :  { %7973 = vrcp.f32 %v727_v45 }
 0xed9   :  { %v7974_v46 = vpop.eup %7973 }
 0xeda   :  { %v731_v49 = vmul.f32 %v7974_v46, %v639_v34 }
 0xf3d   :  { %v734_v47 = vpop.permute.xlu0 %733 }
 0xf3e   :  { %v736_v48 = vmul.f32 %v7974_v46, %v734_v47 }
 0xf40   :  { %738 = vrot.lane.b32.xlu1 %v736_v48, %s8525_s3 }
 0xfb2   :  { %v739_v50 = vpop.permute.xlu1 %738 }
 0xfb3   :  { %v741_v51 = vadd.f32 %v739_v50, %v731_v49 }
 0xfb5   :  { %7975 = vtanh.f32 %v741_v51 }
 0xfbf   :  { %v7976_v52 = vpop.eup %7975 }
 0xfc0   :  { %744 = vrot.lane.b32.xlu0 %v7976_v52, %s8526_s26 }
0x1032   :  { %v745_v53 = vpop.permute.xlu0 %744 }
0x1033   :  { %v747_v54 = vmul.f32 %v7974_v46, %v745_v53 }
0x1035   :  { %749 = vrot.lane.b32.xlu1 %v747_v54, %s8527_s27 }
0x10a7   :  { %v750_v55 = vpop.permute.xlu1 %749 }
0x10a8   :  { %752 = vst.msk [vmem:[#allocation2 + $0xa] sm:$0x3] %vm241_vm2, %v750_v55  ;;  %7252 = vmatmul.mubr.msk.f32.vlgmr.msra.gmra.mrb[14].mxu0 %vm68_vm1, %v750_v55 }
0x10a9   :  { %7714 = vmatpush3.bf16.msra.mxu0 %v8598_v8  ;;  %7258 = vmatprep.mubr.msk.f32.mxu0 %vm8522_vm0, %v8523_v2 }
0x10aa   :  { %7715 = vmatprep.subr.bf16.mxu0 %v8521_v1 }
0x117b   :  { %v821_v56 = vpop.f32.mrb[14].mxu0 }
0x117c   :  { %v825_v57 = vadd.f32 %v821_v56, %v8619_v13  ;;  %v7253_v58 = vpop.f32.mrb[15].mxu0 }
0x117e   :  { %7977 = vtanh.f32 %v825_v57  ;;  %v6853_v60 = vmul.f32 -1.442695, %v825_v57 }
0x1180   :  { %7979 = vpow2.f32 %v6853_v60 }
0x1188   :  { %v7978_v59 = vpop.eup %7977 }
0x1189   :  { %835 = vrot.lane.b32.xlu0 %v7978_v59, %s8524_s25 }
0x118a   :  { %v7980_v61 = vpop.eup %7979 }
0x118b   :  { %v829_v62 = vadd.f32 1.0, %v7980_v61 }
0x118d   :  { %7981 = vrcp.f32 %v829_v62 }
0x1197   :  { %v7982_v63 = vpop.eup %7981 }
0x1198   :  { %v833_v4 = vmul.f32 %v7982_v63, %v741_v51 }
0x11fb   :  { %v836_v0 = vpop.permute.xlu0 %835 }
0x11fc   :  { %v838_v3 = vmul.f32 %v7982_v63, %v836_v0 }
0x11fe   :  { %840 = vrot.lane.b32.xlu1 %v838_v3, %s8525_s3 }
0x1270   :  { %v841_v5 = vpop.permute.xlu1 %840 }
0x1271   :  { %v843_v6 = vadd.f32 %v841_v5, %v833_v4 }
0x1273   :  { %7983 = vtanh.f32 %v843_v6 }
0x127d   :  { %v7984_v7 = vpop.eup %7983 }
0x127e   :  { %846 = vrot.lane.b32.xlu0 %v7984_v7, %s8526_s26 }
0x12f0   :  { %v847_v9 = vpop.permute.xlu0 %846 }
0x12f1   :  { %v849_v10 = vmul.f32 %v7982_v63, %v847_v9 }
0x12f3   :  { %851 = vrot.lane.b32.xlu1 %v849_v10, %s8527_s27 }
0x1365   :  { %v852_v11 = vpop.permute.xlu1 %851 }
0x1366   :  { %854 = vst.msk [vmem:[#allocation2 + $0xc] sm:$0x3] %vm241_vm2, %v852_v11  ;;  %7259 = vmatmul.mubr.msk.f32.vlgmr.msra.gmra.mrb[16].mxu0 %vm68_vm1, %v852_v11 }
0x1367   :  { %7717 = vmatpush3.bf16.msra.mxu0 %v8598_v8  ;;  %7265 = vmatprep.mubr.msk.f32.mxu0 %vm8522_vm0, %v8523_v2 }
0x1368   :  { %7718 = vmatprep.subr.bf16.mxu0 %v8521_v1 }
0x1439   :  { %v923_v12 = vpop.f32.mrb[16].mxu0 }
0x143a   :  { %v927_v14 = vadd.f32 %v923_v12, %v8619_v13  ;;  %v7260_v15 = vpop.f32.mrb[17].mxu0 }
0x143c   :  { %7985 = vtanh.f32 %v927_v14  ;;  %v6855_v17 = vmul.f32 -1.442695, %v927_v14 }
0x143e   :  { %7987 = vpow2.f32 %v6855_v17 }
0x1446   :  { %v7986_v16 = vpop.eup %7985 }
0x1447   :  { %937 = vrot.lane.b32.xlu0 %v7986_v16, %s8524_s25 }
0x1448   :  { %v7988_v18 = vpop.eup %7987 }
0x1449   :  { %v931_v19 = vadd.f32 1.0, %v7988_v18 }
0x144b   :  { %7989 = vrcp.f32 %v931_v19 }
0x1455   :  { %v7990_v20 = vpop.eup %7989 }
0x1456   :  { %v935_v23 = vmul.f32 %v7990_v20, %v843_v6 }
0x14b9   :  { %v938_v21 = vpop.permute.xlu0 %937 }
0x14ba   :  { %v940_v22 = vmul.f32 %v7990_v20, %v938_v21 }
0x14bc   :  { %942 = vrot.lane.b32.xlu1 %v940_v22, %s8525_s3 }
0x152e   :  { %v943_v24 = vpop.permute.xlu1 %942 }
0x152f   :  { %v945_v25 = vadd.f32 %v943_v24, %v935_v23 }
0x1531   :  { %7991 = vtanh.f32 %v945_v25 }
0x153b   :  { %v7992_v26 = vpop.eup %7991 }
0x153c   :  { %948 = vrot.lane.b32.xlu0 %v7992_v26, %s8526_s26 }
0x15ae   :  { %v949_v27 = vpop.permute.xlu0 %948 }
0x15af   :  { %v951_v28 = vmul.f32 %v7990_v20, %v949_v27 }
0x15b1   :  { %953 = vrot.lane.b32.xlu1 %v951_v28, %s8527_s27 }
0x1623   :  { %v954_v29 = vpop.permute.xlu1 %953 }
0x1624   :  { %956 = vst.msk [vmem:[#allocation2 + $0xe] sm:$0x3] %vm241_vm2, %v954_v29  ;;  %7266 = vmatmul.mubr.msk.f32.vlgmr.msra.gmra.mrb[18].mxu0 %vm68_vm1, %v954_v29 }
0x1625   :  { %7720 = vmatpush3.bf16.msra.mxu0 %v8598_v8  ;;  %7272 = vmatprep.mubr.msk.f32.mxu0 %vm8522_vm0, %v8523_v2 }
0x1626   :  { %7721 = vmatprep.subr.bf16.mxu0 %v8521_v1 }
0x16f7   :  { %v1025_v30 = vpop.f32.mrb[18].mxu0 }
0x16f8   :  { %v1029_v31 = vadd.f32 %v1025_v30, %v8619_v13  ;;  %v7267_v32 = vpop.f32.mrb[19].mxu0 }
0x16fa   :  { %7993 = vtanh.f32 %v1029_v31  ;;  %v6857_v34 = vmul.f32 -1.442695, %v1029_v31 }
0x16fc   :  { %7995 = vpow2.f32 %v6857_v34 }
0x1704   :  { %v7994_v33 = vpop.eup %7993 }
0x1705   :  { %1039 = vrot.lane.b32.xlu0 %v7994_v33, %s8524_s25 }
0x1706   :  { %v7996_v35 = vpop.eup %7995 }
0x1707   :  { %v1033_v36 = vadd.f32 1.0, %v7996_v35 }
0x1709   :  { %7997 = vrcp.f32 %v1033_v36 }
0x1713   :  { %v7998_v37 = vpop.eup %7997 }
0x1714   :  { %v1037_v40 = vmul.f32 %v7998_v37, %v945_v25 }
0x1777   :  { %v1040_v38 = vpop.permute.xlu0 %1039 }
0x1778   :  { %v1042_v39 = vmul.f32 %v7998_v37, %v1040_v38 }
0x177a   :  { %1044 = vrot.lane.b32.xlu1 %v1042_v39, %s8525_s3 }
0x17ec   :  { %v1045_v41 = vpop.permute.xlu1 %1044 }
0x17ed   :  { %v1047_v42 = vadd.f32 %v1045_v41, %v1037_v40 }
0x17ef   :  { %7999 = vtanh.f32 %v1047_v42 }
0x17f9   :  { %v8000_v43 = vpop.eup %7999 }
0x17fa   :  { %1050 = vrot.lane.b32.xlu0 %v8000_v43, %s8526_s26 }
0x186c   :  { %v1051_v44 = vpop.permute.xlu0 %1050 }
0x186d   :  { %v1053_v45 = vmul.f32 %v7998_v37, %v1051_v44 }
0x186f   :  { %1055 = vrot.lane.b32.xlu1 %v1053_v45, %s8527_s27 }
0x18e1   :  { %v1056_v46 = vpop.permute.xlu1 %1055 }
0x18e2   :  { %1058 = vst.msk [vmem:[#allocation2 + $0x10] sm:$0x3] %vm241_vm2, %v1056_v46  ;;  %7273 = vmatmul.mubr.msk.f32.vlgmr.msra.gmra.mrb[20].mxu0 %vm68_vm1, %v1056_v46 }
0x18e3   :  { %7723 = vmatpush3.bf16.msra.mxu0 %v8598_v8  ;;  %7279 = vmatprep.mubr.msk.f32.mxu0 %vm8522_vm0, %v8523_v2 }
0x18e4   :  { %7724 = vmatprep.subr.bf16.mxu0 %v8521_v1 }
0x19b5   :  { %v1127_v47 = vpop.f32.mrb[20].mxu0 }
0x19b6   :  { %v1131_v48 = vadd.f32 %v1127_v47, %v8619_v13  ;;  %v7274_v49 = vpop.f32.mrb[21].mxu0 }
0x19b8   :  { %8001 = vtanh.f32 %v1131_v48  ;;  %v6859_v51 = vmul.f32 -1.442695, %v1131_v48 }
0x19ba   :  { %8003 = vpow2.f32 %v6859_v51 }
0x19c2   :  { %v8002_v50 = vpop.eup %8001 }
0x19c3   :  { %1141 = vrot.lane.b32.xlu0 %v8002_v50, %s8524_s25 }
0x19c4   :  { %v8004_v52 = vpop.eup %8003 }
0x19c5   :  { %v1135_v53 = vadd.f32 1.0, %v8004_v52 }
0x19c7   :  { %8005 = vrcp.f32 %v1135_v53 }
0x19d1   :  { %v8006_v54 = vpop.eup %8005 }
0x19d2   :  { %v1139_v57 = vmul.f32 %v8006_v54, %v1047_v42 }
0x1a35   :  { %v1142_v55 = vpop.permute.xlu0 %1141 }
0x1a36   :  { %v1144_v56 = vmul.f32 %v8006_v54, %v1142_v55 }
0x1a38   :  { %1146 = vrot.lane.b32.xlu1 %v1144_v56, %s8525_s3 }
0x1aaa   :  { %v1147_v58 = vpop.permute.xlu1 %1146 }
0x1aab   :  { %v1149_v59 = vadd.f32 %v1147_v58, %v1139_v57 }
0x1aad   :  { %8007 = vtanh.f32 %v1149_v59 }
0x1ab7   :  { %v8008_v60 = vpop.eup %8007 }
0x1ab8   :  { %1152 = vrot.lane.b32.xlu0 %v8008_v60, %s8526_s26 }
0x1b2a   :  { %v1153_v61 = vpop.permute.xlu0 %1152 }
0x1b2b   :  { %v1155_v62 = vmul.f32 %v8006_v54, %v1153_v61 }
0x1b2d   :  { %1157 = vrot.lane.b32.xlu1 %v1155_v62, %s8527_s27 }
0x1b9f   :  { %v1158_v63 = vpop.permute.xlu1 %1157 }
0x1ba0   :  { %1160 = vst.msk [vmem:[#allocation2 + $0x12] sm:$0x3] %vm241_vm2, %v1158_v63  ;;  %7280 = vmatmul.mubr.msk.f32.vlgmr.msra.gmra.mrb[22].mxu0 %vm68_vm1, %v1158_v63 }
0x1ba1   :  { %7726 = vmatpush3.bf16.msra.mxu0 %v8598_v8  ;;  %7286 = vmatprep.mubr.msk.f32.mxu0 %vm8522_vm0, %v8523_v2 }
0x1ba2   :  { %7727 = vmatprep.subr.bf16.mxu0 %v8521_v1 }
0x1c73   :  { %v1229_v0 = vpop.f32.mrb[22].mxu0 }
0x1c74   :  { %v1233_v3 = vadd.f32 %v1229_v0, %v8619_v13  ;;  %v7281_v4 = vpop.f32.mrb[23].mxu0 }
0x1c76   :  { %8009 = vtanh.f32 %v1233_v3  ;;  %v6861_v6 = vmul.f32 -1.442695, %v1233_v3 }
0x1c78   :  { %8011 = vpow2.f32 %v6861_v6 }
0x1c80   :  { %v8010_v5 = vpop.eup %8009 }
0x1c81   :  { %1243 = vrot.lane.b32.xlu0 %v8010_v5, %s8524_s25 }
0x1c82   :  { %v8012_v7 = vpop.eup %8011 }
0x1c83   :  { %v1237_v9 = vadd.f32 1.0, %v8012_v7 }
0x1c85   :  { %8013 = vrcp.f32 %v1237_v9 }
0x1c8f   :  { %v8014_v10 = vpop.eup %8013 }
0x1c90   :  { %v1241_v14 = vmul.f32 %v8014_v10, %v1149_v59 }
0x1cf3   :  { %v1244_v11 = vpop.permute.xlu0 %1243 }
0x1cf4   :  { %v1246_v12 = vmul.f32 %v8014_v10, %v1244_v11 }
0x1cf6   :  { %1248 = vrot.lane.b32.xlu1 %v1246_v12, %s8525_s3 }
0x1d68   :  { %v1249_v15 = vpop.permute.xlu1 %1248 }
0x1d69   :  { %v1251_v16 = vadd.f32 %v1249_v15, %v1241_v14 }
0x1d6b   :  { %8015 = vtanh.f32 %v1251_v16 }
0x1d75   :  { %v8016_v17 = vpop.eup %8015 }
0x1d76   :  { %1254 = vrot.lane.b32.xlu0 %v8016_v17, %s8526_s26 }
0x1de8   :  { %v1255_v18 = vpop.permute.xlu0 %1254 }
0x1de9   :  { %v1257_v19 = vmul.f32 %v8014_v10, %v1255_v18 }
0x1deb   :  { %1259 = vrot.lane.b32.xlu1 %v1257_v19, %s8527_s27 }
0x1e5d   :  { %v1260_v20 = vpop.permute.xlu1 %1259 }
0x1e5e   :  { %1262 = vst.msk [vmem:[#allocation2 + $0x14] sm:$0x3] %vm241_vm2, %v1260_v20  ;;  %7287 = vmatmul.mubr.msk.f32.vlgmr.msra.gmra.mrb[24].mxu0 %vm68_vm1, %v1260_v20 }
0x1e5f   :  { %7729 = vmatpush3.bf16.msra.mxu0 %v8598_v8  ;;  %7293 = vmatprep.mubr.msk.f32.mxu0 %vm8522_vm0, %v8523_v2 }
0x1e60   :  { %7730 = vmatprep.subr.bf16.mxu0 %v8521_v1 }
0x1f31   :  { %v1331_v21 = vpop.f32.mrb[24].mxu0 }
0x1f32   :  { %v1335_v22 = vadd.f32 %v1331_v21, %v8619_v13  ;;  %v7288_v23 = vpop.f32.mrb[25].mxu0 }
0x1f34   :  { %8017 = vtanh.f32 %v1335_v22  ;;  %v6863_v25 = vmul.f32 -1.442695, %v1335_v22 }
0x1f36   :  { %8019 = vpow2.f32 %v6863_v25 }
0x1f3e   :  { %v8018_v24 = vpop.eup %8017 }
0x1f3f   :  { %1345 = vrot.lane.b32.xlu0 %v8018_v24, %s8524_s25 }
0x1f40   :  { %v8020_v26 = vpop.eup %8019 }
0x1f41   :  { %v1339_v27 = vadd.f32 1.0, %v8020_v26 }
0x1f43   :  { %8021 = vrcp.f32 %v1339_v27 }
0x1f4d   :  { %v8022_v28 = vpop.eup %8021 }
0x1f4e   :  { %v1343_v31 = vmul.f32 %v8022_v28, %v1251_v16 }
0x1fb1   :  { %v1346_v29 = vpop.permute.xlu0 %1345 }
0x1fb2   :  { %v1348_v30 = vmul.f32 %v8022_v28, %v1346_v29 }
0x1fb4   :  { %1350 = vrot.lane.b32.xlu1 %v1348_v30, %s8525_s3 }
0x2026   :  { %v1351_v32 = vpop.permute.xlu1 %1350 }
0x2027   :  { %v1353_v33 = vadd.f32 %v1351_v32, %v1343_v31 }
0x2029   :  { %8023 = vtanh.f32 %v1353_v33 }
0x2033   :  { %v8024_v34 = vpop.eup %8023 }
0x2034   :  { %1356 = vrot.lane.b32.xlu0 %v8024_v34, %s8526_s26 }
0x20a6   :  { %v1357_v35 = vpop.permute.xlu0 %1356 }
0x20a7   :  { %v1359_v36 = vmul.f32 %v8022_v28, %v1357_v35 }
0x20a9   :  { %1361 = vrot.lane.b32.xlu1 %v1359_v36, %s8527_s27 }
0x211b   :  { %v1362_v37 = vpop.permute.xlu1 %1361 }
0x211c   :  { %1364 = vst.msk [vmem:[#allocation2 + $0x16] sm:$0x3] %vm241_vm2, %v1362_v37  ;;  %7294 = vmatmul.mubr.msk.f32.vlgmr.msra.gmra.mrb[26].mxu0 %vm68_vm1, %v1362_v37 }
0x211d   :  { %7732 = vmatpush3.bf16.msra.mxu0 %v8598_v8  ;;  %7300 = vmatprep.mubr.msk.f32.mxu0 %vm8522_vm0, %v8523_v2 }
0x211e   :  { %7736 = vmatprep.subr.bf16.mxu0 %v8521_v1 }
0x21ef   :  { %v1433_v38 = vpop.f32.mrb[26].mxu0 }
0x21f0   :  { %v1437_v39 = vadd.f32 %v1433_v38, %v8619_v13  ;;  %v7295_v40 = vpop.f32.mrb[27].mxu0 }
0x21f2   :  { %8025 = vtanh.f32 %v1437_v39  ;;  %v6865_v42 = vmul.f32 -1.442695, %v1437_v39 }
0x21f4   :  { %8027 = vpow2.f32 %v6865_v42 }
0x21fc   :  { %v8026_v41 = vpop.eup %8025 }
0x21fd   :  { %1447 = vrot.lane.b32.xlu0 %v8026_v41, %s8524_s25 }
0x21fe   :  { %v8028_v43 = vpop.eup %8027 }
0x21ff   :  { %v1441_v44 = vadd.f32 1.0, %v8028_v43 }
0x2201   :  { %8029 = vrcp.f32 %v1441_v44 }
0x220b   :  { %v8030_v45 = vpop.eup %8029 }
0x220c   :  { %v1445_v48 = vmul.f32 %v8030_v45, %v1353_v33 }
0x226f   :  { %v1448_v46 = vpop.permute.xlu0 %1447 }
0x2270   :  { %v1450_v47 = vmul.f32 %v8030_v45, %v1448_v46 }
0x2272   :  { %1452 = vrot.lane.b32.xlu1 %v1450_v47, %s8525_s3 }
0x22e4   :  { %v1453_v49 = vpop.permute.xlu1 %1452 }
0x22e5   :  { %v1455_v50 = vadd.f32 %v1453_v49, %v1445_v48 }
0x22e7   :  { %8031 = vtanh.f32 %v1455_v50 }
0x22f1   :  { %v8032_v51 = vpop.eup %8031 }
0x22f2   :  { %1458 = vrot.lane.b32.xlu0 %v8032_v51, %s8526_s26 }
0x2364   :  { %v1459_v52 = vpop.permute.xlu0 %1458 }
0x2365   :  { %v1461_v53 = vmul.f32 %v8030_v45, %v1459_v52 }
0x2367   :  { %1463 = vrot.lane.b32.xlu1 %v1461_v53, %s8527_s27 }
0x23d9   :  { %v1464_v54 = vpop.permute.xlu1 %1463 }
0x23da   :  { %1466 = vst.msk [vmem:[#allocation2 + $0x18] sm:$0x3] %vm241_vm2, %v1464_v54  ;;  %7301 = vmatmul.mubr.msk.f32.vlgmr.msra.gmra.mrb[28].mxu0 %vm68_vm1, %v1464_v54 }
0x23db   :  { %7738 = vmatpush3.bf16.msra.mxu0 %v8598_v8  ;;  %7314 = vmatprep.mubr.msk.f32.mxu0 %vm8522_vm0, %v8523_v2 }
0x23dc   :  { %7742 = vmatprep.subr.bf16.mxu0 %v8521_v1 }
0x24ad   :  { %v1535_v55 = vpop.f32.mrb[28].mxu0 }
0x24ae   :  { %v1539_v56 = vadd.f32 %v1535_v55, %v8619_v13  ;;  %v7302_v57 = vpop.f32.mrb[29].mxu0 }
0x24b0   :  { %8033 = vtanh.f32 %v1539_v56  ;;  %v6867_v59 = vmul.f32 -1.442695, %v1539_v56 }
0x24b2   :  { %8035 = vpow2.f32 %v6867_v59 }
0x24ba   :  { %v8034_v58 = vpop.eup %8033 }
0x24bb   :  { %1549 = vrot.lane.b32.xlu0 %v8034_v58, %s8524_s25 }
0x24bc   :  { %v8036_v60 = vpop.eup %8035 }
0x24bd   :  { %v1543_v61 = vadd.f32 1.0, %v8036_v60 }
0x24bf   :  { %8037 = vrcp.f32 %v1543_v61 }
0x24c9   :  { %v8038_v62 = vpop.eup %8037 }
0x24ca   :  { %v1547_v3 = vmul.f32 %v8038_v62, %v1455_v50 }
0x252d   :  { %v1550_v63 = vpop.permute.xlu0 %1549 }
0x252e   :  { %v1552_v0 = vmul.f32 %v8038_v62, %v1550_v63 }
0x2530   :  { %1554 = vrot.lane.b32.xlu1 %v1552_v0, %s8525_s3 }
0x25a2   :  { %v1555_v4 = vpop.permute.xlu1 %1554 }
0x25a3   :  { %v1557_v5 = vadd.f32 %v1555_v4, %v1547_v3 }
0x25a5   :  { %8039 = vtanh.f32 %v1557_v5 }
0x25af   :  { %v8040_v6 = vpop.eup %8039 }
0x25b0   :  { %1560 = vrot.lane.b32.xlu0 %v8040_v6, %s8526_s26 }
0x2622   :  { %v1561_v7 = vpop.permute.xlu0 %1560 }
0x2623   :  { %v1563_v9 = vmul.f32 %v8038_v62, %v1561_v7 }
0x2625   :  { %1565 = vrot.lane.b32.xlu1 %v1563_v9, %s8527_s27 }
0x2697   :  { %v1566_v10 = vpop.permute.xlu1 %1565 }
0x2698   :  { %1568 = vst.msk [vmem:[#allocation2 + $0x1a] sm:$0x3] %vm241_vm2, %v1566_v10  ;;  %7308 = vmatmul.mubr.msk.f32.vlgmr.msra.gmra.mrb[0].mxu1 %vm68_vm1, %v1566_v10 }
0x2699   :  { %7741 = vmatpush3.bf16.msra.mxu1 %v8598_v8  ;;  %7321 = vmatprep.mubr.msk.f32.mxu1 %vm8522_vm0, %v8523_v2 }
0x269a   :  { %7745 = vmatprep.subr.bf16.mxu1 %v8521_v1 }
0x276b   :  { %v1637_v11 = vpop.f32.mrb[0].mxu1 }
0x276c   :  { %v1641_v12 = vadd.f32 %v1637_v11, %v8619_v13  ;;  %v7309_v14 = vpop.f32.mrb[1].mxu1 }
0x276e   :  { %8041 = vtanh.f32 %v1641_v12  ;;  %v6869_v16 = vmul.f32 -1.442695, %v1641_v12 }
0x2770   :  { %8043 = vpow2.f32 %v6869_v16 }
0x2778   :  { %v8042_v15 = vpop.eup %8041 }
0x2779   :  { %1651 = vrot.lane.b32.xlu0 %v8042_v15, %s8524_s25 }
0x277a   :  { %v8044_v17 = vpop.eup %8043 }
0x277b   :  { %v1645_v18 = vadd.f32 1.0, %v8044_v17 }
0x277d   :  { %8045 = vrcp.f32 %v1645_v18 }
0x2787   :  { %v8046_v19 = vpop.eup %8045 }
0x2788   :  { %v1649_v22 = vmul.f32 %v8046_v19, %v1557_v5 }
0x27eb   :  { %v1652_v20 = vpop.permute.xlu0 %1651 }
0x27ec   :  { %v1654_v21 = vmul.f32 %v8046_v19, %v1652_v20 }
0x27ee   :  { %1656 = vrot.lane.b32.xlu1 %v1654_v21, %s8525_s3 }
0x2860   :  { %v1657_v23 = vpop.permute.xlu1 %1656 }
0x2861   :  { %v1659_v24 = vadd.f32 %v1657_v23, %v1649_v22 }
0x2863   :  { %8047 = vtanh.f32 %v1659_v24 }
0x286d   :  { %v8048_v25 = vpop.eup %8047 }
0x286e   :  { %1662 = vrot.lane.b32.xlu0 %v8048_v25, %s8526_s26 }
0x28e0   :  { %v1663_v26 = vpop.permute.xlu0 %1662 }
0x28e1   :  { %v1665_v27 = vmul.f32 %v8046_v19, %v1663_v26 }
0x28e3   :  { %1667 = vrot.lane.b32.xlu1 %v1665_v27, %s8527_s27 }
0x2955   :  { %v1668_v28 = vpop.permute.xlu1 %1667 }
0x2956   :  { %1670 = vst.msk [vmem:[#allocation2 + $0x1c] sm:$0x3] %vm241_vm2, %v1668_v28  ;;  %7315 = vmatmul.mubr.msk.f32.vlgmr.msra.gmra.mrb[30].mxu0 %vm68_vm1, %v1668_v28 }
0x2957   :  { %7744 = vmatpush3.bf16.msra.mxu0 %v8598_v8  ;;  %7328 = vmatprep.mubr.msk.f32.mxu0 %vm8522_vm0, %v8523_v2 }
0x2958   :  { %7748 = vmatprep.subr.bf16.mxu0 %v8521_v1 }
0x2a29   :  { %v1739_v29 = vpop.f32.mrb[30].mxu0 }
0x2a2a   :  { %v1743_v30 = vadd.f32 %v1739_v29, %v8619_v13  ;;  %v7316_v31 = vpop.f32.mrb[31].mxu0 }
0x2a2c   :  { %8049 = vtanh.f32 %v1743_v30  ;;  %v6871_v33 = vmul.f32 -1.442695, %v1743_v30 }
0x2a2e   :  { %8051 = vpow2.f32 %v6871_v33 }
0x2a36   :  { %v8050_v32 = vpop.eup %8049 }
0x2a37   :  { %1753 = vrot.lane.b32.xlu0 %v8050_v32, %s8524_s25 }
0x2a38   :  { %v8052_v34 = vpop.eup %8051 }
0x2a39   :  { %v1747_v35 = vadd.f32 1.0, %v8052_v34 }
0x2a3b   :  { %8053 = vrcp.f32 %v1747_v35 }
0x2a45   :  { %v8054_v36 = vpop.eup %8053 }
0x2a46   :  { %v1751_v39 = vmul.f32 %v8054_v36, %v1659_v24 }
0x2aa9   :  { %v1754_v37 = vpop.permute.xlu0 %1753 }
0x2aaa   :  { %v1756_v38 = vmul.f32 %v8054_v36, %v1754_v37 }
0x2aac   :  { %1758 = vrot.lane.b32.xlu1 %v1756_v38, %s8525_s3 }
0x2b1e   :  { %v1759_v40 = vpop.permute.xlu1 %1758 }
0x2b1f   :  { %v1761_v41 = vadd.f32 %v1759_v40, %v1751_v39 }
0x2b21   :  { %8055 = vtanh.f32 %v1761_v41 }
0x2b2b   :  { %v8056_v42 = vpop.eup %8055 }
0x2b2c   :  { %1764 = vrot.lane.b32.xlu0 %v8056_v42, %s8526_s26 }
0x2b9e   :  { %v1765_v43 = vpop.permute.xlu0 %1764 }
0x2b9f   :  { %v1767_v44 = vmul.f32 %v8054_v36, %v1765_v43 }
0x2ba1   :  { %1769 = vrot.lane.b32.xlu1 %v1767_v44, %s8527_s27 }
0x2c13   :  { %v1770_v45 = vpop.permute.xlu1 %1769 }
0x2c14   :  { %1772 = vst.msk [vmem:[#allocation2 + $0x1e] sm:$0x3] %vm241_vm2, %v1770_v45  ;;  %7322 = vmatmul.mubr.msk.f32.vlgmr.msra.gmra.mrb[2].mxu1 %vm68_vm1, %v1770_v45 }
0x2c15   :  { %7747 = vmatpush3.bf16.msra.mxu1 %v8598_v8  ;;  %7335 = vmatprep.mubr.msk.f32.mxu1 %vm8522_vm0, %v8523_v2 }
0x2c16   :  { %7751 = vmatprep.subr.bf16.mxu1 %v8521_v1 }
0x2ce7   :  { %v1841_v46 = vpop.f32.mrb[2].mxu1 }
0x2ce8   :  { %v1845_v47 = vadd.f32 %v1841_v46, %v8619_v13  ;;  %v7323_v48 = vpop.f32.mrb[3].mxu1 }
0x2cea   :  { %8057 = vtanh.f32 %v1845_v47  ;;  %v6873_v50 = vmul.f32 -1.442695, %v1845_v47 }
0x2cec   :  { %8059 = vpow2.f32 %v6873_v50 }
0x2cf4   :  { %v8058_v49 = vpop.eup %8057 }
0x2cf5   :  { %1855 = vrot.lane.b32.xlu0 %v8058_v49, %s8524_s25 }
0x2cf6   :  { %v8060_v51 = vpop.eup %8059 }
0x2cf7   :  { %v1849_v52 = vadd.f32 1.0, %v8060_v51 }
0x2cf9   :  { %8061 = vrcp.f32 %v1849_v52 }
0x2d03   :  { %v8062_v53 = vpop.eup %8061 }
0x2d04   :  { %v1853_v56 = vmul.f32 %v8062_v53, %v1761_v41 }
0x2d67   :  { %v1856_v54 = vpop.permute.xlu0 %1855 }
0x2d68   :  { %v1858_v55 = vmul.f32 %v8062_v53, %v1856_v54 }
0x2d6a   :  { %1860 = vrot.lane.b32.xlu1 %v1858_v55, %s8525_s3 }
0x2ddc   :  { %v1861_v57 = vpop.permute.xlu1 %1860 }
0x2ddd   :  { %v1863_v58 = vadd.f32 %v1861_v57, %v1853_v56 }
0x2ddf   :  { %8063 = vtanh.f32 %v1863_v58 }
0x2de9   :  { %v8064_v59 = vpop.eup %8063 }
0x2dea   :  { %1866 = vrot.lane.b32.xlu0 %v8064_v59, %s8526_s26 }
0x2e5c   :  { %v1867_v60 = vpop.permute.xlu0 %1866 }
0x2e5d   :  { %v1869_v61 = vmul.f32 %v8062_v53, %v1867_v60 }
0x2e5f   :  { %1871 = vrot.lane.b32.xlu1 %v1869_v61, %s8527_s27 }
0x2ed1   :  { %v1872_v62 = vpop.permute.xlu1 %1871 }
0x2ed2   :  { %1874 = vst.msk [vmem:[#allocation2 + $0x20] sm:$0x3] %vm241_vm2, %v1872_v62  ;;  %7329 = vmatmul.mubr.msk.f32.vlgmr.msra.gmra.mrb[32].mxu0 %vm68_vm1, %v1872_v62 }
0x2ed3   :  { %7750 = vmatpush3.bf16.msra.mxu0 %v8598_v8  ;;  %7342 = vmatprep.mubr.msk.f32.mxu0 %vm8522_vm0, %v8523_v2 }
0x2ed4   :  { %7754 = vmatprep.subr.bf16.mxu0 %v8521_v1 }
0x2fa5   :  { %v1943_v63 = vpop.f32.mrb[32].mxu0 }
0x2fa6   :  { %v1947_v0 = vadd.f32 %v1943_v63, %v8619_v13  ;;  %v7330_v3 = vpop.f32.mrb[33].mxu0 }
0x2fa8   :  { %8065 = vtanh.f32 %v1947_v0  ;;  %v6875_v5 = vmul.f32 -1.442695, %v1947_v0 }
0x2faa   :  { %8067 = vpow2.f32 %v6875_v5 }
0x2fb2   :  { %v8066_v4 = vpop.eup %8065 }
0x2fb3   :  { %1957 = vrot.lane.b32.xlu0 %v8066_v4, %s8524_s25 }
0x2fb4   :  { %v8068_v6 = vpop.eup %8067 }
0x2fb5   :  { %v1951_v7 = vadd.f32 1.0, %v8068_v6 }
0x2fb7   :  { %8069 = vrcp.f32 %v1951_v7 }
0x2fc1   :  { %v8070_v9 = vpop.eup %8069 }
0x2fc2   :  { %v1955_v12 = vmul.f32 %v8070_v9, %v1863_v58 }
0x3025   :  { %v1958_v10 = vpop.permute.xlu0 %1957 }
0x3026   :  { %v1960_v11 = vmul.f32 %v8070_v9, %v1958_v10 }
0x3028   :  { %1962 = vrot.lane.b32.xlu1 %v1960_v11, %s8525_s3 }
0x309a   :  { %v1963_v14 = vpop.permute.xlu1 %1962 }
0x309b   :  { %v1965_v15 = vadd.f32 %v1963_v14, %v1955_v12 }
0x309d   :  { %8071 = vtanh.f32 %v1965_v15 }
0x30a7   :  { %v8072_v16 = vpop.eup %8071 }
0x30a8   :  { %1968 = vrot.lane.b32.xlu0 %v8072_v16, %s8526_s26 }
0x311a   :  { %v1969_v17 = vpop.permute.xlu0 %1968 }
0x311b   :  { %v1971_v18 = vmul.f32 %v8070_v9, %v1969_v17 }
0x311d   :  { %1973 = vrot.lane.b32.xlu1 %v1971_v18, %s8527_s27 }
0x318f   :  { %v1974_v19 = vpop.permute.xlu1 %1973 }
0x3190   :  { %1976 = vst.msk [vmem:[#allocation2 + $0x22] sm:$0x3] %vm241_vm2, %v1974_v19  ;;  %7336 = vmatmul.mubr.msk.f32.vlgmr.msra.gmra.mrb[4].mxu1 %vm68_vm1, %v1974_v19 }
0x3191   :  { %7753 = vmatpush3.bf16.msra.mxu1 %v8598_v8  ;;  %7349 = vmatprep.mubr.msk.f32.mxu1 %vm8522_vm0, %v8523_v2 }
0x3192   :  { %7757 = vmatprep.subr.bf16.mxu1 %v8521_v1 }
0x3263   :  { %v2045_v20 = vpop.f32.mrb[4].mxu1 }
0x3264   :  { %v2049_v21 = vadd.f32 %v2045_v20, %v8619_v13  ;;  %v7337_v22 = vpop.f32.mrb[5].mxu1 }
0x3266   :  { %8073 = vtanh.f32 %v2049_v21  ;;  %v6877_v24 = vmul.f32 -1.442695, %v2049_v21 }
0x3268   :  { %8075 = vpow2.f32 %v6877_v24 }
0x3270   :  { %v8074_v23 = vpop.eup %8073 }
0x3271   :  { %2059 = vrot.lane.b32.xlu0 %v8074_v23, %s8524_s25 }
0x3272   :  { %v8076_v25 = vpop.eup %8075 }
0x3273   :  { %v2053_v26 = vadd.f32 1.0, %v8076_v25 }
0x3275   :  { %8077 = vrcp.f32 %v2053_v26 }
0x327f   :  { %v8078_v27 = vpop.eup %8077 }
0x3280   :  { %v2057_v30 = vmul.f32 %v8078_v27, %v1965_v15 }
0x32e3   :  { %v2060_v28 = vpop.permute.xlu0 %2059 }
0x32e4   :  { %v2062_v29 = vmul.f32 %v8078_v27, %v2060_v28 }
0x32e6   :  { %2064 = vrot.lane.b32.xlu1 %v2062_v29, %s8525_s3 }
0x3358   :  { %v2065_v31 = vpop.permute.xlu1 %2064 }
0x3359   :  { %v2067_v32 = vadd.f32 %v2065_v31, %v2057_v30 }
0x335b   :  { %8079 = vtanh.f32 %v2067_v32 }
0x3365   :  { %v8080_v33 = vpop.eup %8079 }
0x3366   :  { %2070 = vrot.lane.b32.xlu0 %v8080_v33, %s8526_s26 }
0x33d8   :  { %v2071_v34 = vpop.permute.xlu0 %2070 }
0x33d9   :  { %v2073_v35 = vmul.f32 %v8078_v27, %v2071_v34 }
0x33db   :  { %2075 = vrot.lane.b32.xlu1 %v2073_v35, %s8527_s27 }
0x344d   :  { %v2076_v36 = vpop.permute.xlu1 %2075 }
0x344e   :  { %2078 = vst.msk [vmem:[#allocation2 + $0x24] sm:$0x3] %vm241_vm2, %v2076_v36  ;;  %7343 = vmatmul.mubr.msk.f32.vlgmr.msra.gmra.mrb[34].mxu0 %vm68_vm1, %v2076_v36 }
0x344f   :  { %7756 = vmatpush3.bf16.msra.mxu0 %v8598_v8  ;;  %7356 = vmatprep.mubr.msk.f32.mxu0 %vm8522_vm0, %v8523_v2 }
0x3450   :  { %7760 = vmatprep.subr.bf16.mxu0 %v8521_v1 }
0x3521   :  { %v2147_v37 = vpop.f32.mrb[34].mxu0 }
0x3522   :  { %v2151_v38 = vadd.f32 %v2147_v37, %v8619_v13  ;;  %v7344_v39 = vpop.f32.mrb[35].mxu0 }
0x3524   :  { %8081 = vtanh.f32 %v2151_v38  ;;  %v6879_v41 = vmul.f32 -1.442695, %v2151_v38 }
0x3526   :  { %8083 = vpow2.f32 %v6879_v41 }
0x352e   :  { %v8082_v40 = vpop.eup %8081 }
0x352f   :  { %2161 = vrot.lane.b32.xlu0 %v8082_v40, %s8524_s25 }
0x3530   :  { %v8084_v42 = vpop.eup %8083 }
0x3531   :  { %v2155_v43 = vadd.f32 1.0, %v8084_v42 }
0x3533   :  { %8085 = vrcp.f32 %v2155_v43 }
0x353d   :  { %v8086_v44 = vpop.eup %8085 }
0x353e   :  { %v2159_v47 = vmul.f32 %v8086_v44, %v2067_v32 }
0x35a1   :  { %v2162_v45 = vpop.permute.xlu0 %2161 }
0x35a2   :  { %v2164_v46 = vmul.f32 %v8086_v44, %v2162_v45 }
0x35a4   :  { %2166 = vrot.lane.b32.xlu1 %v2164_v46, %s8525_s3 }
0x3616   :  { %v2167_v48 = vpop.permute.xlu1 %2166 }
0x3617   :  { %v2169_v49 = vadd.f32 %v2167_v48, %v2159_v47 }
0x3619   :  { %8087 = vtanh.f32 %v2169_v49 }
0x3623   :  { %v8088_v50 = vpop.eup %8087 }
0x3624   :  { %2172 = vrot.lane.b32.xlu0 %v8088_v50, %s8526_s26 }
0x3696   :  { %v2173_v51 = vpop.permute.xlu0 %2172 }
0x3697   :  { %v2175_v52 = vmul.f32 %v8086_v44, %v2173_v51 }
0x3699   :  { %2177 = vrot.lane.b32.xlu1 %v2175_v52, %s8527_s27 }
0x370b   :  { %v2178_v53 = vpop.permute.xlu1 %2177 }
0x370c   :  { %2180 = vst.msk [vmem:[#allocation2 + $0x26] sm:$0x3] %vm241_vm2, %v2178_v53  ;;  %7350 = vmatmul.mubr.msk.f32.vlgmr.msra.gmra.mrb[6].mxu1 %vm68_vm1, %v2178_v53 }
0x370d   :  { %7759 = vmatpush3.bf16.msra.mxu1 %v8598_v8  ;;  %7363 = vmatprep.mubr.msk.f32.mxu1 %vm8522_vm0, %v8523_v2 }
0x370e   :  { %7763 = vmatprep.subr.bf16.mxu1 %v8521_v1 }
0x37df   :  { %v2249_v54 = vpop.f32.mrb[6].mxu1 }
0x37e0   :  { %v2253_v55 = vadd.f32 %v2249_v54, %v8619_v13  ;;  %v7351_v56 = vpop.f32.mrb[7].mxu1 }
0x37e2   :  { %8089 = vtanh.f32 %v2253_v55  ;;  %v6881_v58 = vmul.f32 -1.442695, %v2253_v55 }
0x37e4   :  { %8091 = vpow2.f32 %v6881_v58 }
0x37ec   :  { %v8090_v57 = vpop.eup %8089 }
0x37ed   :  { %2263 = vrot.lane.b32.xlu0 %v8090_v57, %s8524_s25 }
0x37ee   :  { %v8092_v59 = vpop.eup %8091 }
0x37ef   :  { %v2257_v60 = vadd.f32 1.0, %v8092_v59 }
0x37f1   :  { %8093 = vrcp.f32 %v2257_v60 }
0x37fb   :  { %v8094_v61 = vpop.eup %8093 }
0x37fc   :  { %v2261_v0 = vmul.f32 %v8094_v61, %v2169_v49 }
0x385f   :  { %v2264_v62 = vpop.permute.xlu0 %2263 }
0x3860   :  { %v2266_v63 = vmul.f32 %v8094_v61, %v2264_v62 }
0x3862   :  { %2268 = vrot.lane.b32.xlu1 %v2266_v63, %s8525_s3 }
0x38d4   :  { %v2269_v3 = vpop.permute.xlu1 %2268 }
0x38d5   :  { %v2271_v4 = vadd.f32 %v2269_v3, %v2261_v0 }
0x38d7   :  { %8095 = vtanh.f32 %v2271_v4 }
0x38e1   :  { %v8096_v5 = vpop.eup %8095 }
0x38e2   :  { %2274 = vrot.lane.b32.xlu0 %v8096_v5, %s8526_s26 }
0x3954   :  { %v2275_v6 = vpop.permute.xlu0 %2274 }
0x3955   :  { %v2277_v7 = vmul.f32 %v8094_v61, %v2275_v6 }
0x3957   :  { %2279 = vrot.lane.b32.xlu1 %v2277_v7, %s8527_s27 }
0x39c9   :  { %v2280_v9 = vpop.permute.xlu1 %2279 }
0x39ca   :  { %2282 = vst.msk [vmem:[#allocation2 + $0x28] sm:$0x3] %vm241_vm2, %v2280_v9  ;;  %7357 = vmatmul.mubr.msk.f32.vlgmr.msra.gmra.mrb[36].mxu0 %vm68_vm1, %v2280_v9 }
0x39cb   :  { %7762 = vmatpush3.bf16.msra.mxu0 %v8598_v8  ;;  %7370 = vmatprep.mubr.msk.f32.mxu0 %vm8522_vm0, %v8523_v2 }
0x39cc   :  { %7766 = vmatprep.subr.bf16.mxu0 %v8521_v1 }
0x3a9d   :  { %v2351_v10 = vpop.f32.mrb[36].mxu0 }
0x3a9e   :  { %v2355_v11 = vadd.f32 %v2351_v10, %v8619_v13  ;;  %v7358_v12 = vpop.f32.mrb[37].mxu0 }
0x3aa0   :  { %8097 = vtanh.f32 %v2355_v11  ;;  %v6883_v15 = vmul.f32 -1.442695, %v2355_v11 }
0x3aa2   :  { %8099 = vpow2.f32 %v6883_v15 }
0x3aaa   :  { %v8098_v14 = vpop.eup %8097 }
0x3aab   :  { %2365 = vrot.lane.b32.xlu0 %v8098_v14, %s8524_s25 }
0x3aac   :  { %v8100_v16 = vpop.eup %8099 }
0x3aad   :  { %v2359_v17 = vadd.f32 1.0, %v8100_v16 }
0x3aaf   :  { %8101 = vrcp.f32 %v2359_v17 }
0x3ab9   :  { %v8102_v18 = vpop.eup %8101 }
0x3aba   :  { %v2363_v21 = vmul.f32 %v8102_v18, %v2271_v4 }
0x3b1d   :  { %v2366_v19 = vpop.permute.xlu0 %2365 }
0x3b1e   :  { %v2368_v20 = vmul.f32 %v8102_v18, %v2366_v19 }
0x3b20   :  { %2370 = vrot.lane.b32.xlu1 %v2368_v20, %s8525_s3 }
0x3b92   :  { %v2371_v22 = vpop.permute.xlu1 %2370 }
0x3b93   :  { %v2373_v23 = vadd.f32 %v2371_v22, %v2363_v21 }
0x3b95   :  { %8103 = vtanh.f32 %v2373_v23 }
0x3b9f   :  { %v8104_v24 = vpop.eup %8103 }
0x3ba0   :  { %2376 = vrot.lane.b32.xlu0 %v8104_v24, %s8526_s26 }
0x3c12   :  { %v2377_v25 = vpop.permute.xlu0 %2376 }
0x3c13   :  { %v2379_v26 = vmul.f32 %v8102_v18, %v2377_v25 }
0x3c15   :  { %2381 = vrot.lane.b32.xlu1 %v2379_v26, %s8527_s27 }
0x3c87   :  { %v2382_v27 = vpop.permute.xlu1 %2381 }
0x3c88   :  { %2384 = vst.msk [vmem:[#allocation2 + $0x2a] sm:$0x3] %vm241_vm2, %v2382_v27  ;;  %7364 = vmatmul.mubr.msk.f32.vlgmr.msra.gmra.mrb[8].mxu1 %vm68_vm1, %v2382_v27 }
0x3c89   :  { %7765 = vmatpush3.bf16.msra.mxu1 %v8598_v8  ;;  %7377 = vmatprep.mubr.msk.f32.mxu1 %vm8522_vm0, %v8523_v2 }
0x3c8a   :  { %7769 = vmatprep.subr.bf16.mxu1 %v8521_v1 }
0x3d5b   :  { %v2453_v28 = vpop.f32.mrb[8].mxu1 }
0x3d5c   :  { %v2457_v29 = vadd.f32 %v2453_v28, %v8619_v13  ;;  %v7365_v30 = vpop.f32.mrb[9].mxu1 }
0x3d5e   :  { %8105 = vtanh.f32 %v2457_v29  ;;  %v6885_v32 = vmul.f32 -1.442695, %v2457_v29 }
0x3d60   :  { %8107 = vpow2.f32 %v6885_v32 }
0x3d68   :  { %v8106_v31 = vpop.eup %8105 }
0x3d69   :  { %2467 = vrot.lane.b32.xlu0 %v8106_v31, %s8524_s25 }
0x3d6a   :  { %v8108_v33 = vpop.eup %8107 }
0x3d6b   :  { %v2461_v34 = vadd.f32 1.0, %v8108_v33 }
0x3d6d   :  { %8109 = vrcp.f32 %v2461_v34 }
0x3d77   :  { %v8110_v35 = vpop.eup %8109 }
0x3d78   :  { %v2465_v38 = vmul.f32 %v8110_v35, %v2373_v23 }
0x3ddb   :  { %v2468_v36 = vpop.permute.xlu0 %2467 }
0x3ddc   :  { %v2470_v37 = vmul.f32 %v8110_v35, %v2468_v36 }
0x3dde   :  { %2472 = vrot.lane.b32.xlu1 %v2470_v37, %s8525_s3 }
0x3e50   :  { %v2473_v39 = vpop.permute.xlu1 %2472 }
0x3e51   :  { %v2475_v40 = vadd.f32 %v2473_v39, %v2465_v38 }
0x3e53   :  { %8111 = vtanh.f32 %v2475_v40 }
0x3e5d   :  { %v8112_v41 = vpop.eup %8111 }
0x3e5e   :  { %2478 = vrot.lane.b32.xlu0 %v8112_v41, %s8526_s26 }
0x3ed0   :  { %v2479_v42 = vpop.permute.xlu0 %2478 }
0x3ed1   :  { %v2481_v43 = vmul.f32 %v8110_v35, %v2479_v42 }
0x3ed3   :  { %2483 = vrot.lane.b32.xlu1 %v2481_v43, %s8527_s27 }
0x3f45   :  { %v2484_v44 = vpop.permute.xlu1 %2483 }
0x3f46   :  { %2486 = vst.msk [vmem:[#allocation2 + $0x2c] sm:$0x3] %vm241_vm2, %v2484_v44  ;;  %7371 = vmatmul.mubr.msk.f32.vlgmr.msra.gmra.mrb[38].mxu0 %vm68_vm1, %v2484_v44 }
0x3f47   :  { %7768 = vmatpush3.bf16.msra.mxu0 %v8598_v8  ;;  %7384 = vmatprep.mubr.msk.f32.mxu0 %vm8522_vm0, %v8523_v2 }
0x3f48   :  { %7772 = vmatprep.subr.bf16.mxu0 %v8521_v1 }
0x4019   :  { %v2555_v45 = vpop.f32.mrb[38].mxu0 }
0x401a   :  { %v2559_v46 = vadd.f32 %v2555_v45, %v8619_v13  ;;  %v7372_v47 = vpop.f32.mrb[39].mxu0 }
0x401c   :  { %8113 = vtanh.f32 %v2559_v46  ;;  %v6887_v49 = vmul.f32 -1.442695, %v2559_v46 }
0x401e   :  { %8115 = vpow2.f32 %v6887_v49 }
0x4026   :  { %v8114_v48 = vpop.eup %8113 }
0x4027   :  { %2569 = vrot.lane.b32.xlu0 %v8114_v48, %s8524_s25 }
0x4028   :  { %v8116_v50 = vpop.eup %8115 }
0x4029   :  { %v2563_v51 = vadd.f32 1.0, %v8116_v50 }
0x402b   :  { %8117 = vrcp.f32 %v2563_v51 }
0x4035   :  { %v8118_v52 = vpop.eup %8117 }
0x4036   :  { %v2567_v55 = vmul.f32 %v8118_v52, %v2475_v40 }
0x4099   :  { %v2570_v53 = vpop.permute.xlu0 %2569 }
0x409a   :  { %v2572_v54 = vmul.f32 %v8118_v52, %v2570_v53 }
0x409c   :  { %2574 = vrot.lane.b32.xlu1 %v2572_v54, %s8525_s3 }
0x410e   :  { %v2575_v56 = vpop.permute.xlu1 %2574 }
0x410f   :  { %v2577_v57 = vadd.f32 %v2575_v56, %v2567_v55 }
0x4111   :  { %8119 = vtanh.f32 %v2577_v57 }
0x411b   :  { %v8120_v58 = vpop.eup %8119 }
0x411c   :  { %2580 = vrot.lane.b32.xlu0 %v8120_v58, %s8526_s26 }
0x418e   :  { %v2581_v59 = vpop.permute.xlu0 %2580 }
0x418f   :  { %v2583_v60 = vmul.f32 %v8118_v52, %v2581_v59 }
0x4191   :  { %2585 = vrot.lane.b32.xlu1 %v2583_v60, %s8527_s27 }
0x4203   :  { %v2586_v61 = vpop.permute.xlu1 %2585 }
0x4204   :  { %2588 = vst.msk [vmem:[#allocation2 + $0x2e] sm:$0x3] %vm241_vm2, %v2586_v61  ;;  %7378 = vmatmul.mubr.msk.f32.vlgmr.msra.gmra.mrb[10].mxu1 %vm68_vm1, %v2586_v61 }
0x4205   :  { %7771 = vmatpush3.bf16.msra.mxu1 %v8598_v8  ;;  %7391 = vmatprep.mubr.msk.f32.mxu1 %vm8522_vm0, %v8523_v2 }
0x4206   :  { %7775 = vmatprep.subr.bf16.mxu1 %v8521_v1 }
0x42d7   :  { %v2657_v62 = vpop.f32.mrb[10].mxu1 }
0x42d8   :  { %v2661_v63 = vadd.f32 %v2657_v62, %v8619_v13  ;;  %v7379_v0 = vpop.f32.mrb[11].mxu1 }
0x42da   :  { %8121 = vtanh.f32 %v2661_v63  ;;  %v6889_v4 = vmul.f32 -1.442695, %v2661_v63 }
0x42dc   :  { %8123 = vpow2.f32 %v6889_v4 }
0x42e4   :  { %v8122_v3 = vpop.eup %8121 }
0x42e5   :  { %2671 = vrot.lane.b32.xlu0 %v8122_v3, %s8524_s25 }
0x42e6   :  { %v8124_v5 = vpop.eup %8123 }
0x42e7   :  { %v2665_v6 = vadd.f32 1.0, %v8124_v5 }
0x42e9   :  { %8125 = vrcp.f32 %v2665_v6 }
0x42f3   :  { %v8126_v7 = vpop.eup %8125 }
0x42f4   :  { %v2669_v11 = vmul.f32 %v8126_v7, %v2577_v57 }
0x4357   :  { %v2672_v9 = vpop.permute.xlu0 %2671 }
0x4358   :  { %v2674_v10 = vmul.f32 %v8126_v7, %v2672_v9 }
0x435a   :  { %2676 = vrot.lane.b32.xlu1 %v2674_v10, %s8525_s3 }
0x43cc   :  { %v2677_v12 = vpop.permute.xlu1 %2676 }
0x43cd   :  { %v2679_v14 = vadd.f32 %v2677_v12, %v2669_v11 }
0x43cf   :  { %8127 = vtanh.f32 %v2679_v14 }
0x43d9   :  { %v8128_v15 = vpop.eup %8127 }
0x43da   :  { %2682 = vrot.lane.b32.xlu0 %v8128_v15, %s8526_s26 }
0x444c   :  { %v2683_v16 = vpop.permute.xlu0 %2682 }
0x444d   :  { %v2685_v17 = vmul.f32 %v8126_v7, %v2683_v16 }
0x444f   :  { %2687 = vrot.lane.b32.xlu1 %v2685_v17, %s8527_s27 }
0x44c1   :  { %v2688_v18 = vpop.permute.xlu1 %2687 }
0x44c2   :  { %2690 = vst.msk [vmem:[#allocation2 + $0x30] sm:$0x3] %vm241_vm2, %v2688_v18  ;;  %7385 = vmatmul.mubr.msk.f32.vlgmr.msra.gmra.mrb[40].mxu0 %vm68_vm1, %v2688_v18 }
0x44c3   :  { %7774 = vmatpush3.bf16.msra.mxu0 %v8598_v8  ;;  %7398 = vmatprep.mubr.msk.f32.mxu0 %vm8522_vm0, %v8523_v2 }
0x44c4   :  { %7778 = vmatprep.subr.bf16.mxu0 %v8521_v1 }
0x4595   :  { %v2759_v19 = vpop.f32.mrb[40].mxu0 }
0x4596   :  { %v2763_v20 = vadd.f32 %v2759_v19, %v8619_v13  ;;  %v7386_v21 = vpop.f32.mrb[41].mxu0 }
0x4598   :  { %8129 = vtanh.f32 %v2763_v20  ;;  %v6891_v23 = vmul.f32 -1.442695, %v2763_v20 }
0x459a   :  { %8131 = vpow2.f32 %v6891_v23 }
0x45a2   :  { %v8130_v22 = vpop.eup %8129 }
0x45a3   :  { %2773 = vrot.lane.b32.xlu0 %v8130_v22, %s8524_s25 }
0x45a4   :  { %v8132_v24 = vpop.eup %8131 }
0x45a5   :  { %v2767_v25 = vadd.f32 1.0, %v8132_v24 }
0x45a7   :  { %8133 = vrcp.f32 %v2767_v25 }
0x45b1   :  { %v8134_v26 = vpop.eup %8133 }
0x45b2   :  { %v2771_v29 = vmul.f32 %v8134_v26, %v2679_v14 }
0x4615   :  { %v2774_v27 = vpop.permute.xlu0 %2773 }
0x4616   :  { %v2776_v28 = vmul.f32 %v8134_v26, %v2774_v27 }
0x4618   :  { %2778 = vrot.lane.b32.xlu1 %v2776_v28, %s8525_s3 }
0x468a   :  { %v2779_v30 = vpop.permute.xlu1 %2778 }
0x468b   :  { %v2781_v31 = vadd.f32 %v2779_v30, %v2771_v29 }
0x468d   :  { %8135 = vtanh.f32 %v2781_v31 }
0x4697   :  { %v8136_v32 = vpop.eup %8135 }
0x4698   :  { %2784 = vrot.lane.b32.xlu0 %v8136_v32, %s8526_s26 }
0x470a   :  { %v2785_v33 = vpop.permute.xlu0 %2784 }
0x470b   :  { %v2787_v34 = vmul.f32 %v8134_v26, %v2785_v33 }
0x470d   :  { %2789 = vrot.lane.b32.xlu1 %v2787_v34, %s8527_s27 }
0x477f   :  { %v2790_v35 = vpop.permute.xlu1 %2789 }
0x4780   :  { %2792 = vst.msk [vmem:[#allocation2 + $0x32] sm:$0x3] %vm241_vm2, %v2790_v35  ;;  %7392 = vmatmul.mubr.msk.f32.vlgmr.msra.gmra.mrb[12].mxu1 %vm68_vm1, %v2790_v35 }
0x4781   :  { %7777 = vmatpush3.bf16.msra.mxu1 %v8598_v8  ;;  %7405 = vmatprep.mubr.msk.f32.mxu1 %vm8522_vm0, %v8523_v2 }
0x4782   :  { %7781 = vmatprep.subr.bf16.mxu1 %v8521_v1 }
0x4853   :  { %v2861_v36 = vpop.f32.mrb[12].mxu1 }
0x4854   :  { %v2865_v37 = vadd.f32 %v2861_v36, %v8619_v13  ;;  %v7393_v38 = vpop.f32.mrb[13].mxu1 }
0x4856   :  { %8137 = vtanh.f32 %v2865_v37  ;;  %v6893_v40 = vmul.f32 -1.442695, %v2865_v37 }
0x4858   :  { %8139 = vpow2.f32 %v6893_v40 }
0x4860   :  { %v8138_v39 = vpop.eup %8137 }
0x4861   :  { %2875 = vrot.lane.b32.xlu0 %v8138_v39, %s8524_s25 }
0x4862   :  { %v8140_v41 = vpop.eup %8139 }
0x4863   :  { %v2869_v42 = vadd.f32 1.0, %v8140_v41 }
0x4865   :  { %8141 = vrcp.f32 %v2869_v42 }
0x486f   :  { %v8142_v43 = vpop.eup %8141 }
0x4870   :  { %v2873_v46 = vmul.f32 %v8142_v43, %v2781_v31 }
0x48d3   :  { %v2876_v44 = vpop.permute.xlu0 %2875 }
0x48d4   :  { %v2878_v45 = vmul.f32 %v8142_v43, %v2876_v44 }
0x48d6   :  { %2880 = vrot.lane.b32.xlu1 %v2878_v45, %s8525_s3 }
0x4948   :  { %v2881_v47 = vpop.permute.xlu1 %2880 }
0x4949   :  { %v2883_v48 = vadd.f32 %v2881_v47, %v2873_v46 }
0x494b   :  { %8143 = vtanh.f32 %v2883_v48 }
0x4955   :  { %v8144_v49 = vpop.eup %8143 }
0x4956   :  { %2886 = vrot.lane.b32.xlu0 %v8144_v49, %s8526_s26 }
0x49c8   :  { %v2887_v50 = vpop.permute.xlu0 %2886 }
0x49c9   :  { %v2889_v51 = vmul.f32 %v8142_v43, %v2887_v50 }
0x49cb   :  { %2891 = vrot.lane.b32.xlu1 %v2889_v51, %s8527_s27 }
0x4a3d   :  { %v2892_v52 = vpop.permute.xlu1 %2891 }
0x4a3e   :  { %2894 = vst.msk [vmem:[#allocation2 + $0x34] sm:$0x3] %vm241_vm2, %v2892_v52  ;;  %7399 = vmatmul.mubr.msk.f32.vlgmr.msra.gmra.mrb[42].mxu0 %vm68_vm1, %v2892_v52 }
0x4a3f   :  { %7780 = vmatpush3.bf16.msra.mxu0 %v8598_v8  ;;  %7412 = vmatprep.mubr.msk.f32.mxu0 %vm8522_vm0, %v8523_v2 }
0x4a40   :  { %7784 = vmatprep.subr.bf16.mxu0 %v8521_v1 }
0x4b11   :  { %v2963_v53 = vpop.f32.mrb[42].mxu0 }
0x4b12   :  { %v2967_v54 = vadd.f32 %v2963_v53, %v8619_v13  ;;  %v7400_v55 = vpop.f32.mrb[43].mxu0 }
0x4b14   :  { %8145 = vtanh.f32 %v2967_v54  ;;  %v6895_v57 = vmul.f32 -1.442695, %v2967_v54 }
0x4b16   :  { %8147 = vpow2.f32 %v6895_v57 }
0x4b1e   :  { %v8146_v56 = vpop.eup %8145 }
0x4b1f   :  { %2977 = vrot.lane.b32.xlu0 %v8146_v56, %s8524_s25 }
0x4b20   :  { %v8148_v58 = vpop.eup %8147 }
0x4b21   :  { %v2971_v59 = vadd.f32 1.0, %v8148_v58 }
0x4b23   :  { %8149 = vrcp.f32 %v2971_v59 }
0x4b2d   :  { %v8150_v60 = vpop.eup %8149 }
0x4b2e   :  { %v2975_v63 = vmul.f32 %v8150_v60, %v2883_v48 }
0x4b91   :  { %v2978_v61 = vpop.permute.xlu0 %2977 }
0x4b92   :  { %v2980_v62 = vmul.f32 %v8150_v60, %v2978_v61 }
0x4b94   :  { %2982 = vrot.lane.b32.xlu1 %v2980_v62, %s8525_s3 }
0x4c06   :  { %v2983_v0 = vpop.permute.xlu1 %2982 }
0x4c07   :  { %v2985_v3 = vadd.f32 %v2983_v0, %v2975_v63 }
0x4c09   :  { %8151 = vtanh.f32 %v2985_v3 }
0x4c13   :  { %v8152_v4 = vpop.eup %8151 }
0x4c14   :  { %2988 = vrot.lane.b32.xlu0 %v8152_v4, %s8526_s26 }
0x4c86   :  { %v2989_v5 = vpop.permute.xlu0 %2988 }
0x4c87   :  { %v2991_v6 = vmul.f32 %v8150_v60, %v2989_v5 }
0x4c89   :  { %2993 = vrot.lane.b32.xlu1 %v2991_v6, %s8527_s27 }
0x4cfb   :  { %v2994_v7 = vpop.permute.xlu1 %2993 }
0x4cfc   :  { %2996 = vst.msk [vmem:[#allocation2 + $0x36] sm:$0x3] %vm241_vm2, %v2994_v7  ;;  %7406 = vmatmul.mubr.msk.f32.vlgmr.msra.gmra.mrb[14].mxu1 %vm68_vm1, %v2994_v7 }
0x4cfd   :  { %7783 = vmatpush3.bf16.msra.mxu1 %v8598_v8  ;;  %7419 = vmatprep.mubr.msk.f32.mxu1 %vm8522_vm0, %v8523_v2 }
0x4cfe   :  { %7787 = vmatprep.subr.bf16.mxu1 %v8521_v1 }
0x4dcf   :  { %v3065_v9 = vpop.f32.mrb[14].mxu1 }
0x4dd0   :  { %v3069_v10 = vadd.f32 %v3065_v9, %v8619_v13  ;;  %v7407_v11 = vpop.f32.mrb[15].mxu1 }
0x4dd2   :  { %8153 = vtanh.f32 %v3069_v10  ;;  %v6897_v14 = vmul.f32 -1.442695, %v3069_v10 }
0x4dd4   :  { %8155 = vpow2.f32 %v6897_v14 }
0x4ddc   :  { %v8154_v12 = vpop.eup %8153 }
0x4ddd   :  { %3079 = vrot.lane.b32.xlu0 %v8154_v12, %s8524_s25 }
0x4dde   :  { %v8156_v15 = vpop.eup %8155 }
0x4ddf   :  { %v3073_v16 = vadd.f32 1.0, %v8156_v15 }
0x4de1   :  { %8157 = vrcp.f32 %v3073_v16 }
0x4deb   :  { %v8158_v17 = vpop.eup %8157 }
0x4dec   :  { %v3077_v20 = vmul.f32 %v8158_v17, %v2985_v3 }
0x4e4f   :  { %v3080_v18 = vpop.permute.xlu0 %3079 }
0x4e50   :  { %v3082_v19 = vmul.f32 %v8158_v17, %v3080_v18 }
0x4e52   :  { %3084 = vrot.lane.b32.xlu1 %v3082_v19, %s8525_s3 }
0x4ec4   :  { %v3085_v21 = vpop.permute.xlu1 %3084 }
0x4ec5   :  { %v3087_v22 = vadd.f32 %v3085_v21, %v3077_v20 }
0x4ec7   :  { %8159 = vtanh.f32 %v3087_v22 }
0x4ed1   :  { %v8160_v23 = vpop.eup %8159 }
0x4ed2   :  { %3090 = vrot.lane.b32.xlu0 %v8160_v23, %s8526_s26 }
0x4f44   :  { %v3091_v24 = vpop.permute.xlu0 %3090 }
0x4f45   :  { %v3093_v25 = vmul.f32 %v8158_v17, %v3091_v24 }
0x4f47   :  { %3095 = vrot.lane.b32.xlu1 %v3093_v25, %s8527_s27 }
0x4fb9   :  { %v3096_v26 = vpop.permute.xlu1 %3095 }
0x4fba   :  { %3098 = vst.msk [vmem:[#allocation2 + $0x38] sm:$0x3] %vm241_vm2, %v3096_v26  ;;  %7413 = vmatmul.mubr.msk.f32.vlgmr.msra.gmra.mrb[44].mxu0 %vm68_vm1, %v3096_v26 }
0x4fbb   :  { %7786 = vmatpush3.bf16.msra.mxu0 %v8598_v8  ;;  %7426 = vmatprep.mubr.msk.f32.mxu0 %vm8522_vm0, %v8523_v2 }
0x4fbc   :  { %7790 = vmatprep.subr.bf16.mxu0 %v8521_v1 }
0x508d   :  { %v3167_v27 = vpop.f32.mrb[44].mxu0 }
0x508e   :  { %v3171_v28 = vadd.f32 %v3167_v27, %v8619_v13  ;;  %v7414_v29 = vpop.f32.mrb[45].mxu0 }
0x5090   :  { %8161 = vtanh.f32 %v3171_v28  ;;  %v6899_v31 = vmul.f32 -1.442695, %v3171_v28 }
0x5092   :  { %8163 = vpow2.f32 %v6899_v31 }
0x509a   :  { %v8162_v30 = vpop.eup %8161 }
0x509b   :  { %3181 = vrot.lane.b32.xlu0 %v8162_v30, %s8524_s25 }
0x509c   :  { %v8164_v32 = vpop.eup %8163 }
0x509d   :  { %v3175_v33 = vadd.f32 1.0, %v8164_v32 }
0x509f   :  { %8165 = vrcp.f32 %v3175_v33 }
0x50a9   :  { %v8166_v34 = vpop.eup %8165 }
0x50aa   :  { %v3179_v37 = vmul.f32 %v8166_v34, %v3087_v22 }
0x510d   :  { %v3182_v35 = vpop.permute.xlu0 %3181 }
0x510e   :  { %v3184_v36 = vmul.f32 %v8166_v34, %v3182_v35 }
0x5110   :  { %3186 = vrot.lane.b32.xlu1 %v3184_v36, %s8525_s3 }
0x5182   :  { %v3187_v38 = vpop.permute.xlu1 %3186 }
0x5183   :  { %v3189_v39 = vadd.f32 %v3187_v38, %v3179_v37 }
0x5185   :  { %8167 = vtanh.f32 %v3189_v39 }
0x518f   :  { %v8168_v40 = vpop.eup %8167 }
0x5190   :  { %3192 = vrot.lane.b32.xlu0 %v8168_v40, %s8526_s26 }
0x5202   :  { %v3193_v41 = vpop.permute.xlu0 %3192 }
0x5203   :  { %v3195_v42 = vmul.f32 %v8166_v34, %v3193_v41 }
0x5205   :  { %3197 = vrot.lane.b32.xlu1 %v3195_v42, %s8527_s27 }
0x5277   :  { %v3198_v43 = vpop.permute.xlu1 %3197 }
0x5278   :  { %3200 = vst.msk [vmem:[#allocation2 + $0x3a] sm:$0x3] %vm241_vm2, %v3198_v43  ;;  %7420 = vmatmul.mubr.msk.f32.vlgmr.msra.gmra.mrb[16].mxu1 %vm68_vm1, %v3198_v43 }
0x5279   :  { %7789 = vmatpush3.bf16.msra.mxu1 %v8598_v8  ;;  %7433 = vmatprep.mubr.msk.f32.mxu1 %vm8522_vm0, %v8523_v2 }
0x527a   :  { %7793 = vmatprep.subr.bf16.mxu1 %v8521_v1 }
0x534b   :  { %v3269_v44 = vpop.f32.mrb[16].mxu1 }
0x534c   :  { %v3273_v45 = vadd.f32 %v3269_v44, %v8619_v13  ;;  %v7421_v46 = vpop.f32.mrb[17].mxu1 }
0x534e   :  { %8169 = vtanh.f32 %v3273_v45  ;;  %v6901_v48 = vmul.f32 -1.442695, %v3273_v45 }
0x5350   :  { %8171 = vpow2.f32 %v6901_v48 }
0x5358   :  { %v8170_v47 = vpop.eup %8169 }
0x5359   :  { %3283 = vrot.lane.b32.xlu0 %v8170_v47, %s8524_s25 }
0x535a   :  { %v8172_v49 = vpop.eup %8171 }
0x535b   :  { %v3277_v50 = vadd.f32 1.0, %v8172_v49 }
0x535d   :  { %8173 = vrcp.f32 %v3277_v50 }
0x5367   :  { %v8174_v51 = vpop.eup %8173 }
0x5368   :  { %v3281_v54 = vmul.f32 %v8174_v51, %v3189_v39 }
0x53cb   :  { %v3284_v52 = vpop.permute.xlu0 %3283 }
0x53cc   :  { %v3286_v53 = vmul.f32 %v8174_v51, %v3284_v52 }
0x53ce   :  { %3288 = vrot.lane.b32.xlu1 %v3286_v53, %s8525_s3 }
0x5440   :  { %v3289_v55 = vpop.permute.xlu1 %3288 }
0x5441   :  { %v3291_v56 = vadd.f32 %v3289_v55, %v3281_v54 }
0x5443   :  { %8175 = vtanh.f32 %v3291_v56 }
0x544d   :  { %v8176_v57 = vpop.eup %8175 }
0x544e   :  { %3294 = vrot.lane.b32.xlu0 %v8176_v57, %s8526_s26 }
0x54c0   :  { %v3295_v58 = vpop.permute.xlu0 %3294 }
0x54c1   :  { %v3297_v59 = vmul.f32 %v8174_v51, %v3295_v58 }
0x54c3   :  { %3299 = vrot.lane.b32.xlu1 %v3297_v59, %s8527_s27 }
0x5535   :  { %v3300_v60 = vpop.permute.xlu1 %3299 }
0x5536   :  { %3302 = vst.msk [vmem:[#allocation2 + $0x3c] sm:$0x3] %vm241_vm2, %v3300_v60  ;;  %7427 = vmatmul.mubr.msk.f32.vlgmr.msra.gmra.mrb[46].mxu0 %vm68_vm1, %v3300_v60 }
0x5537   :  { %7792 = vmatpush3.bf16.msra.mxu0 %v8598_v8  ;;  %7440 = vmatprep.mubr.msk.f32.mxu0 %vm8522_vm0, %v8523_v2 }
0x5538   :  { %7796 = vmatprep.subr.bf16.mxu0 %v8521_v1 }
0x5609   :  { %v3371_v61 = vpop.f32.mrb[46].mxu0 }
0x560a   :  { %v3375_v62 = vadd.f32 %v3371_v61, %v8619_v13  ;;  %v7428_v63 = vpop.f32.mrb[47].mxu0 }
0x560c   :  { %8177 = vtanh.f32 %v3375_v62  ;;  %v6903_v3 = vmul.f32 -1.442695, %v3375_v62 }
0x560e   :  { %8179 = vpow2.f32 %v6903_v3 }
0x5616   :  { %v8178_v0 = vpop.eup %8177 }
0x5617   :  { %3385 = vrot.lane.b32.xlu0 %v8178_v0, %s8524_s25 }
0x5618   :  { %v8180_v4 = vpop.eup %8179 }
0x5619   :  { %v3379_v5 = vadd.f32 1.0, %v8180_v4 }
0x561b   :  { %8181 = vrcp.f32 %v3379_v5 }
0x5625   :  { %v8182_v6 = vpop.eup %8181 }
0x5626   :  { %v3383_v10 = vmul.f32 %v8182_v6, %v3291_v56 }
0x5689   :  { %v3386_v7 = vpop.permute.xlu0 %3385 }
0x568a   :  { %v3388_v9 = vmul.f32 %v8182_v6, %v3386_v7 }
0x568c   :  { %3390 = vrot.lane.b32.xlu1 %v3388_v9, %s8525_s3 }
0x56fe   :  { %v3391_v11 = vpop.permute.xlu1 %3390 }
0x56ff   :  { %v3393_v12 = vadd.f32 %v3391_v11, %v3383_v10 }
0x5701   :  { %8183 = vtanh.f32 %v3393_v12 }
0x570b   :  { %v8184_v14 = vpop.eup %8183 }
0x570c   :  { %3396 = vrot.lane.b32.xlu0 %v8184_v14, %s8526_s26 }
0x577e   :  { %v3397_v15 = vpop.permute.xlu0 %3396 }
0x577f   :  { %v3399_v16 = vmul.f32 %v8182_v6, %v3397_v15 }
0x5781   :  { %3401 = vrot.lane.b32.xlu1 %v3399_v16, %s8527_s27 }
0x57f3   :  { %v3402_v17 = vpop.permute.xlu1 %3401 }
0x57f4   :  { %3404 = vst.msk [vmem:[#allocation2 + $0x3e] sm:$0x3] %vm241_vm2, %v3402_v17  ;;  %7434 = vmatmul.mubr.msk.f32.vlgmr.msra.gmra.mrb[18].mxu1 %vm68_vm1, %v3402_v17 }
0x57f5   :  { %7795 = vmatpush3.bf16.msra.mxu1 %v8598_v8  ;;  %7447 = vmatprep.mubr.msk.f32.mxu1 %vm8522_vm0, %v8523_v2 }
0x57f6   :  { %7799 = vmatprep.subr.bf16.mxu1 %v8521_v1 }
0x58c7   :  { %v3473_v18 = vpop.f32.mrb[18].mxu1 }
0x58c8   :  { %v3477_v19 = vadd.f32 %v3473_v18, %v8619_v13  ;;  %v7435_v20 = vpop.f32.mrb[19].mxu1 }
0x58ca   :  { %8185 = vtanh.f32 %v3477_v19  ;;  %v6905_v22 = vmul.f32 -1.442695, %v3477_v19 }
0x58cc   :  { %8187 = vpow2.f32 %v6905_v22 }
0x58d4   :  { %v8186_v21 = vpop.eup %8185 }
0x58d5   :  { %3487 = vrot.lane.b32.xlu0 %v8186_v21, %s8524_s25 }
0x58d6   :  { %v8188_v23 = vpop.eup %8187 }
0x58d7   :  { %v3481_v24 = vadd.f32 1.0, %v8188_v23 }
0x58d9   :  { %8189 = vrcp.f32 %v3481_v24 }
0x58e3   :  { %v8190_v25 = vpop.eup %8189 }
0x58e4   :  { %v3485_v28 = vmul.f32 %v8190_v25, %v3393_v12 }
0x5947   :  { %v3488_v26 = vpop.permute.xlu0 %3487 }
0x5948   :  { %v3490_v27 = vmul.f32 %v8190_v25, %v3488_v26 }
0x594a   :  { %3492 = vrot.lane.b32.xlu1 %v3490_v27, %s8525_s3 }
0x59bc   :  { %v3493_v29 = vpop.permute.xlu1 %3492 }
0x59bd   :  { %v3495_v30 = vadd.f32 %v3493_v29, %v3485_v28 }
0x59bf   :  { %8191 = vtanh.f32 %v3495_v30 }
0x59c9   :  { %v8192_v31 = vpop.eup %8191 }
0x59ca   :  { %3498 = vrot.lane.b32.xlu0 %v8192_v31, %s8526_s26 }
0x5a3c   :  { %v3499_v32 = vpop.permute.xlu0 %3498 }
0x5a3d   :  { %v3501_v33 = vmul.f32 %v8190_v25, %v3499_v32 }
0x5a3f   :  { %3503 = vrot.lane.b32.xlu1 %v3501_v33, %s8527_s27 }
0x5ab1   :  { %v3504_v34 = vpop.permute.xlu1 %3503 }
0x5ab2   :  { %3506 = vst.msk [vmem:[#allocation2 + $0x40] sm:$0x3] %vm241_vm2, %v3504_v34  ;;  %7441 = vmatmul.mubr.msk.f32.vlgmr.msra.gmra.mrb[48].mxu0 %vm68_vm1, %v3504_v34 }
0x5ab3   :  { %7798 = vmatpush3.bf16.msra.mxu0 %v8598_v8  ;;  %7454 = vmatprep.mubr.msk.f32.mxu0 %vm8522_vm0, %v8523_v2 }
0x5ab4   :  { %7802 = vmatprep.subr.bf16.mxu0 %v8521_v1 }
0x5b85   :  { %v3575_v35 = vpop.f32.mrb[48].mxu0 }
0x5b86   :  { %v3579_v36 = vadd.f32 %v3575_v35, %v8619_v13  ;;  %v7442_v37 = vpop.f32.mrb[49].mxu0 }
0x5b88   :  { %8193 = vtanh.f32 %v3579_v36  ;;  %v6907_v39 = vmul.f32 -1.442695, %v3579_v36 }
0x5b8a   :  { %8195 = vpow2.f32 %v6907_v39 }
0x5b92   :  { %v8194_v38 = vpop.eup %8193 }
0x5b93   :  { %3589 = vrot.lane.b32.xlu0 %v8194_v38, %s8524_s25 }
0x5b94   :  { %v8196_v40 = vpop.eup %8195 }
0x5b95   :  { %v3583_v41 = vadd.f32 1.0, %v8196_v40 }
0x5b97   :  { %8197 = vrcp.f32 %v3583_v41 }
0x5ba1   :  { %v8198_v42 = vpop.eup %8197 }
0x5ba2   :  { %v3587_v45 = vmul.f32 %v8198_v42, %v3495_v30 }
0x5c05   :  { %v3590_v43 = vpop.permute.xlu0 %3589 }
0x5c06   :  { %v3592_v44 = vmul.f32 %v8198_v42, %v3590_v43 }
0x5c08   :  { %3594 = vrot.lane.b32.xlu1 %v3592_v44, %s8525_s3 }
0x5c7a   :  { %v3595_v46 = vpop.permute.xlu1 %3594 }
0x5c7b   :  { %v3597_v47 = vadd.f32 %v3595_v46, %v3587_v45 }
0x5c7d   :  { %8199 = vtanh.f32 %v3597_v47 }
0x5c87   :  { %v8200_v48 = vpop.eup %8199 }
0x5c88   :  { %3600 = vrot.lane.b32.xlu0 %v8200_v48, %s8526_s26 }
0x5cfa   :  { %v3601_v49 = vpop.permute.xlu0 %3600 }
0x5cfb   :  { %v3603_v50 = vmul.f32 %v8198_v42, %v3601_v49 }
0x5cfd   :  { %3605 = vrot.lane.b32.xlu1 %v3603_v50, %s8527_s27 }
0x5d6f   :  { %v3606_v51 = vpop.permute.xlu1 %3605 }
0x5d70   :  { %3608 = vst.msk [vmem:[#allocation2 + $0x42] sm:$0x3] %vm241_vm2, %v3606_v51  ;;  %7448 = vmatmul.mubr.msk.f32.vlgmr.msra.gmra.mrb[20].mxu1 %vm68_vm1, %v3606_v51 }
0x5d71   :  { %7801 = vmatpush3.bf16.msra.mxu1 %v8598_v8  ;;  %7461 = vmatprep.mubr.msk.f32.mxu1 %vm8522_vm0, %v8523_v2 }
0x5d72   :  { %7805 = vmatprep.subr.bf16.mxu1 %v8521_v1 }
0x5e43   :  { %v3677_v52 = vpop.f32.mrb[20].mxu1 }
0x5e44   :  { %v3681_v53 = vadd.f32 %v3677_v52, %v8619_v13  ;;  %v7449_v54 = vpop.f32.mrb[21].mxu1 }
0x5e46   :  { %8201 = vtanh.f32 %v3681_v53  ;;  %v6909_v56 = vmul.f32 -1.442695, %v3681_v53 }
0x5e48   :  { %8203 = vpow2.f32 %v6909_v56 }
0x5e50   :  { %v8202_v55 = vpop.eup %8201 }
0x5e51   :  { %3691 = vrot.lane.b32.xlu0 %v8202_v55, %s8524_s25 }
0x5e52   :  { %v8204_v57 = vpop.eup %8203 }
0x5e53   :  { %v3685_v58 = vadd.f32 1.0, %v8204_v57 }
0x5e55   :  { %8205 = vrcp.f32 %v3685_v58 }
0x5e5f   :  { %v8206_v59 = vpop.eup %8205 }
0x5e60   :  { %v3689_v62 = vmul.f32 %v8206_v59, %v3597_v47 }
0x5ec3   :  { %v3692_v60 = vpop.permute.xlu0 %3691 }
0x5ec4   :  { %v3694_v61 = vmul.f32 %v8206_v59, %v3692_v60 }
0x5ec6   :  { %3696 = vrot.lane.b32.xlu1 %v3694_v61, %s8525_s3 }
0x5f38   :  { %v3697_v63 = vpop.permute.xlu1 %3696 }
0x5f39   :  { %v3699_v0 = vadd.f32 %v3697_v63, %v3689_v62 }
0x5f3b   :  { %8207 = vtanh.f32 %v3699_v0 }
0x5f45   :  { %v8208_v3 = vpop.eup %8207 }
0x5f46   :  { %3702 = vrot.lane.b32.xlu0 %v8208_v3, %s8526_s26 }
0x5fb8   :  { %v3703_v4 = vpop.permute.xlu0 %3702 }
0x5fb9   :  { %v3705_v5 = vmul.f32 %v8206_v59, %v3703_v4 }
0x5fbb   :  { %3707 = vrot.lane.b32.xlu1 %v3705_v5, %s8527_s27 }
0x602d   :  { %v3708_v6 = vpop.permute.xlu1 %3707 }
0x602e   :  { %3710 = vst.msk [vmem:[#allocation2 + $0x44] sm:$0x3] %vm241_vm2, %v3708_v6  ;;  %7455 = vmatmul.mubr.msk.f32.vlgmr.msra.gmra.mrb[50].mxu0 %vm68_vm1, %v3708_v6 }
0x602f   :  { %7804 = vmatpush3.bf16.msra.mxu0 %v8598_v8  ;;  %7468 = vmatprep.mubr.msk.f32.mxu0 %vm8522_vm0, %v8523_v2 }
0x6030   :  { %7808 = vmatprep.subr.bf16.mxu0 %v8521_v1 }
0x6101   :  { %v3779_v7 = vpop.f32.mrb[50].mxu0 }
0x6102   :  { %v3783_v9 = vadd.f32 %v3779_v7, %v8619_v13  ;;  %v7456_v10 = vpop.f32.mrb[51].mxu0 }
0x6104   :  { %8209 = vtanh.f32 %v3783_v9  ;;  %v6911_v12 = vmul.f32 -1.442695, %v3783_v9 }
0x6106   :  { %8211 = vpow2.f32 %v6911_v12 }
0x610e   :  { %v8210_v11 = vpop.eup %8209 }
0x610f   :  { %3793 = vrot.lane.b32.xlu0 %v8210_v11, %s8524_s25 }
0x6110   :  { %v8212_v14 = vpop.eup %8211 }
0x6111   :  { %v3787_v15 = vadd.f32 1.0, %v8212_v14 }
0x6113   :  { %8213 = vrcp.f32 %v3787_v15 }
0x611d   :  { %v8214_v16 = vpop.eup %8213 }
0x611e   :  { %v3791_v19 = vmul.f32 %v8214_v16, %v3699_v0 }
0x6181   :  { %v3794_v17 = vpop.permute.xlu0 %3793 }
0x6182   :  { %v3796_v18 = vmul.f32 %v8214_v16, %v3794_v17 }
0x6184   :  { %3798 = vrot.lane.b32.xlu1 %v3796_v18, %s8525_s3 }
0x61f6   :  { %v3799_v20 = vpop.permute.xlu1 %3798 }
0x61f7   :  { %v3801_v21 = vadd.f32 %v3799_v20, %v3791_v19 }
0x61f9   :  { %8215 = vtanh.f32 %v3801_v21 }
0x6203   :  { %v8216_v22 = vpop.eup %8215 }
0x6204   :  { %3804 = vrot.lane.b32.xlu0 %v8216_v22, %s8526_s26 }
0x6276   :  { %v3805_v23 = vpop.permute.xlu0 %3804 }
0x6277   :  { %v3807_v24 = vmul.f32 %v8214_v16, %v3805_v23 }
0x6279   :  { %3809 = vrot.lane.b32.xlu1 %v3807_v24, %s8527_s27 }
0x62eb   :  { %v3810_v25 = vpop.permute.xlu1 %3809 }
0x62ec   :  { %3812 = vst.msk [vmem:[#allocation2 + $0x46] sm:$0x3] %vm241_vm2, %v3810_v25  ;;  %7462 = vmatmul.mubr.msk.f32.vlgmr.msra.gmra.mrb[22].mxu1 %vm68_vm1, %v3810_v25 }
0x62ed   :  { %7807 = vmatpush3.bf16.msra.mxu1 %v8598_v8  ;;  %7475 = vmatprep.mubr.msk.f32.mxu1 %vm8522_vm0, %v8523_v2 }
0x62ee   :  { %7811 = vmatprep.subr.bf16.mxu1 %v8521_v1 }
0x63bf   :  { %v3881_v26 = vpop.f32.mrb[22].mxu1 }
0x63c0   :  { %v3885_v27 = vadd.f32 %v3881_v26, %v8619_v13  ;;  %v7463_v28 = vpop.f32.mrb[23].mxu1 }
0x63c2   :  { %8217 = vtanh.f32 %v3885_v27  ;;  %v6913_v30 = vmul.f32 -1.442695, %v3885_v27 }
0x63c4   :  { %8219 = vpow2.f32 %v6913_v30 }
0x63cc   :  { %v8218_v29 = vpop.eup %8217 }
0x63cd   :  { %3895 = vrot.lane.b32.xlu0 %v8218_v29, %s8524_s25 }
0x63ce   :  { %v8220_v31 = vpop.eup %8219 }
0x63cf   :  { %v3889_v32 = vadd.f32 1.0, %v8220_v31 }
0x63d1   :  { %8221 = vrcp.f32 %v3889_v32 }
0x63db   :  { %v8222_v33 = vpop.eup %8221 }
0x63dc   :  { %v3893_v36 = vmul.f32 %v8222_v33, %v3801_v21 }
0x643f   :  { %v3896_v34 = vpop.permute.xlu0 %3895 }
0x6440   :  { %v3898_v35 = vmul.f32 %v8222_v33, %v3896_v34 }
0x6442   :  { %3900 = vrot.lane.b32.xlu1 %v3898_v35, %s8525_s3 }
0x64b4   :  { %v3901_v37 = vpop.permute.xlu1 %3900 }
0x64b5   :  { %v3903_v38 = vadd.f32 %v3901_v37, %v3893_v36 }
0x64b7   :  { %8223 = vtanh.f32 %v3903_v38 }
0x64c1   :  { %v8224_v39 = vpop.eup %8223 }
0x64c2   :  { %3906 = vrot.lane.b32.xlu0 %v8224_v39, %s8526_s26 }
0x6534   :  { %v3907_v40 = vpop.permute.xlu0 %3906 }
0x6535   :  { %v3909_v41 = vmul.f32 %v8222_v33, %v3907_v40 }
0x6537   :  { %3911 = vrot.lane.b32.xlu1 %v3909_v41, %s8527_s27 }
0x65a9   :  { %v3912_v42 = vpop.permute.xlu1 %3911 }
0x65aa   :  { %3914 = vst.msk [vmem:[#allocation2 + $0x48] sm:$0x3] %vm241_vm2, %v3912_v42  ;;  %7469 = vmatmul.mubr.msk.f32.vlgmr.msra.gmra.mrb[52].mxu0 %vm68_vm1, %v3912_v42 }
0x65ab   :  { %7810 = vmatpush3.bf16.msra.mxu0 %v8598_v8  ;;  %7482 = vmatprep.mubr.msk.f32.mxu0 %vm8522_vm0, %v8523_v2 }
0x65ac   :  { %7814 = vmatprep.subr.bf16.mxu0 %v8521_v1 }
0x667d   :  { %v3983_v43 = vpop.f32.mrb[52].mxu0 }
0x667e   :  { %v3987_v44 = vadd.f32 %v3983_v43, %v8619_v13  ;;  %v7470_v45 = vpop.f32.mrb[53].mxu0 }
0x6680   :  { %8225 = vtanh.f32 %v3987_v44  ;;  %v6915_v47 = vmul.f32 -1.442695, %v3987_v44 }
0x6682   :  { %8227 = vpow2.f32 %v6915_v47 }
0x668a   :  { %v8226_v46 = vpop.eup %8225 }
0x668b   :  { %3997 = vrot.lane.b32.xlu0 %v8226_v46, %s8524_s25 }
0x668c   :  { %v8228_v48 = vpop.eup %8227 }
0x668d   :  { %v3991_v49 = vadd.f32 1.0, %v8228_v48 }
0x668f   :  { %8229 = vrcp.f32 %v3991_v49 }
0x6699   :  { %v8230_v50 = vpop.eup %8229 }
0x669a   :  { %v3995_v53 = vmul.f32 %v8230_v50, %v3903_v38 }
0x66fd   :  { %v3998_v51 = vpop.permute.xlu0 %3997 }
0x66fe   :  { %v4000_v52 = vmul.f32 %v8230_v50, %v3998_v51 }
0x6700   :  { %4002 = vrot.lane.b32.xlu1 %v4000_v52, %s8525_s3 }
0x6772   :  { %v4003_v54 = vpop.permute.xlu1 %4002 }
0x6773   :  { %v4005_v55 = vadd.f32 %v4003_v54, %v3995_v53 }
0x6775   :  { %8231 = vtanh.f32 %v4005_v55 }
0x677f   :  { %v8232_v56 = vpop.eup %8231 }
0x6780   :  { %4008 = vrot.lane.b32.xlu0 %v8232_v56, %s8526_s26 }
0x67f2   :  { %v4009_v57 = vpop.permute.xlu0 %4008 }
0x67f3   :  { %v4011_v58 = vmul.f32 %v8230_v50, %v4009_v57 }
0x67f5   :  { %4013 = vrot.lane.b32.xlu1 %v4011_v58, %s8527_s27 }
0x6867   :  { %v4014_v59 = vpop.permute.xlu1 %4013 }
0x6868   :  { %4016 = vst.msk [vmem:[#allocation2 + $0x4a] sm:$0x3] %vm241_vm2, %v4014_v59  ;;  %7476 = vmatmul.mubr.msk.f32.vlgmr.msra.gmra.mrb[24].mxu1 %vm68_vm1, %v4014_v59 }
0x6869   :  { %7813 = vmatpush3.bf16.msra.mxu1 %v8598_v8  ;;  %7489 = vmatprep.mubr.msk.f32.mxu1 %vm8522_vm0, %v8523_v2 }
0x686a   :  { %7817 = vmatprep.subr.bf16.mxu1 %v8521_v1 }
0x693b   :  { %v4085_v60 = vpop.f32.mrb[24].mxu1 }
0x693c   :  { %v4089_v61 = vadd.f32 %v4085_v60, %v8619_v13  ;;  %v7477_v62 = vpop.f32.mrb[25].mxu1 }
0x693e   :  { %8233 = vtanh.f32 %v4089_v61  ;;  %v6917_v0 = vmul.f32 -1.442695, %v4089_v61 }
0x6940   :  { %8235 = vpow2.f32 %v6917_v0 }
0x6948   :  { %v8234_v63 = vpop.eup %8233 }
0x6949   :  { %4099 = vrot.lane.b32.xlu0 %v8234_v63, %s8524_s25 }
0x694a   :  { %v8236_v3 = vpop.eup %8235 }
0x694b   :  { %v4093_v4 = vadd.f32 1.0, %v8236_v3 }
0x694d   :  { %8237 = vrcp.f32 %v4093_v4 }
0x6957   :  { %v8238_v5 = vpop.eup %8237 }
0x6958   :  { %v4097_v9 = vmul.f32 %v8238_v5, %v4005_v55 }
0x69bb   :  { %v4100_v6 = vpop.permute.xlu0 %4099 }
0x69bc   :  { %v4102_v7 = vmul.f32 %v8238_v5, %v4100_v6 }
0x69be   :  { %4104 = vrot.lane.b32.xlu1 %v4102_v7, %s8525_s3 }
0x6a30   :  { %v4105_v10 = vpop.permute.xlu1 %4104 }
0x6a31   :  { %v4107_v11 = vadd.f32 %v4105_v10, %v4097_v9 }
0x6a33   :  { %8239 = vtanh.f32 %v4107_v11 }
0x6a3d   :  { %v8240_v12 = vpop.eup %8239 }
0x6a3e   :  { %4110 = vrot.lane.b32.xlu0 %v8240_v12, %s8526_s26 }
0x6ab0   :  { %v4111_v14 = vpop.permute.xlu0 %4110 }
0x6ab1   :  { %v4113_v15 = vmul.f32 %v8238_v5, %v4111_v14 }
0x6ab3   :  { %4115 = vrot.lane.b32.xlu1 %v4113_v15, %s8527_s27 }
0x6b25   :  { %v4116_v16 = vpop.permute.xlu1 %4115 }
0x6b26   :  { %4118 = vst.msk [vmem:[#allocation2 + $0x4c] sm:$0x3] %vm241_vm2, %v4116_v16  ;;  %7483 = vmatmul.mubr.msk.f32.vlgmr.msra.gmra.mrb[54].mxu0 %vm68_vm1, %v4116_v16 }
0x6b27   :  { %7816 = vmatpush3.bf16.msra.mxu0 %v8598_v8  ;;  %7496 = vmatprep.mubr.msk.f32.mxu0 %vm8522_vm0, %v8523_v2 }
0x6b28   :  { %7820 = vmatprep.subr.bf16.mxu0 %v8521_v1 }
0x6bf9   :  { %v4187_v17 = vpop.f32.mrb[54].mxu0 }
0x6bfa   :  { %v4191_v18 = vadd.f32 %v4187_v17, %v8619_v13  ;;  %v7484_v19 = vpop.f32.mrb[55].mxu0 }
0x6bfc   :  { %8241 = vtanh.f32 %v4191_v18  ;;  %v6919_v21 = vmul.f32 -1.442695, %v4191_v18 }
0x6bfe   :  { %8243 = vpow2.f32 %v6919_v21 }
0x6c06   :  { %v8242_v20 = vpop.eup %8241 }
0x6c07   :  { %4201 = vrot.lane.b32.xlu0 %v8242_v20, %s8524_s25 }
0x6c08   :  { %v8244_v22 = vpop.eup %8243 }
0x6c09   :  { %v4195_v23 = vadd.f32 1.0, %v8244_v22 }
0x6c0b   :  { %8245 = vrcp.f32 %v4195_v23 }
0x6c15   :  { %v8246_v24 = vpop.eup %8245 }
0x6c16   :  { %v4199_v27 = vmul.f32 %v8246_v24, %v4107_v11 }
0x6c79   :  { %v4202_v25 = vpop.permute.xlu0 %4201 }
0x6c7a   :  { %v4204_v26 = vmul.f32 %v8246_v24, %v4202_v25 }
0x6c7c   :  { %4206 = vrot.lane.b32.xlu1 %v4204_v26, %s8525_s3 }
0x6cee   :  { %v4207_v28 = vpop.permute.xlu1 %4206 }
0x6cef   :  { %v4209_v29 = vadd.f32 %v4207_v28, %v4199_v27 }
0x6cf1   :  { %8247 = vtanh.f32 %v4209_v29 }
0x6cfb   :  { %v8248_v30 = vpop.eup %8247 }
0x6cfc   :  { %4212 = vrot.lane.b32.xlu0 %v8248_v30, %s8526_s26 }
0x6d6e   :  { %v4213_v31 = vpop.permute.xlu0 %4212 }
0x6d6f   :  { %v4215_v32 = vmul.f32 %v8246_v24, %v4213_v31 }
0x6d71   :  { %4217 = vrot.lane.b32.xlu1 %v4215_v32, %s8527_s27 }
0x6de3   :  { %v4218_v33 = vpop.permute.xlu1 %4217 }
0x6de4   :  { %4220 = vst.msk [vmem:[#allocation2 + $0x4e] sm:$0x3] %vm241_vm2, %v4218_v33  ;;  %7490 = vmatmul.mubr.msk.f32.vlgmr.msra.gmra.mrb[26].mxu1 %vm68_vm1, %v4218_v33 }
0x6de5   :  { %7819 = vmatpush3.bf16.msra.mxu1 %v8598_v8  ;;  %7503 = vmatprep.mubr.msk.f32.mxu1 %vm8522_vm0, %v8523_v2 }
0x6de6   :  { %7823 = vmatprep.subr.bf16.mxu1 %v8521_v1 }
0x6eb7   :  { %v4289_v34 = vpop.f32.mrb[26].mxu1 }
0x6eb8   :  { %v4293_v35 = vadd.f32 %v4289_v34, %v8619_v13  ;;  %v7491_v36 = vpop.f32.mrb[27].mxu1 }
0x6eba   :  { %8249 = vtanh.f32 %v4293_v35  ;;  %v6921_v38 = vmul.f32 -1.442695, %v4293_v35 }
0x6ebc   :  { %8251 = vpow2.f32 %v6921_v38 }
0x6ec4   :  { %v8250_v37 = vpop.eup %8249 }
0x6ec5   :  { %4303 = vrot.lane.b32.xlu0 %v8250_v37, %s8524_s25 }
0x6ec6   :  { %v8252_v39 = vpop.eup %8251 }
0x6ec7   :  { %v4297_v40 = vadd.f32 1.0, %v8252_v39 }
0x6ec9   :  { %8253 = vrcp.f32 %v4297_v40 }
0x6ed3   :  { %v8254_v41 = vpop.eup %8253 }
0x6ed4   :  { %v4301_v44 = vmul.f32 %v8254_v41, %v4209_v29 }
0x6f37   :  { %v4304_v42 = vpop.permute.xlu0 %4303 }
0x6f38   :  { %v4306_v43 = vmul.f32 %v8254_v41, %v4304_v42 }
0x6f3a   :  { %4308 = vrot.lane.b32.xlu1 %v4306_v43, %s8525_s3 }
0x6fac   :  { %v4309_v45 = vpop.permute.xlu1 %4308 }
0x6fad   :  { %v4311_v46 = vadd.f32 %v4309_v45, %v4301_v44 }
0x6faf   :  { %8255 = vtanh.f32 %v4311_v46 }
0x6fb9   :  { %v8256_v47 = vpop.eup %8255 }
0x6fba   :  { %4314 = vrot.lane.b32.xlu0 %v8256_v47, %s8526_s26 }
0x702c   :  { %v4315_v48 = vpop.permute.xlu0 %4314 }
0x702d   :  { %v4317_v49 = vmul.f32 %v8254_v41, %v4315_v48 }
0x702f   :  { %4319 = vrot.lane.b32.xlu1 %v4317_v49, %s8527_s27 }
0x70a1   :  { %v4320_v50 = vpop.permute.xlu1 %4319 }
0x70a2   :  { %4322 = vst.msk [vmem:[#allocation2 + $0x50] sm:$0x3] %vm241_vm2, %v4320_v50  ;;  %7497 = vmatmul.mubr.msk.f32.vlgmr.msra.gmra.mrb[56].mxu0 %vm68_vm1, %v4320_v50 }
0x70a3   :  { %7822 = vmatpush3.bf16.msra.mxu0 %v8598_v8  ;;  %7510 = vmatprep.mubr.msk.f32.mxu0 %vm8522_vm0, %v8523_v2 }
0x70a4   :  { %7826 = vmatprep.subr.bf16.mxu0 %v8521_v1 }
0x7175   :  { %v4391_v51 = vpop.f32.mrb[56].mxu0 }
0x7176   :  { %v4395_v52 = vadd.f32 %v4391_v51, %v8619_v13  ;;  %v7498_v53 = vpop.f32.mrb[57].mxu0 }
0x7178   :  { %8257 = vtanh.f32 %v4395_v52  ;;  %v6923_v55 = vmul.f32 -1.442695, %v4395_v52 }
0x717a   :  { %8259 = vpow2.f32 %v6923_v55 }
0x7182   :  { %v8258_v54 = vpop.eup %8257 }
0x7183   :  { %4405 = vrot.lane.b32.xlu0 %v8258_v54, %s8524_s25 }
0x7184   :  { %v8260_v56 = vpop.eup %8259 }
0x7185   :  { %v4399_v57 = vadd.f32 1.0, %v8260_v56 }
0x7187   :  { %8261 = vrcp.f32 %v4399_v57 }
0x7191   :  { %v8262_v58 = vpop.eup %8261 }
0x7192   :  { %v4403_v61 = vmul.f32 %v8262_v58, %v4311_v46 }
0x71f5   :  { %v4406_v59 = vpop.permute.xlu0 %4405 }
0x71f6   :  { %v4408_v60 = vmul.f32 %v8262_v58, %v4406_v59 }
0x71f8   :  { %4410 = vrot.lane.b32.xlu1 %v4408_v60, %s8525_s3 }
0x726a   :  { %v4411_v62 = vpop.permute.xlu1 %4410 }
0x726b   :  { %v4413_v63 = vadd.f32 %v4411_v62, %v4403_v61 }
0x726d   :  { %8263 = vtanh.f32 %v4413_v63 }
0x7277   :  { %v8264_v0 = vpop.eup %8263 }
0x7278   :  { %4416 = vrot.lane.b32.xlu0 %v8264_v0, %s8526_s26 }
0x72ea   :  { %v4417_v3 = vpop.permute.xlu0 %4416 }
0x72eb   :  { %v4419_v4 = vmul.f32 %v8262_v58, %v4417_v3 }
0x72ed   :  { %4421 = vrot.lane.b32.xlu1 %v4419_v4, %s8527_s27 }
0x735f   :  { %v4422_v5 = vpop.permute.xlu1 %4421 }
0x7360   :  { %4424 = vst.msk [vmem:[#allocation2 + $0x52] sm:$0x3] %vm241_vm2, %v4422_v5  ;;  %7504 = vmatmul.mubr.msk.f32.vlgmr.msra.gmra.mrb[28].mxu1 %vm68_vm1, %v4422_v5 }
0x7361   :  { %7825 = vmatpush3.bf16.msra.mxu1 %v8598_v8  ;;  %7517 = vmatprep.mubr.msk.f32.mxu1 %vm8522_vm0, %v8523_v2 }
0x7362   :  { %7829 = vmatprep.subr.bf16.mxu1 %v8521_v1 }
0x7433   :  { %v4493_v6 = vpop.f32.mrb[28].mxu1 }
0x7434   :  { %v4497_v7 = vadd.f32 %v4493_v6, %v8619_v13  ;;  %v7505_v9 = vpop.f32.mrb[29].mxu1 }
0x7436   :  { %8265 = vtanh.f32 %v4497_v7  ;;  %v6925_v11 = vmul.f32 -1.442695, %v4497_v7 }
0x7438   :  { %8267 = vpow2.f32 %v6925_v11 }
0x7440   :  { %v8266_v10 = vpop.eup %8265 }
0x7441   :  { %4507 = vrot.lane.b32.xlu0 %v8266_v10, %s8524_s25 }
0x7442   :  { %v8268_v12 = vpop.eup %8267 }
0x7443   :  { %v4501_v14 = vadd.f32 1.0, %v8268_v12 }
0x7445   :  { %8269 = vrcp.f32 %v4501_v14 }
0x744f   :  { %v8270_v15 = vpop.eup %8269 }
0x7450   :  { %v4505_v18 = vmul.f32 %v8270_v15, %v4413_v63 }
0x74b3   :  { %v4508_v16 = vpop.permute.xlu0 %4507 }
0x74b4   :  { %v4510_v17 = vmul.f32 %v8270_v15, %v4508_v16 }
0x74b6   :  { %4512 = vrot.lane.b32.xlu1 %v4510_v17, %s8525_s3 }
0x7528   :  { %v4513_v19 = vpop.permute.xlu1 %4512 }
0x7529   :  { %v4515_v20 = vadd.f32 %v4513_v19, %v4505_v18 }
0x752b   :  { %8271 = vtanh.f32 %v4515_v20 }
0x7535   :  { %v8272_v21 = vpop.eup %8271 }
0x7536   :  { %4518 = vrot.lane.b32.xlu0 %v8272_v21, %s8526_s26 }
0x75a8   :  { %v4519_v22 = vpop.permute.xlu0 %4518 }
0x75a9   :  { %v4521_v23 = vmul.f32 %v8270_v15, %v4519_v22 }
0x75ab   :  { %4523 = vrot.lane.b32.xlu1 %v4521_v23, %s8527_s27 }
0x761d   :  { %v4524_v24 = vpop.permute.xlu1 %4523 }
0x761e   :  { %4526 = vst.msk [vmem:[#allocation2 + $0x54] sm:$0x3] %vm241_vm2, %v4524_v24  ;;  %7511 = vmatmul.mubr.msk.f32.vlgmr.msra.gmra.mrb[58].mxu0 %vm68_vm1, %v4524_v24 }
0x761f   :  { %7828 = vmatpush3.bf16.msra.mxu0 %v8598_v8  ;;  %7524 = vmatprep.mubr.msk.f32.mxu0 %vm8522_vm0, %v8523_v2 }
0x7620   :  { %7832 = vmatprep.subr.bf16.mxu0 %v8521_v1 }
0x76f1   :  { %v4595_v25 = vpop.f32.mrb[58].mxu0 }
0x76f2   :  { %v4599_v26 = vadd.f32 %v4595_v25, %v8619_v13  ;;  %v7512_v27 = vpop.f32.mrb[59].mxu0 }
0x76f4   :  { %8273 = vtanh.f32 %v4599_v26  ;;  %v6927_v29 = vmul.f32 -1.442695, %v4599_v26 }
0x76f6   :  { %8275 = vpow2.f32 %v6927_v29 }
0x76fe   :  { %v8274_v28 = vpop.eup %8273 }
0x76ff   :  { %4609 = vrot.lane.b32.xlu0 %v8274_v28, %s8524_s25 }
0x7700   :  { %v8276_v30 = vpop.eup %8275 }
0x7701   :  { %v4603_v31 = vadd.f32 1.0, %v8276_v30 }
0x7703   :  { %8277 = vrcp.f32 %v4603_v31 }
0x770d   :  { %v8278_v32 = vpop.eup %8277 }
0x770e   :  { %v4607_v35 = vmul.f32 %v8278_v32, %v4515_v20 }
0x7771   :  { %v4610_v33 = vpop.permute.xlu0 %4609 }
0x7772   :  { %v4612_v34 = vmul.f32 %v8278_v32, %v4610_v33 }
0x7774   :  { %4614 = vrot.lane.b32.xlu1 %v4612_v34, %s8525_s3 }
0x77e6   :  { %v4615_v36 = vpop.permute.xlu1 %4614 }
0x77e7   :  { %v4617_v37 = vadd.f32 %v4615_v36, %v4607_v35 }
0x77e9   :  { %8279 = vtanh.f32 %v4617_v37 }
0x77f3   :  { %v8280_v38 = vpop.eup %8279 }
0x77f4   :  { %4620 = vrot.lane.b32.xlu0 %v8280_v38, %s8526_s26 }
0x7866   :  { %v4621_v39 = vpop.permute.xlu0 %4620 }
0x7867   :  { %v4623_v40 = vmul.f32 %v8278_v32, %v4621_v39 }
0x7869   :  { %4625 = vrot.lane.b32.xlu1 %v4623_v40, %s8527_s27 }
0x78db   :  { %v4626_v41 = vpop.permute.xlu1 %4625 }
0x78dc   :  { %4628 = vst.msk [vmem:[#allocation2 + $0x56] sm:$0x3] %vm241_vm2, %v4626_v41  ;;  %7518 = vmatmul.mubr.msk.f32.vlgmr.msra.gmra.mrb[30].mxu1 %vm68_vm1, %v4626_v41 }
0x78dd   :  { %7831 = vmatpush3.bf16.msra.mxu1 %v8598_v8  ;;  %7531 = vmatprep.mubr.msk.f32.mxu1 %vm8522_vm0, %v8523_v2 }
0x78de   :  { %7835 = vmatprep.subr.bf16.mxu1 %v8521_v1 }
0x79af   :  { %v4697_v42 = vpop.f32.mrb[30].mxu1 }
0x79b0   :  { %v4701_v43 = vadd.f32 %v4697_v42, %v8619_v13  ;;  %v7519_v44 = vpop.f32.mrb[31].mxu1 }
0x79b2   :  { %8281 = vtanh.f32 %v4701_v43  ;;  %v6929_v46 = vmul.f32 -1.442695, %v4701_v43 }
0x79b4   :  { %8283 = vpow2.f32 %v6929_v46 }
0x79bc   :  { %v8282_v45 = vpop.eup %8281 }
0x79bd   :  { %4711 = vrot.lane.b32.xlu0 %v8282_v45, %s8524_s25 }
0x79be   :  { %v8284_v47 = vpop.eup %8283 }
0x79bf   :  { %v4705_v48 = vadd.f32 1.0, %v8284_v47 }
0x79c1   :  { %8285 = vrcp.f32 %v4705_v48 }
0x79cb   :  { %v8286_v49 = vpop.eup %8285 }
0x79cc   :  { %v4709_v52 = vmul.f32 %v8286_v49, %v4617_v37 }
0x7a2f   :  { %v4712_v50 = vpop.permute.xlu0 %4711 }
0x7a30   :  { %v4714_v51 = vmul.f32 %v8286_v49, %v4712_v50 }
0x7a32   :  { %4716 = vrot.lane.b32.xlu1 %v4714_v51, %s8525_s3 }
0x7aa4   :  { %v4717_v53 = vpop.permute.xlu1 %4716 }
0x7aa5   :  { %v4719_v54 = vadd.f32 %v4717_v53, %v4709_v52 }
0x7aa7   :  { %8287 = vtanh.f32 %v4719_v54 }
0x7ab1   :  { %v8288_v55 = vpop.eup %8287 }
0x7ab2   :  { %4722 = vrot.lane.b32.xlu0 %v8288_v55, %s8526_s26 }
0x7b24   :  { %v4723_v56 = vpop.permute.xlu0 %4722 }
0x7b25   :  { %v4725_v57 = vmul.f32 %v8286_v49, %v4723_v56 }
0x7b27   :  { %4727 = vrot.lane.b32.xlu1 %v4725_v57, %s8527_s27 }
0x7b99   :  { %v4728_v58 = vpop.permute.xlu1 %4727 }
0x7b9a   :  { %4730 = vst.msk [vmem:[#allocation2 + $0x58] sm:$0x3] %vm241_vm2, %v4728_v58  ;;  %7525 = vmatmul.mubr.msk.f32.vlgmr.msra.gmra.mrb[60].mxu0 %vm68_vm1, %v4728_v58 }
0x7b9b   :  { %7834 = vmatpush3.bf16.msra.mxu0 %v8598_v8  ;;  %7538 = vmatprep.mubr.msk.f32.mxu0 %vm8522_vm0, %v8523_v2 }
0x7b9c   :  { %7838 = vmatprep.subr.bf16.mxu0 %v8521_v1 }
0x7c6d   :  { %v4799_v59 = vpop.f32.mrb[60].mxu0 }
0x7c6e   :  { %v4803_v60 = vadd.f32 %v4799_v59, %v8619_v13  ;;  %v7526_v61 = vpop.f32.mrb[61].mxu0 }
0x7c70   :  { %8289 = vtanh.f32 %v4803_v60  ;;  %v6931_v63 = vmul.f32 -1.442695, %v4803_v60 }
0x7c72   :  { %8291 = vpow2.f32 %v6931_v63 }
0x7c7a   :  { %v8290_v62 = vpop.eup %8289 }
0x7c7b   :  { %4813 = vrot.lane.b32.xlu0 %v8290_v62, %s8524_s25 }
0x7c7c   :  { %v8292_v0 = vpop.eup %8291 }
0x7c7d   :  { %v4807_v3 = vadd.f32 1.0, %v8292_v0 }
0x7c7f   :  { %8293 = vrcp.f32 %v4807_v3 }
0x7c89   :  { %v8294_v4 = vpop.eup %8293 }
0x7c8a   :  { %v4811_v7 = vmul.f32 %v8294_v4, %v4719_v54 }
0x7ced   :  { %v4814_v5 = vpop.permute.xlu0 %4813 }
0x7cee   :  { %v4816_v6 = vmul.f32 %v8294_v4, %v4814_v5 }
0x7cf0   :  { %4818 = vrot.lane.b32.xlu1 %v4816_v6, %s8525_s3 }
0x7d62   :  { %v4819_v9 = vpop.permute.xlu1 %4818 }
0x7d63   :  { %v4821_v10 = vadd.f32 %v4819_v9, %v4811_v7 }
0x7d65   :  { %8295 = vtanh.f32 %v4821_v10 }
0x7d6f   :  { %v8296_v11 = vpop.eup %8295 }
0x7d70   :  { %4824 = vrot.lane.b32.xlu0 %v8296_v11, %s8526_s26 }
0x7de2   :  { %v4825_v12 = vpop.permute.xlu0 %4824 }
0x7de3   :  { %v4827_v14 = vmul.f32 %v8294_v4, %v4825_v12 }
0x7de5   :  { %4829 = vrot.lane.b32.xlu1 %v4827_v14, %s8527_s27 }
0x7e57   :  { %v4830_v15 = vpop.permute.xlu1 %4829 }
0x7e58   :  { %4832 = vst.msk [vmem:[#allocation2 + $0x5a] sm:$0x3] %vm241_vm2, %v4830_v15  ;;  %7532 = vmatmul.mubr.msk.f32.vlgmr.msra.gmra.mrb[32].mxu1 %vm68_vm1, %v4830_v15 }
0x7e59   :  { %7837 = vmatpush3.bf16.msra.mxu1 %v8598_v8  ;;  %7545 = vmatprep.mubr.msk.f32.mxu1 %vm8522_vm0, %v8523_v2 }
0x7e5a   :  { %7841 = vmatprep.subr.bf16.mxu1 %v8521_v1 }
0x7f2b   :  { %v4901_v16 = vpop.f32.mrb[32].mxu1 }
0x7f2c   :  { %v4905_v17 = vadd.f32 %v4901_v16, %v8619_v13  ;;  %v7533_v18 = vpop.f32.mrb[33].mxu1 }
0x7f2e   :  { %8297 = vtanh.f32 %v4905_v17  ;;  %v6933_v20 = vmul.f32 -1.442695, %v4905_v17 }
0x7f30   :  { %8299 = vpow2.f32 %v6933_v20 }
0x7f38   :  { %v8298_v19 = vpop.eup %8297 }
0x7f39   :  { %4915 = vrot.lane.b32.xlu0 %v8298_v19, %s8524_s25 }
0x7f3a   :  { %v8300_v21 = vpop.eup %8299 }
0x7f3b   :  { %v4909_v22 = vadd.f32 1.0, %v8300_v21 }
0x7f3d   :  { %8301 = vrcp.f32 %v4909_v22 }
0x7f47   :  { %v8302_v23 = vpop.eup %8301 }
0x7f48   :  { %v4913_v26 = vmul.f32 %v8302_v23, %v4821_v10 }
0x7fab   :  { %v4916_v24 = vpop.permute.xlu0 %4915 }
0x7fac   :  { %v4918_v25 = vmul.f32 %v8302_v23, %v4916_v24 }
0x7fae   :  { %4920 = vrot.lane.b32.xlu1 %v4918_v25, %s8525_s3 }
0x8020   :  { %v4921_v27 = vpop.permute.xlu1 %4920 }
0x8021   :  { %v4923_v28 = vadd.f32 %v4921_v27, %v4913_v26 }
0x8023   :  { %8303 = vtanh.f32 %v4923_v28 }
0x802d   :  { %v8304_v29 = vpop.eup %8303 }
0x802e   :  { %4926 = vrot.lane.b32.xlu0 %v8304_v29, %s8526_s26 }
0x80a0   :  { %v4927_v30 = vpop.permute.xlu0 %4926 }
0x80a1   :  { %v4929_v31 = vmul.f32 %v8302_v23, %v4927_v30 }
0x80a3   :  { %4931 = vrot.lane.b32.xlu1 %v4929_v31, %s8527_s27 }
0x8115   :  { %v4932_v32 = vpop.permute.xlu1 %4931 }
0x8116   :  { %4934 = vst.msk [vmem:[#allocation2 + $0x5c] sm:$0x3] %vm241_vm2, %v4932_v32  ;;  %7539 = vmatmul.mubr.msk.f32.vlgmr.msra.gmra.mrb[62].mxu0 %vm68_vm1, %v4932_v32 }
0x8117   :  { %7840 = vmatpush3.bf16.msra.mxu0 %v8598_v8  ;;  %7552 = vmatprep.mubr.msk.f32.mxu0 %vm8522_vm0, %v8523_v2 }
0x8118   :  { %7844 = vmatprep.subr.bf16.mxu0 %v8521_v1 }
0x81e9   :  { %v5003_v33 = vpop.f32.mrb[62].mxu0 }
0x81ea   :  { %v5007_v34 = vadd.f32 %v5003_v33, %v8619_v13  ;;  %v7540_v35 = vpop.f32.mrb[63].mxu0 }
0x81ec   :  { %8305 = vtanh.f32 %v5007_v34  ;;  %v6935_v37 = vmul.f32 -1.442695, %v5007_v34 }
0x81ee   :  { %8307 = vpow2.f32 %v6935_v37 }
0x81f6   :  { %v8306_v36 = vpop.eup %8305 }
0x81f7   :  { %5017 = vrot.lane.b32.xlu0 %v8306_v36, %s8524_s25 }
0x81f8   :  { %v8308_v38 = vpop.eup %8307 }
0x81f9   :  { %v5011_v39 = vadd.f32 1.0, %v8308_v38 }
0x81fb   :  { %8309 = vrcp.f32 %v5011_v39 }
0x8205   :  { %v8310_v40 = vpop.eup %8309 }
0x8206   :  { %v5015_v43 = vmul.f32 %v8310_v40, %v4923_v28 }
0x8269   :  { %v5018_v41 = vpop.permute.xlu0 %5017 }
0x826a   :  { %v5020_v42 = vmul.f32 %v8310_v40, %v5018_v41 }
0x826c   :  { %5022 = vrot.lane.b32.xlu1 %v5020_v42, %s8525_s3 }
0x82de   :  { %v5023_v44 = vpop.permute.xlu1 %5022 }
0x82df   :  { %v5025_v45 = vadd.f32 %v5023_v44, %v5015_v43 }
0x82e1   :  { %8311 = vtanh.f32 %v5025_v45 }
0x82eb   :  { %v8312_v46 = vpop.eup %8311 }
0x82ec   :  { %5028 = vrot.lane.b32.xlu0 %v8312_v46, %s8526_s26 }
0x835e   :  { %v5029_v47 = vpop.permute.xlu0 %5028 }
0x835f   :  { %v5031_v48 = vmul.f32 %v8310_v40, %v5029_v47 }
0x8361   :  { %5033 = vrot.lane.b32.xlu1 %v5031_v48, %s8527_s27 }
0x83d3   :  { %v5034_v49 = vpop.permute.xlu1 %5033 }
0x83d4   :  { %5036 = vst.msk [vmem:[#allocation2 + $0x5e] sm:$0x3] %vm241_vm2, %v5034_v49  ;;  %7546 = vmatmul.mubr.msk.f32.vlgmr.msra.gmra.mrb[34].mxu1 %vm68_vm1, %v5034_v49 }
0x83d5   :  { %7843 = vmatpush3.bf16.msra.mxu1 %v8598_v8  ;;  %7559 = vmatprep.mubr.msk.f32.mxu1 %vm8522_vm0, %v8523_v2 }
0x83d6   :  { %7847 = vmatprep.subr.bf16.mxu1 %v8521_v1 }
0x84a7   :  { %v5105_v50 = vpop.f32.mrb[34].mxu1 }
0x84a8   :  { %v5109_v51 = vadd.f32 %v5105_v50, %v8619_v13  ;;  %v7547_v52 = vpop.f32.mrb[35].mxu1 }
0x84aa   :  { %8313 = vtanh.f32 %v5109_v51  ;;  %v6937_v54 = vmul.f32 -1.442695, %v5109_v51 }
0x84ac   :  { %8315 = vpow2.f32 %v6937_v54 }
0x84b4   :  { %v8314_v53 = vpop.eup %8313 }
0x84b5   :  { %5119 = vrot.lane.b32.xlu0 %v8314_v53, %s8524_s25 }
0x84b6   :  { %v8316_v55 = vpop.eup %8315 }
0x84b7   :  { %v5113_v56 = vadd.f32 1.0, %v8316_v55 }
0x84b9   :  { %8317 = vrcp.f32 %v5113_v56 }
0x84c3   :  { %v8318_v57 = vpop.eup %8317 }
0x84c4   :  { %v5117_v60 = vmul.f32 %v8318_v57, %v5025_v45 }
0x8527   :  { %v5120_v58 = vpop.permute.xlu0 %5119 }
0x8528   :  { %v5122_v59 = vmul.f32 %v8318_v57, %v5120_v58 }
0x852a   :  { %5124 = vrot.lane.b32.xlu1 %v5122_v59, %s8525_s3 }
0x859c   :  { %v5125_v61 = vpop.permute.xlu1 %5124 }
0x859d   :  { %v5127_v62 = vadd.f32 %v5125_v61, %v5117_v60 }
0x859f   :  { %8319 = vtanh.f32 %v5127_v62 }
0x85a9   :  { %v8320_v63 = vpop.eup %8319 }
0x85aa   :  { %5130 = vrot.lane.b32.xlu0 %v8320_v63, %s8526_s26 }
0x861c   :  { %v5131_v0 = vpop.permute.xlu0 %5130 }
0x861d   :  { %v5133_v3 = vmul.f32 %v8318_v57, %v5131_v0 }
0x861f   :  { %5135 = vrot.lane.b32.xlu1 %v5133_v3, %s8527_s27 }
0x8691   :  { %v5136_v4 = vpop.permute.xlu1 %5135 }
0x8692   :  { %5138 = vst.msk [vmem:[#allocation2 + $0x60] sm:$0x3] %vm241_vm2, %v5136_v4  ;;  %7553 = vmatmul.mubr.msk.f32.vlgmr.msra.gmra.mrb[64].mxu0 %vm68_vm1, %v5136_v4 }
0x8693   :  { %7846 = vmatpush3.bf16.msra.mxu0 %v8598_v8  ;;  %7566 = vmatprep.mubr.msk.f32.mxu0 %vm8522_vm0, %v8523_v2 }
0x8694   :  { %7850 = vmatprep.subr.bf16.mxu0 %v8521_v1 }
0x8765   :  { %v5207_v5 = vpop.f32.mrb[64].mxu0 }
0x8766   :  { %v5211_v6 = vadd.f32 %v5207_v5, %v8619_v13  ;;  %v7554_v7 = vpop.f32.mrb[65].mxu0 }
0x8768   :  { %8321 = vtanh.f32 %v5211_v6  ;;  %v6939_v10 = vmul.f32 -1.442695, %v5211_v6 }
0x876a   :  { %8323 = vpow2.f32 %v6939_v10 }
0x8772   :  { %v8322_v9 = vpop.eup %8321 }
0x8773   :  { %5221 = vrot.lane.b32.xlu0 %v8322_v9, %s8524_s25 }
0x8774   :  { %v8324_v11 = vpop.eup %8323 }
0x8775   :  { %v5215_v12 = vadd.f32 1.0, %v8324_v11 }
0x8777   :  { %8325 = vrcp.f32 %v5215_v12 }
0x8781   :  { %v8326_v14 = vpop.eup %8325 }
0x8782   :  { %v5219_v17 = vmul.f32 %v8326_v14, %v5127_v62 }
0x87e5   :  { %v5222_v15 = vpop.permute.xlu0 %5221 }
0x87e6   :  { %v5224_v16 = vmul.f32 %v8326_v14, %v5222_v15 }
0x87e8   :  { %5226 = vrot.lane.b32.xlu1 %v5224_v16, %s8525_s3 }
0x885a   :  { %v5227_v18 = vpop.permute.xlu1 %5226 }
0x885b   :  { %v5229_v19 = vadd.f32 %v5227_v18, %v5219_v17 }
0x885d   :  { %8327 = vtanh.f32 %v5229_v19 }
0x8867   :  { %v8328_v20 = vpop.eup %8327 }
0x8868   :  { %5232 = vrot.lane.b32.xlu0 %v8328_v20, %s8526_s26 }
0x88da   :  { %v5233_v21 = vpop.permute.xlu0 %5232 }
0x88db   :  { %v5235_v22 = vmul.f32 %v8326_v14, %v5233_v21 }
0x88dd   :  { %5237 = vrot.lane.b32.xlu1 %v5235_v22, %s8527_s27 }
0x894f   :  { %v5238_v23 = vpop.permute.xlu1 %5237 }
0x8950   :  { %5240 = vst.msk [vmem:[#allocation2 + $0x62] sm:$0x3] %vm241_vm2, %v5238_v23  ;;  %7560 = vmatmul.mubr.msk.f32.vlgmr.msra.gmra.mrb[36].mxu1 %vm68_vm1, %v5238_v23 }
0x8951   :  { %7849 = vmatpush3.bf16.msra.mxu1 %v8598_v8  ;;  %7573 = vmatprep.mubr.msk.f32.mxu1 %vm8522_vm0, %v8523_v2 }
0x8952   :  { %7853 = vmatprep.subr.bf16.mxu1 %v8521_v1 }
0x8a23   :  { %v5309_v24 = vpop.f32.mrb[36].mxu1 }
0x8a24   :  { %v5313_v25 = vadd.f32 %v5309_v24, %v8619_v13  ;;  %v7561_v26 = vpop.f32.mrb[37].mxu1 }
0x8a26   :  { %8329 = vtanh.f32 %v5313_v25  ;;  %v6941_v28 = vmul.f32 -1.442695, %v5313_v25 }
0x8a28   :  { %8331 = vpow2.f32 %v6941_v28 }
0x8a30   :  { %v8330_v27 = vpop.eup %8329 }
0x8a31   :  { %5323 = vrot.lane.b32.xlu0 %v8330_v27, %s8524_s25 }
0x8a32   :  { %v8332_v29 = vpop.eup %8331 }
0x8a33   :  { %v5317_v30 = vadd.f32 1.0, %v8332_v29 }
0x8a35   :  { %8333 = vrcp.f32 %v5317_v30 }
0x8a3f   :  { %v8334_v31 = vpop.eup %8333 }
0x8a40   :  { %v5321_v34 = vmul.f32 %v8334_v31, %v5229_v19 }
0x8aa3   :  { %v5324_v32 = vpop.permute.xlu0 %5323 }
0x8aa4   :  { %v5326_v33 = vmul.f32 %v8334_v31, %v5324_v32 }
0x8aa6   :  { %5328 = vrot.lane.b32.xlu1 %v5326_v33, %s8525_s3 }
0x8b18   :  { %v5329_v35 = vpop.permute.xlu1 %5328 }
0x8b19   :  { %v5331_v36 = vadd.f32 %v5329_v35, %v5321_v34 }
0x8b1b   :  { %8335 = vtanh.f32 %v5331_v36 }
0x8b25   :  { %v8336_v37 = vpop.eup %8335 }
0x8b26   :  { %5334 = vrot.lane.b32.xlu0 %v8336_v37, %s8526_s26 }
0x8b98   :  { %v5335_v38 = vpop.permute.xlu0 %5334 }
0x8b99   :  { %v5337_v39 = vmul.f32 %v8334_v31, %v5335_v38 }
0x8b9b   :  { %5339 = vrot.lane.b32.xlu1 %v5337_v39, %s8527_s27 }
0x8c0d   :  { %v5340_v40 = vpop.permute.xlu1 %5339 }
0x8c0e   :  { %5342 = vst.msk [vmem:[#allocation2 + $0x64] sm:$0x3] %vm241_vm2, %v5340_v40  ;;  %7567 = vmatmul.mubr.msk.f32.vlgmr.msra.gmra.mrb[66].mxu0 %vm68_vm1, %v5340_v40 }
0x8c0f   :  { %7852 = vmatpush3.bf16.msra.mxu0 %v8598_v8  ;;  %7580 = vmatprep.mubr.msk.f32.mxu0 %vm8522_vm0, %v8523_v2 }
0x8c10   :  { %7856 = vmatprep.subr.bf16.mxu0 %v8521_v1 }
0x8ce1   :  { %v5411_v41 = vpop.f32.mrb[66].mxu0 }
0x8ce2   :  { %v5415_v42 = vadd.f32 %v5411_v41, %v8619_v13  ;;  %v7568_v43 = vpop.f32.mrb[67].mxu0 }
0x8ce4   :  { %8337 = vtanh.f32 %v5415_v42  ;;  %v6943_v45 = vmul.f32 -1.442695, %v5415_v42 }
0x8ce6   :  { %8339 = vpow2.f32 %v6943_v45 }
0x8cee   :  { %v8338_v44 = vpop.eup %8337 }
0x8cef   :  { %5425 = vrot.lane.b32.xlu0 %v8338_v44, %s8524_s25 }
0x8cf0   :  { %v8340_v46 = vpop.eup %8339 }
0x8cf1   :  { %v5419_v47 = vadd.f32 1.0, %v8340_v46 }
0x8cf3   :  { %8341 = vrcp.f32 %v5419_v47 }
0x8cfd   :  { %v8342_v48 = vpop.eup %8341 }
0x8cfe   :  { %v5423_v51 = vmul.f32 %v8342_v48, %v5331_v36 }
0x8d61   :  { %v5426_v49 = vpop.permute.xlu0 %5425 }
0x8d62   :  { %v5428_v50 = vmul.f32 %v8342_v48, %v5426_v49 }
0x8d64   :  { %5430 = vrot.lane.b32.xlu1 %v5428_v50, %s8525_s3 }
0x8dd6   :  { %v5431_v52 = vpop.permute.xlu1 %5430 }
0x8dd7   :  { %v5433_v53 = vadd.f32 %v5431_v52, %v5423_v51 }
0x8dd9   :  { %8343 = vtanh.f32 %v5433_v53 }
0x8de3   :  { %v8344_v54 = vpop.eup %8343 }
0x8de4   :  { %5436 = vrot.lane.b32.xlu0 %v8344_v54, %s8526_s26 }
0x8e56   :  { %v5437_v55 = vpop.permute.xlu0 %5436 }
0x8e57   :  { %v5439_v56 = vmul.f32 %v8342_v48, %v5437_v55 }
0x8e59   :  { %5441 = vrot.lane.b32.xlu1 %v5439_v56, %s8527_s27 }
0x8ecb   :  { %v5442_v57 = vpop.permute.xlu1 %5441 }
0x8ecc   :  { %5444 = vst.msk [vmem:[#allocation2 + $0x66] sm:$0x3] %vm241_vm2, %v5442_v57  ;;  %7574 = vmatmul.mubr.msk.f32.vlgmr.msra.gmra.mrb[38].mxu1 %vm68_vm1, %v5442_v57 }
0x8ecd   :  { %7855 = vmatpush3.bf16.msra.mxu1 %v8598_v8  ;;  %7587 = vmatprep.mubr.msk.f32.mxu1 %vm8522_vm0, %v8523_v2 }
0x8ece   :  { %7859 = vmatprep.subr.bf16.mxu1 %v8521_v1 }
0x8f9f   :  { %v5513_v58 = vpop.f32.mrb[38].mxu1 }
0x8fa0   :  { %v5517_v59 = vadd.f32 %v5513_v58, %v8619_v13  ;;  %v7575_v60 = vpop.f32.mrb[39].mxu1 }
0x8fa2   :  { %8345 = vtanh.f32 %v5517_v59  ;;  %v6945_v62 = vmul.f32 -1.442695, %v5517_v59 }
0x8fa4   :  { %8347 = vpow2.f32 %v6945_v62 }
0x8fac   :  { %v8346_v61 = vpop.eup %8345 }
0x8fad   :  { %5527 = vrot.lane.b32.xlu0 %v8346_v61, %s8524_s25 }
0x8fae   :  { %v8348_v63 = vpop.eup %8347 }
0x8faf   :  { %v5521_v0 = vadd.f32 1.0, %v8348_v63 }
0x8fb1   :  { %8349 = vrcp.f32 %v5521_v0 }
0x8fbb   :  { %v8350_v3 = vpop.eup %8349 }
0x8fbc   :  { %v5525_v6 = vmul.f32 %v8350_v3, %v5433_v53 }
0x901f   :  { %v5528_v4 = vpop.permute.xlu0 %5527 }
0x9020   :  { %v5530_v5 = vmul.f32 %v8350_v3, %v5528_v4 }
0x9022   :  { %5532 = vrot.lane.b32.xlu1 %v5530_v5, %s8525_s3 }
0x9094   :  { %v5533_v7 = vpop.permute.xlu1 %5532 }
0x9095   :  { %v5535_v9 = vadd.f32 %v5533_v7, %v5525_v6 }
0x9097   :  { %8351 = vtanh.f32 %v5535_v9 }
0x90a1   :  { %v8352_v10 = vpop.eup %8351 }
0x90a2   :  { %5538 = vrot.lane.b32.xlu0 %v8352_v10, %s8526_s26 }
0x9114   :  { %v5539_v11 = vpop.permute.xlu0 %5538 }
0x9115   :  { %v5541_v12 = vmul.f32 %v8350_v3, %v5539_v11 }
0x9117   :  { %5543 = vrot.lane.b32.xlu1 %v5541_v12, %s8527_s27 }
0x9189   :  { %v5544_v14 = vpop.permute.xlu1 %5543 }
0x918a   :  { %5546 = vst.msk [vmem:[#allocation2 + $0x68] sm:$0x3] %vm241_vm2, %v5544_v14  ;;  %7581 = vmatmul.mubr.msk.f32.vlgmr.msra.gmra.mrb[68].mxu0 %vm68_vm1, %v5544_v14 }
0x918b   :  { %7858 = vmatpush3.bf16.msra.mxu0 %v8598_v8  ;;  %7594 = vmatprep.mubr.msk.f32.mxu0 %vm8522_vm0, %v8523_v2 }
0x918c   :  { %7862 = vmatprep.subr.bf16.mxu0 %v8521_v1 }
0x925d   :  { %v5615_v15 = vpop.f32.mrb[68].mxu0 }
0x925e   :  { %v5619_v16 = vadd.f32 %v5615_v15, %v8619_v13  ;;  %v7582_v17 = vpop.f32.mrb[69].mxu0 }
0x9260   :  { %8353 = vtanh.f32 %v5619_v16  ;;  %v6947_v19 = vmul.f32 -1.442695, %v5619_v16 }
0x9262   :  { %8355 = vpow2.f32 %v6947_v19 }
0x926a   :  { %v8354_v18 = vpop.eup %8353 }
0x926b   :  { %5629 = vrot.lane.b32.xlu0 %v8354_v18, %s8524_s25 }
0x926c   :  { %v8356_v20 = vpop.eup %8355 }
0x926d   :  { %v5623_v21 = vadd.f32 1.0, %v8356_v20 }
0x926f   :  { %8357 = vrcp.f32 %v5623_v21 }
0x9279   :  { %v8358_v22 = vpop.eup %8357 }
0x927a   :  { %v5627_v25 = vmul.f32 %v8358_v22, %v5535_v9 }
0x92dd   :  { %v5630_v23 = vpop.permute.xlu0 %5629 }
0x92de   :  { %v5632_v24 = vmul.f32 %v8358_v22, %v5630_v23 }
0x92e0   :  { %5634 = vrot.lane.b32.xlu1 %v5632_v24, %s8525_s3 }
0x9352   :  { %v5635_v26 = vpop.permute.xlu1 %5634 }
0x9353   :  { %v5637_v27 = vadd.f32 %v5635_v26, %v5627_v25 }
0x9355   :  { %8359 = vtanh.f32 %v5637_v27 }
0x935f   :  { %v8360_v28 = vpop.eup %8359 }
0x9360   :  { %5640 = vrot.lane.b32.xlu0 %v8360_v28, %s8526_s26 }
0x93d2   :  { %v5641_v29 = vpop.permute.xlu0 %5640 }
0x93d3   :  { %v5643_v30 = vmul.f32 %v8358_v22, %v5641_v29 }
0x93d5   :  { %5645 = vrot.lane.b32.xlu1 %v5643_v30, %s8527_s27 }
0x9447   :  { %v5646_v31 = vpop.permute.xlu1 %5645 }
0x9448   :  { %5648 = vst.msk [vmem:[#allocation2 + $0x6a] sm:$0x3] %vm241_vm2, %v5646_v31  ;;  %7588 = vmatmul.mubr.msk.f32.vlgmr.msra.gmra.mrb[40].mxu1 %vm68_vm1, %v5646_v31 }
0x9449   :  { %7861 = vmatpush3.bf16.msra.mxu1 %v8598_v8  ;;  %7601 = vmatprep.mubr.msk.f32.mxu1 %vm8522_vm0, %v8523_v2 }
0x944a   :  { %7865 = vmatprep.subr.bf16.mxu1 %v8521_v1 }
0x951b   :  { %v5717_v32 = vpop.f32.mrb[40].mxu1 }
0x951c   :  { %v5721_v33 = vadd.f32 %v5717_v32, %v8619_v13  ;;  %v7589_v34 = vpop.f32.mrb[41].mxu1 }
0x951e   :  { %8361 = vtanh.f32 %v5721_v33  ;;  %v6949_v36 = vmul.f32 -1.442695, %v5721_v33 }
0x9520   :  { %8363 = vpow2.f32 %v6949_v36 }
0x9528   :  { %v8362_v35 = vpop.eup %8361 }
0x9529   :  { %5731 = vrot.lane.b32.xlu0 %v8362_v35, %s8524_s25 }
0x952a   :  { %v8364_v37 = vpop.eup %8363 }
0x952b   :  { %v5725_v38 = vadd.f32 1.0, %v8364_v37 }
0x952d   :  { %8365 = vrcp.f32 %v5725_v38 }
0x9537   :  { %v8366_v39 = vpop.eup %8365 }
0x9538   :  { %v5729_v42 = vmul.f32 %v8366_v39, %v5637_v27 }
0x959b   :  { %v5732_v40 = vpop.permute.xlu0 %5731 }
0x959c   :  { %v5734_v41 = vmul.f32 %v8366_v39, %v5732_v40 }
0x959e   :  { %5736 = vrot.lane.b32.xlu1 %v5734_v41, %s8525_s3 }
0x9610   :  { %v5737_v43 = vpop.permute.xlu1 %5736 }
0x9611   :  { %v5739_v44 = vadd.f32 %v5737_v43, %v5729_v42 }
0x9613   :  { %8367 = vtanh.f32 %v5739_v44 }
0x961d   :  { %v8368_v45 = vpop.eup %8367 }
0x961e   :  { %5742 = vrot.lane.b32.xlu0 %v8368_v45, %s8526_s26 }
0x9690   :  { %v5743_v46 = vpop.permute.xlu0 %5742 }
0x9691   :  { %v5745_v47 = vmul.f32 %v8366_v39, %v5743_v46 }
0x9693   :  { %5747 = vrot.lane.b32.xlu1 %v5745_v47, %s8527_s27 }
0x9705   :  { %v5748_v48 = vpop.permute.xlu1 %5747 }
0x9706   :  { %5750 = vst.msk [vmem:[#allocation2 + $0x6c] sm:$0x3] %vm241_vm2, %v5748_v48  ;;  %7595 = vmatmul.mubr.msk.f32.vlgmr.msra.gmra.mrb[70].mxu0 %vm68_vm1, %v5748_v48 }
0x9707   :  { %7864 = vmatpush3.bf16.msra.mxu0 %v8598_v8  ;;  %7608 = vmatprep.mubr.msk.f32.mxu0 %vm8522_vm0, %v8523_v2 }
0x9708   :  { %7868 = vmatprep.subr.bf16.mxu0 %v8521_v1 }
0x97d9   :  { %v5819_v49 = vpop.f32.mrb[70].mxu0 }
0x97da   :  { %v5823_v50 = vadd.f32 %v5819_v49, %v8619_v13  ;;  %v7596_v51 = vpop.f32.mrb[71].mxu0 }
0x97dc   :  { %8369 = vtanh.f32 %v5823_v50  ;;  %v6951_v53 = vmul.f32 -1.442695, %v5823_v50 }
0x97de   :  { %8371 = vpow2.f32 %v6951_v53 }
0x97e6   :  { %v8370_v52 = vpop.eup %8369 }
0x97e7   :  { %5833 = vrot.lane.b32.xlu0 %v8370_v52, %s8524_s25 }
0x97e8   :  { %v8372_v54 = vpop.eup %8371 }
0x97e9   :  { %v5827_v55 = vadd.f32 1.0, %v8372_v54 }
0x97eb   :  { %8373 = vrcp.f32 %v5827_v55 }
0x97f5   :  { %v8374_v56 = vpop.eup %8373 }
0x97f6   :  { %v5831_v59 = vmul.f32 %v8374_v56, %v5739_v44 }
0x9859   :  { %v5834_v57 = vpop.permute.xlu0 %5833 }
0x985a   :  { %v5836_v58 = vmul.f32 %v8374_v56, %v5834_v57 }
0x985c   :  { %5838 = vrot.lane.b32.xlu1 %v5836_v58, %s8525_s3 }
0x98ce   :  { %v5839_v60 = vpop.permute.xlu1 %5838 }
0x98cf   :  { %v5841_v61 = vadd.f32 %v5839_v60, %v5831_v59 }
0x98d1   :  { %8375 = vtanh.f32 %v5841_v61 }
0x98db   :  { %v8376_v62 = vpop.eup %8375 }
0x98dc   :  { %5844 = vrot.lane.b32.xlu0 %v8376_v62, %s8526_s26 }
0x994e   :  { %v5845_v63 = vpop.permute.xlu0 %5844 }
0x994f   :  { %v5847_v0 = vmul.f32 %v8374_v56, %v5845_v63 }
0x9951   :  { %5849 = vrot.lane.b32.xlu1 %v5847_v0, %s8527_s27 }
0x99c3   :  { %v5850_v3 = vpop.permute.xlu1 %5849 }
0x99c4   :  { %5852 = vst.msk [vmem:[#allocation2 + $0x6e] sm:$0x3] %vm241_vm2, %v5850_v3  ;;  %7602 = vmatmul.mubr.msk.f32.vlgmr.msra.gmra.mrb[42].mxu1 %vm68_vm1, %v5850_v3 }
0x99c5   :  { %7867 = vmatpush3.bf16.msra.mxu1 %v8598_v8  ;;  %7615 = vmatprep.mubr.msk.f32.mxu1 %vm8522_vm0, %v8523_v2 }
0x99c6   :  { %7871 = vmatprep.subr.bf16.mxu1 %v8521_v1 }
0x9a97   :  { %v5921_v4 = vpop.f32.mrb[42].mxu1 }
0x9a98   :  { %v5925_v5 = vadd.f32 %v5921_v4, %v8619_v13  ;;  %v7603_v6 = vpop.f32.mrb[43].mxu1 }
0x9a9a   :  { %8377 = vtanh.f32 %v5925_v5  ;;  %v6953_v9 = vmul.f32 -1.442695, %v5925_v5 }
0x9a9c   :  { %8379 = vpow2.f32 %v6953_v9 }
0x9aa4   :  { %v8378_v7 = vpop.eup %8377 }
0x9aa5   :  { %5935 = vrot.lane.b32.xlu0 %v8378_v7, %s8524_s25 }
0x9aa6   :  { %v8380_v10 = vpop.eup %8379 }
0x9aa7   :  { %v5929_v11 = vadd.f32 1.0, %v8380_v10 }
0x9aa9   :  { %8381 = vrcp.f32 %v5929_v11 }
0x9ab3   :  { %v8382_v12 = vpop.eup %8381 }
0x9ab4   :  { %v5933_v16 = vmul.f32 %v8382_v12, %v5841_v61 }
0x9b17   :  { %v5936_v14 = vpop.permute.xlu0 %5935 }
0x9b18   :  { %v5938_v15 = vmul.f32 %v8382_v12, %v5936_v14 }
0x9b1a   :  { %5940 = vrot.lane.b32.xlu1 %v5938_v15, %s8525_s3 }
0x9b8c   :  { %v5941_v17 = vpop.permute.xlu1 %5940 }
0x9b8d   :  { %v5943_v18 = vadd.f32 %v5941_v17, %v5933_v16 }
0x9b8f   :  { %8383 = vtanh.f32 %v5943_v18 }
0x9b99   :  { %v8384_v19 = vpop.eup %8383 }
0x9b9a   :  { %5946 = vrot.lane.b32.xlu0 %v8384_v19, %s8526_s26 }
0x9c0c   :  { %v5947_v20 = vpop.permute.xlu0 %5946 }
0x9c0d   :  { %v5949_v21 = vmul.f32 %v8382_v12, %v5947_v20 }
0x9c0f   :  { %5951 = vrot.lane.b32.xlu1 %v5949_v21, %s8527_s27 }
0x9c81   :  { %v5952_v22 = vpop.permute.xlu1 %5951 }
0x9c82   :  { %5954 = vst.msk [vmem:[#allocation2 + $0x70] sm:$0x3] %vm241_vm2, %v5952_v22  ;;  %7609 = vmatmul.mubr.msk.f32.vlgmr.msra.gmra.mrb[72].mxu0 %vm68_vm1, %v5952_v22 }
0x9c83   :  { %7870 = vmatpush3.bf16.msra.mxu0 %v8598_v8  ;;  %7622 = vmatprep.mubr.msk.f32.mxu0 %vm8522_vm0, %v8523_v2 }
0x9c84   :  { %7874 = vmatprep.subr.bf16.mxu0 %v8521_v1 }
0x9d55   :  { %v6023_v23 = vpop.f32.mrb[72].mxu0 }
0x9d56   :  { %v6027_v24 = vadd.f32 %v6023_v23, %v8619_v13  ;;  %v7610_v25 = vpop.f32.mrb[73].mxu0 }
0x9d58   :  { %8385 = vtanh.f32 %v6027_v24  ;;  %v6955_v27 = vmul.f32 -1.442695, %v6027_v24 }
0x9d5a   :  { %8387 = vpow2.f32 %v6955_v27 }
0x9d62   :  { %v8386_v26 = vpop.eup %8385 }
0x9d63   :  { %6037 = vrot.lane.b32.xlu0 %v8386_v26, %s8524_s25 }
0x9d64   :  { %v8388_v28 = vpop.eup %8387 }
0x9d65   :  { %v6031_v29 = vadd.f32 1.0, %v8388_v28 }
0x9d67   :  { %8389 = vrcp.f32 %v6031_v29 }
0x9d71   :  { %v8390_v30 = vpop.eup %8389 }
0x9d72   :  { %v6035_v33 = vmul.f32 %v8390_v30, %v5943_v18 }
0x9dd5   :  { %v6038_v31 = vpop.permute.xlu0 %6037 }
0x9dd6   :  { %v6040_v32 = vmul.f32 %v8390_v30, %v6038_v31 }
0x9dd8   :  { %6042 = vrot.lane.b32.xlu1 %v6040_v32, %s8525_s3 }
0x9e4a   :  { %v6043_v34 = vpop.permute.xlu1 %6042 }
0x9e4b   :  { %v6045_v35 = vadd.f32 %v6043_v34, %v6035_v33 }
0x9e4d   :  { %8391 = vtanh.f32 %v6045_v35 }
0x9e57   :  { %v8392_v36 = vpop.eup %8391 }
0x9e58   :  { %6048 = vrot.lane.b32.xlu0 %v8392_v36, %s8526_s26 }
0x9eca   :  { %v6049_v37 = vpop.permute.xlu0 %6048 }
0x9ecb   :  { %v6051_v38 = vmul.f32 %v8390_v30, %v6049_v37 }
0x9ecd   :  { %6053 = vrot.lane.b32.xlu1 %v6051_v38, %s8527_s27 }
0x9f3f   :  { %v6054_v39 = vpop.permute.xlu1 %6053 }
0x9f40   :  { %6056 = vst.msk [vmem:[#allocation2 + $0x72] sm:$0x3] %vm241_vm2, %v6054_v39  ;;  %7616 = vmatmul.mubr.msk.f32.vlgmr.msra.gmra.mrb[44].mxu1 %vm68_vm1, %v6054_v39 }
0x9f41   :  { %7873 = vmatpush3.bf16.msra.mxu1 %v8598_v8  ;;  %7629 = vmatprep.mubr.msk.f32.mxu1 %vm8522_vm0, %v8523_v2 }
0x9f42   :  { %7877 = vmatprep.subr.bf16.mxu1 %v8521_v1 }
0xa013   :  { %v6125_v40 = vpop.f32.mrb[44].mxu1 }
0xa014   :  { %v6129_v41 = vadd.f32 %v6125_v40, %v8619_v13  ;;  %v7617_v42 = vpop.f32.mrb[45].mxu1 }
0xa016   :  { %8393 = vtanh.f32 %v6129_v41  ;;  %v6957_v44 = vmul.f32 -1.442695, %v6129_v41 }
0xa018   :  { %8395 = vpow2.f32 %v6957_v44 }
0xa020   :  { %v8394_v43 = vpop.eup %8393 }
0xa021   :  { %6139 = vrot.lane.b32.xlu0 %v8394_v43, %s8524_s25 }
0xa022   :  { %v8396_v45 = vpop.eup %8395 }
0xa023   :  { %v6133_v46 = vadd.f32 1.0, %v8396_v45 }
0xa025   :  { %8397 = vrcp.f32 %v6133_v46  ;;  %v6670_v46 = vld [vmem:[#allocation2 + $0x8] sm:$0xff] }
0xa02f   :  { %v8398_v47 = vpop.eup %8397 }
0xa030   :  { %v6137_v50 = vmul.f32 %v8398_v47, %v6045_v35 }
0xa093   :  { %v6140_v48 = vpop.permute.xlu0 %6139 }
0xa094   :  { %v6142_v49 = vmul.f32 %v8398_v47, %v6140_v48 }
0xa096   :  { %6144 = vrot.lane.b32.xlu1 %v6142_v49, %s8525_s3 }
0xa108   :  { %v6145_v51 = vpop.permute.xlu1 %6144 }
0xa109   :  { %v6147_v52 = vadd.f32 %v6145_v51, %v6137_v50  ;;  %v6672_v51 = vld [vmem:[#allocation2 + $0x18] sm:$0xff] }
0xa10b   :  { %8399 = vtanh.f32 %v6147_v52 }
0xa115   :  { %v8400_v53 = vpop.eup %8399 }
0xa116   :  { %6150 = vrot.lane.b32.xlu0 %v8400_v53, %s8526_s26 }
0xa188   :  { %v6151_v54 = vpop.permute.xlu0 %6150 }
0xa189   :  { %v6153_v55 = vmul.f32 %v8398_v47, %v6151_v54  ;;  %v6669_v47 = vld [vmem:[#allocation2] sm:$0xff]  ;;  %v6674_v54 = vld [vmem:[#allocation2 + $0x28] sm:$0xff] }
0xa18a   :  { %v7884_v50 = vpack.c.bf16 %v6670_v46, %v6669_v47 }
0xa18b   :  { %6155 = vrot.lane.b32.xlu1 %v6153_v55, %s8527_s27  ;;  %v6673_v55 = vld [vmem:[#allocation2 + $0x20] sm:$0xff] }
0xa1fd   :  { %v6156_v56 = vpop.permute.xlu1 %6155 }
0xa1fe   :  { %6158 = vst.msk [vmem:[#allocation2 + $0x74] sm:$0x3] %vm241_vm2, %v6156_v56  ;;  %7623 = vmatmul.mubr.msk.f32.vlgmr.msra.gmra.mrb[74].mxu0 %vm68_vm1, %v6156_v56  ;;  %v7892_v56 = vpack.c.bf16 %v6674_v54, %v6673_v55 }
0xa1ff   :  { %7876 = vmatpush3.bf16.msra.mxu0 %v8598_v8  ;;  %7636 = vmatprep.mubr.msk.f32.mxu0 %vm8522_vm0, %v8523_v2 }
0xa200   :  { %7880 = vmatprep.subr.bf16.mxu0 %v8521_v1 }
0xa2d1   :  { %v6227_v57 = vpop.f32.mrb[74].mxu0 }
0xa2d2   :  { %v6231_v58 = vadd.f32 %v6227_v57, %v8619_v13  ;;  %v7624_v59 = vpop.f32.mrb[75].mxu0  ;;  %v6676_v57 = vld [vmem:[#allocation2 + $0x38] sm:$0xff] }
0xa2d3   :  { %v6678_v59 = vld [vmem:[#allocation2 + $0x48] sm:$0xff] }
0xa2d4   :  { %8401 = vtanh.f32 %v6231_v58  ;;  %v6959_v61 = vmul.f32 -1.442695, %v6231_v58 }
0xa2d6   :  { %8403 = vpow2.f32 %v6959_v61 }
0xa2de   :  { %v8402_v60 = vpop.eup %8401 }
0xa2df   :  { %6241 = vrot.lane.b32.xlu0 %v8402_v60, %s8524_s25  ;;  %v6677_v60 = vld [vmem:[#allocation2 + $0x40] sm:$0xff] }
0xa2e0   :  { %v8404_v62 = vpop.eup %8403  ;;  %v7900_v61 = vpack.c.bf16 %v6678_v59, %v6677_v60 }
0xa2e1   :  { %v6235_v63 = vadd.f32 1.0, %v8404_v62  ;;  %v6680_v62 = vld [vmem:[#allocation2 + $0x58] sm:$0xff] }
0xa2e3   :  { %8405 = vrcp.f32 %v6235_v63  ;;  %v6679_v63 = vld [vmem:[#allocation2 + $0x50] sm:$0xff] }
0xa2ed   :  { %v8406_v0 = vpop.eup %8405 }
0xa2ee   :  { %v6239_v5 = vmul.f32 %v8406_v0, %v6147_v52  ;;  %v6671_v52 = vld [vmem:[#allocation2 + $0x10] sm:$0xff] }
0xa2ef   :  { %v7888_v53 = vpack.c.bf16 %v6672_v51, %v6671_v52 }
0xa351   :  { %v6242_v3 = vpop.permute.xlu0 %6241 }
0xa352   :  { %v6244_v4 = vmul.f32 %v8406_v0, %v6242_v3  ;;  %v6682_v3 = vld [vmem:[#allocation2 + $0x68] sm:$0xff] }
0xa354   :  { %6246 = vrot.lane.b32.xlu1 %v6244_v4, %s8525_s3  ;;  %v6681_v4 = vld [vmem:[#allocation2 + $0x60] sm:$0xff] }
0xa3c6   :  { %v6247_v6 = vpop.permute.xlu1 %6246 }
0xa3c7   :  { %v6249_v7 = vadd.f32 %v6247_v6, %v6239_v5  ;;  %v7908_v5 = vpack.c.bf16 %v6682_v3, %v6681_v4 }
0xa3c9   :  { %8407 = vtanh.f32 %v6249_v7 }
0xa3d3   :  { %v8408_v9 = vpop.eup %8407 }
0xa3d4   :  { %6252 = vrot.lane.b32.xlu0 %v8408_v9, %s8526_s26 }
0xa446   :  { %v6253_v10 = vpop.permute.xlu0 %6252 }
0xa447   :  { %v6255_v11 = vmul.f32 %v8406_v0, %v6253_v10  ;;  %v7904_v0 = vpack.c.bf16 %v6680_v62, %v6679_v63 }
0xa449   :  { %6257 = vrot.lane.b32.xlu1 %v6255_v11, %s8527_s27 }
0xa4bb   :  { %v6258_v12 = vpop.permute.xlu1 %6257 }
0xa4bc   :  { %6260 = vst.msk [vmem:[#allocation2 + $0x76] sm:$0x3] %vm241_vm2, %v6258_v12  ;;  %7630 = vmatmul.mubr.msk.f32.vlgmr.msra.gmra.mrb[46].mxu1 %vm68_vm1, %v6258_v12 }
0xa4bd   :  { %7879 = vmatpush3.bf16.msra.mxu1 %v8598_v8  ;;  %7643 = vmatprep.mubr.msk.f32.mxu1 %vm8522_vm0, %v8523_v2 }
0xa4be   :  { %7883 = vmatprep.subr.bf16.mxu1 %v8521_v1 }
0xa58f   :  { %v6329_v14 = vpop.f32.mrb[46].mxu1 }
0xa590   :  { %v6333_v15 = vadd.f32 %v6329_v14, %v8619_v13  ;;  %v7631_v16 = vpop.f32.mrb[47].mxu1 }
0xa592   :  { %8409 = vtanh.f32 %v6333_v15  ;;  %v6961_v18 = vmul.f32 -1.442695, %v6333_v15 }
0xa594   :  { %8411 = vpow2.f32 %v6961_v18 }
0xa59c   :  { %v8410_v17 = vpop.eup %8409 }
0xa59d   :  { %6343 = vrot.lane.b32.xlu0 %v8410_v17, %s8524_s25 }
0xa59e   :  { %v8412_v19 = vpop.eup %8411 }
0xa59f   :  { %v6337_v20 = vadd.f32 1.0, %v8412_v19 }
0xa5a1   :  { %8413 = vrcp.f32 %v6337_v20 }
0xa5ab   :  { %v8414_v21 = vpop.eup %8413 }
0xa5ac   :  { %v6341_v24 = vmul.f32 %v8414_v21, %v6249_v7 }
0xa60f   :  { %v6344_v22 = vpop.permute.xlu0 %6343 }
0xa610   :  { %v6346_v23 = vmul.f32 %v8414_v21, %v6344_v22 }
0xa612   :  { %6348 = vrot.lane.b32.xlu1 %v6346_v23, %s8525_s3 }
0xa684   :  { %v6349_v25 = vpop.permute.xlu1 %6348 }
0xa685   :  { %v6351_v26 = vadd.f32 %v6349_v25, %v6341_v24 }
0xa687   :  { %8415 = vtanh.f32 %v6351_v26 }
0xa691   :  { %v8416_v27 = vpop.eup %8415 }
0xa692   :  { %6354 = vrot.lane.b32.xlu0 %v8416_v27, %s8526_s26 }
0xa704   :  { %v6355_v28 = vpop.permute.xlu0 %6354 }
0xa705   :  { %v6357_v29 = vmul.f32 %v8414_v21, %v6355_v28 }
0xa707   :  { %6359 = vrot.lane.b32.xlu1 %v6357_v29, %s8527_s27 }
0xa779   :  { %v6360_v30 = vpop.permute.xlu1 %6359 }
0xa77a   :  { %6362 = vst.msk [vmem:[#allocation2 + $0x78] sm:$0x3] %vm241_vm2, %v6360_v30  ;;  %7637 = vmatmul.mubr.msk.f32.vlgmr.msra.gmra.mrb[76].mxu0 %vm68_vm1, %v6360_v30 }
0xa77b   :  { %7882 = vmatpush3.bf16.msra.mxu0 %v8598_v8  ;;  %7650 = vmatprep.mubr.msk.f32.mxu0 %vm8522_vm0, %v8523_v2 }
0xa84d   :  { %v6431_v31 = vpop.f32.mrb[76].mxu0 }
0xa84e   :  { %v6435_v32 = vadd.f32 %v6431_v31, %v8619_v13  ;;  %v7638_v33 = vpop.f32.mrb[77].mxu0 }
0xa850   :  { %8417 = vtanh.f32 %v6435_v32  ;;  %v6963_v35 = vmul.f32 -1.442695, %v6435_v32 }
0xa852   :  { %8419 = vpow2.f32 %v6963_v35 }
0xa85a   :  { %v8418_v34 = vpop.eup %8417 }
0xa85b   :  { %6445 = vrot.lane.b32.xlu0 %v8418_v34, %s8524_s25 }
0xa85c   :  { %v8420_v36 = vpop.eup %8419 }
0xa85d   :  { %v6439_v37 = vadd.f32 1.0, %v8420_v36 }
0xa85f   :  { %8421 = vrcp.f32 %v6439_v37 }
0xa869   :  { %v8422_v38 = vpop.eup %8421 }
0xa86a   :  { %v6443_v8 = vmul.f32 %v8422_v38, %v6351_v26 }
0xa8cd   :  { %v6446_v39 = vpop.permute.xlu0 %6445 }
0xa8ce   :  { %v6448_v40 = vmul.f32 %v8422_v38, %v6446_v39  ;;  %v58_v39 = vld [vmem:[#allocation3] sm:$0x1] }
0xa8d0   :  { %6450 = vrot.lane.b32.xlu1 %v6448_v40, %s8525_s3  ;;  %v8528_v40 = vmov 0  }
0xa8d1   :  { %7928 = vset.pattern.permute.xlu0 %v8528_v40 }
0xa942   :  { %v6451_v41 = vpop.permute.xlu1 %6450 }
0xa943   :  { %v6453_v42 = vadd.f32 %v6451_v41, %v6443_v8  ;;  %v6683_v41 = vld [vmem:[#allocation2 + $0x70] sm:$0xff] }
0xa945   :  { %8423 = vtanh.f32 %v6453_v42 }
0xa94f   :  { %v8424_v43 = vpop.eup %8423 }
0xa950   :  { %6456 = vrot.lane.b32.xlu0 %v8424_v43, %s8526_s26 }
0xa9c2   :  { %v6457_v44 = vpop.permute.xlu0 %6456 }
0xa9c3   :  { %v6459_v45 = vmul.f32 %v8422_v38, %v6457_v44  ;;  %v57_v44 = vld [vmem:[%s9362_s4] sm:$0x1]  ;;  %s8489_s4 = scalar_lea.vmem %s6829_s7, 16 }
0xa9c4   :  { %p8490_p2 = scmp.ne.s32.totalorder %s6829_s7, %s8489_s4  ;;  %p8495_p4 = scmp.lt.s32.totalorder %s8493_s5, %s8489_s4 }
0xa9c5   :  { %6461 = vrot.lane.b32.xlu1 %v6459_v45, %s8527_s27  ;;  %v6690_v45 = vlaneseq }
0xa9c6   :  { %p8496_p5 = por %p8495_p4, %p8494_p3 }
0xa9c7   :  { %v6691_v46 = vshrl.u32 %v6690_v45, 7 }
0xa9c8   :  { %p8497_p6 = pnand %p8496_p5, %p8490_p2 }
0xa9c9   :  { %v6692_v47 = vsub.s32 0, %v6691_v46 }
0xaa37   :  { %v6462_v49 = vpop.permute.xlu1 %6461 }
0xaa38   :  { %6464 = vst.msk [vmem:[#allocation2 + $0x7a] sm:$0x3] %vm241_vm2, %v6462_v49  ;;  %7644 = vmatmul.mubr.msk.f32.vlgmr.msra.gmra.mrb[48].mxu1 %vm68_vm1, %v6462_v49 }
0xaa39   :  { %7886 = vmatpush3.bf16.xpose.msk.msra.mxu1 %vm9298_vm3, %v7884_v50  ;;  %7685 = vmatprep.mubr.msk.f32.mxu1 %vm8522_vm0, %v8523_v2  ;;  %v6675_v2 = vld [vmem:[#allocation2 + $0x30] sm:$0xff] }
0xaa3a   :  { %7887 = vmatprep.subr.bf16.mxu1 %v8521_v1  ;;  %v7896_v58 = vpack.c.bf16 %v6676_v57, %v6675_v2 }
0xaa41   :  { %7890 = vmatpush3.bf16.xpose.msk.msra.mxu1 %vm9298_vm3, %v7888_v53 }
0xaa42   :  { %7891 = vmatprep.subr.bf16.mxu1 %v8521_v1 }
0xaa49   :  { %7894 = vmatpush3.bf16.xpose.msk.msra.mxu1 %vm9298_vm3, %v7892_v56 }
0xaa4a   :  { %7895 = vmatprep.subr.bf16.mxu1 %v8521_v1 }
0xaa51   :  { %7898 = vmatpush3.bf16.xpose.msk.msra.mxu1 %vm9298_vm3, %v7896_v58 }
0xaa52   :  { %7899 = vmatprep.subr.bf16.mxu1 %v8521_v1 }
0xaa59   :  { %7902 = vmatpush3.bf16.xpose.msk.msra.mxu1 %vm9298_vm3, %v7900_v61 }
0xaa5a   :  { %7903 = vmatprep.subr.bf16.mxu1 %v8521_v1 }
0xaa61   :  { %7906 = vmatpush3.bf16.xpose.msk.msra.mxu1 %vm9298_vm3, %v7904_v0 }
0xaa62   :  { %7907 = vmatprep.subr.bf16.mxu1 %v8521_v1 }
0xaa69   :  { %7910 = vmatpush3.bf16.xpose.msk.msra.mxu1 %vm9298_vm3, %v7908_v5 }
0xaa6a   :  { %7911 = vmatprep.subr.bf16.mxu1 %v8521_v1 }
0xab0b   :  { %v6533_v6 = vpop.f32.mrb[48].mxu1 }
0xab0c   :  { %v6537_v7 = vadd.f32 %v6533_v6, %v8619_v13  ;;  %v7645_v9 = vpop.f32.mrb[49].mxu1 }
0xab0e   :  { %8425 = vtanh.f32 %v6537_v7  ;;  %v6965_v11 = vmul.f32 -1.442695, %v6537_v7 }
0xab10   :  { %8427 = vpow2.f32 %v6965_v11 }
0xab18   :  { %v8426_v10 = vpop.eup %8425 }
0xab19   :  { %6547 = vrot.lane.b32.xlu0 %v8426_v10, %s8524_s25 }
0xab1a   :  { %v8428_v12 = vpop.eup %8427 }
0xab1b   :  { %v6541_v14 = vadd.f32 1.0, %v8428_v12 }
0xab1d   :  { %8429 = vrcp.f32 %v6541_v14 }
0xab27   :  { %v8430_v15 = vpop.eup %8429 }
0xab28   :  { %v6545_v18 = vmul.f32 %v8430_v15, %v6453_v42 }
0xab8b   :  { %v6548_v16 = vpop.permute.xlu0 %6547 }
0xab8c   :  { %v6550_v17 = vmul.f32 %v8430_v15, %v6548_v16 }
0xab8e   :  { %6552 = vrot.lane.b32.xlu1 %v6550_v17, %s8525_s3 }
0xac00   :  { %v6553_v1 = vpop.permute.xlu1 %6552 }
0xac01   :  { %v6555_v19 = vadd.f32 %v6553_v1, %v6545_v18 }
0xac03   :  { %8431 = vtanh.f32 %v6555_v19 }
0xac0d   :  { %v8432_v20 = vpop.eup %8431 }
0xac0e   :  { %6558 = vrot.lane.b32.xlu0 %v8432_v20, %s8526_s26 }
0xac80   :  { %v6559_v21 = vpop.permute.xlu0 %6558 }
0xac81   :  { %v6561_v22 = vmul.f32 %v8430_v15, %v6559_v21 }
0xac83   :  { %6563 = vrot.lane.b32.xlu1 %v6561_v22, %s8527_s27 }
0xacf5   :  { %v6564_v23 = vpop.permute.xlu1 %6563 }
0xacf6   :  { %6566 = vst.msk [vmem:[#allocation2 + $0x7c] sm:$0x3] %vm241_vm2, %v6564_v23  ;;  %7651 = vmatmul.mubr.msk.f32.vlgmr.msra.gmra.mrb[78].mxu0 %vm68_vm1, %v6564_v23 }
0xadc9   :  { %v6635_v24 = vpop.f32.mrb[78].mxu0 }
0xadca   :  { %v6639_v25 = vadd.f32 %v6635_v24, %v8619_v13  ;;  %v7652_v26 = vpop.f32.mrb[79].mxu0 }
0xadcc   :  { %8433 = vtanh.f32 %v6639_v25  ;;  %v6967_v28 = vmul.f32 -1.442695, %v6639_v25 }
0xadce   :  { %8435 = vpow2.f32 %v6967_v28 }
0xadd6   :  { %v8434_v27 = vpop.eup %8433 }
0xadd7   :  { %6649 = vrot.lane.b32.xlu0 %v8434_v27, %s8524_s25 }
0xadd8   :  { %v8436_v29 = vpop.eup %8435 }
0xadd9   :  { %v6643_v30 = vadd.f32 1.0, %v8436_v29 }
0xaddb   :  { %8437 = vrcp.f32 %v6643_v30 }
0xade5   :  { %v8438_v31 = vpop.eup %8437 }
0xade6   :  { %v6647_v34 = vmul.f32 %v8438_v31, %v6555_v19 }
0xae49   :  { %v6650_v32 = vpop.permute.xlu0 %6649 }
0xae4a   :  { %v6652_v33 = vmul.f32 %v8438_v31, %v6650_v32 }
0xae4c   :  { %6654 = vrot.lane.b32.xlu1 %v6652_v33, %s8525_s3 }
0xaebe   :  { %v6655_v35 = vpop.permute.xlu1 %6654 }
0xaebf   :  { %v6657_v36 = vadd.f32 %v6655_v35, %v6647_v34 }
0xaec1   :  { %8439 = vtanh.f32 %v6657_v36 }
0xaecb   :  { %v8440_v13 = vpop.eup %8439 }
0xaecc   :  { %6660 = vrot.lane.b32.xlu0 %v8440_v13, %s8526_s26 }
0xaed0   :  { %6687 = vperm.xlu0 %7928, %v58_v39  }
0xaf3e   :  { %v6661_v37 = vpop.permute.xlu0 %6660 }
0xaf3f   :  { %v6663_v38 = vmul.f32 %v8438_v31, %v6661_v37 }
0xaf41   :  { %6665 = vrot.lane.b32.xlu1 %v6663_v38, %s8527_s27 }
0xaf4f   :  { %v6688_v49 = vpop.permute.xlu0 %6687 }
0xaf50   :  { %v6693_v50 = vrot.slane %v6688_v49, %v6692_v47 }
0xafb3   :  { %v6666_v8 = vpop.permute.xlu1 %6665 }
0xafb4   :  { %6668 = vst.msk [vmem:[#allocation2 + $0x7e] sm:$0x3] %vm241_vm2, %v6666_v8 }
0xafbb   :  { %v6684_v42 = vld [vmem:[#allocation2 + $0x78] sm:$0xff] }
0xafbc   :  { %v7912_v43 = vpack.c.bf16 %v6684_v42, %v6683_v41 }
0xafbe   :  { %7914 = vmatpush3.bf16.xpose.msk.msra.mxu1 %vm9298_vm3, %v7912_v43 }
0xafc5   :  { %7686 = vmatmul.mubr.msk.f32.vlgmr.msra.gmra.mrb[50].mxu1 %vm68_vm1, %v57_v44 }
0xb098   :  { %v6811_v51 = vpop.f32.mrb[50].mxu1 }
0xb099   :  { %v6812_v52 = vadd.f32 %v6811_v51, %v6693_v50  ;;  %v7687_v53 = vpop.f32.mrb[51].mxu1 }
0xb09b   :  { %v6985_v54 = vmul.f32 -1.442695, %v6812_v52 }
0xb09d   :  { %8441 = vpow2.f32 %v6985_v54 }
0xb0a7   :  { %v8442_v55 = vpop.eup %8441 }
0xb0a8   :  { %v6818_v56 = vadd.f32 1.0, %v8442_v55 }
0xb0aa   :  { %8443 = vrcp.f32 %v6818_v56 }
0xb0b4   :  { %v8444_v48 = vpop.eup %8443 }
0xb0b5   :  { %6821 = vst [vmem:[#allocation9] sm:$0x1] %v8444_v48 }
0xb0b6   :  { %8500 = shalt.err (!%p8497_p6)
}
0xb0b7   :  { %s8501_s10 = scalar_lea.hbm %s9364_s6, 16 }
0xb0b8   :  { %p8502_p7 = scmp.ne.s32.totalorder %s9364_s6, %s8501_s10  ;;  %p8505_p8 = scmp.lt.u32.totalorder %s8501_s10, %s9364_s6 }
0xb0ba   :  { %p8507_p9 = pnand %p8505_p8, %p8502_p7 }
0xb0bc   :  { %8510 = shalt.err (!%p8507_p9)
}
0xb0bd   :  { %6831 = dma.vmem_to_hbm [thread:$0]  %s6829_s7, 16, %s9364_s6, [#allocation6]  }
0xb0be   :  { %8515 = dma.done.wait [#allocation6], 16  }
0xb0bf   :  { %8516 = vsyncadd [#allocation6], 4294967280 }
0xb0c0   :  { %6835 = vsyncpa [#allocation5], 1 }
0xb0c1   :  { %6836 = vsyncpa [#allocation8], 1 }
0xb0c2   :  { %6837 = vsyncpa [#allocation6], 1 }

</bundles_post_ra>
